<compile_context>
chip_gen: v7x
topology: tpu7x:2x2x1
jax: 0.10.0
libtpu: 0.0.40
codegen_flags: <defaults>
</compile_context>

<pallas_src>
import jax
import jax.numpy as jnp
from jax import lax
from jax.experimental import pallas as pl
from jax.experimental.pallas import tpu as pltpu

# ---- small, module-consistent hyperparameters ----
N = 2                # batch
S = 8                # sequence length (src_len == trg_len, required by the reference forward)
NS = N * S           # flattened rows
EMBED = 32           # embed_size
HEADS = 4
HEAD_DIM = EMBED // HEADS
FWD_EXP = 2          # forward_expansion
FF_HID = FWD_EXP * EMBED
NUM_LAYERS = 2
MASK_VOCAB = 50      # mask_vocab_size
VOCAB_PAD = 64       # padded vocab rows for the in-kernel one-hot gather
MAX_LEN = 16         # max_length
TRG_VOCAB = 50       # TODO(synk): `trg_vocab_size` is an undefined global in the reference module; fixed to 50.
OUT_PAD = 128        # lane-dense padded width for the final projection output
VEC_PAD = 128        # lane-padded width of the bias/norm vector slab
LN_EPS = 1e-5

# matrix slab layout (per layer, 8 matrices of shape (E, E))
M_A1_WV, M_A1_WK, M_A1_WQ, M_A1_WO, M_A2_WV, M_A2_WK, M_A2_WQ, M_A2_WO = range(8)
NUM_MAT = 8
# vector slab layout (per layer, 10 rows of width VEC_PAD)
R_A1_BO, R_NRM_W, R_NRM_B, R_A2_BO, R_N1_W, R_N1_B, R_FFB1, R_FFB2, R_N2_W, R_N2_B = range(10)
NUM_VEC = 10


# --------------------------- fused Pallas kernel ------------------------------

def _decoder_kernel(tok_ref, enc_ref, src_mask_ref, trg_mask_ref,
                    wemb_ref, pos_ref, w_ref, ffw1_ref, ffw2_ref,
                    vec_ref, fcw_ref, fcb_ref, o_ref):
    """Whole decoder stack for the whole (flattened) batch, one invocation."""

    # ---- embedding lookup as a one-hot matmul (uses the otherwise idle MXU) ----
    tok = tok_ref[...]                                              # (NS, 1) int32
    iota = lax.broadcasted_iota(jnp.int32, (NS, VOCAB_PAD), 1)
    onehot = (iota == tok).astype(jnp.float32)                      # (NS, VOCAB_PAD)
    x = jnp.dot(onehot, wemb_ref[...],
                preferred_element_type=jnp.float32) + pos_ref[...]  # (NS, E)
    enc = enc_ref[...]                                              # (NS, E)

    # ---- additive masks: computed once, hoisted out of layer & head loops ----
    # NOTE: additive masking is numerically identical to the reference's
    # masked_fill(-1e20) for partially-masked rows (masked logits underflow to 0
    # after softmax).  A *fully*-masked row would fall back to a softmax over the
    # raw energies instead of the reference's uniform distribution; no mask in
    # this model fully masks a row (causal trg mask keeps the diagonal, src mask
    # is all-ones).
    NEG = jnp.float32(-1e20)
    trg_negs = [jnp.where(trg_mask_ref[b] == 0.0, NEG, 0.0) for b in range(N)]  # (S, S)
    src_negs = [jnp.where(src_mask_ref[b] == 0.0, NEG, 0.0) for b in range(N)]  # (1, S)

    def mat(l, m):                       # (E, E) matrix slice, static index
        return w_ref[l * NUM_MAT + m]

    def vec(l, row, width=EMBED):        # (1, width) bias/norm row, static slice
        r = l * NUM_VEC + row
        return vec_ref[r:r + 1, :width]

    def attention(v_flat, q_flat, k_flat, negs, wv, wk, wq_scaled, wo_t, bo):
        # One (NS,E)x(E,E) matmul per projection: heads are block-diagonal
        # (kron(I_heads, W.T)) and the 1/sqrt(E) scale is folded into wq.
        # The whole batch shares the weights (flattened rows).
        vh = jnp.dot(v_flat, wv, preferred_element_type=jnp.float32)
        kh = jnp.dot(k_flat, wk, preferred_element_type=jnp.float32)
        qh = jnp.dot(q_flat, wq_scaled, preferred_element_type=jnp.float32)
        rows = []
        for b in range(N):                   # static: batches must not mix in softmax
            r0, r1 = b * S, (b + 1) * S
            neg = negs[b]
            ctxs = []
            for h in range(HEADS):           # static: heads independent (no carried acc)
                c0, c1 = h * HEAD_DIM, (h + 1) * HEAD_DIM
                energy = lax.dot_general(
                    qh[r0:r1, c0:c1], kh[r0:r1, c0:c1],
                    (((1,), (1,)), ((), ())),
                    preferred_element_type=jnp.float32) + neg        # (S, S)
                m = jnp.max(energy, axis=-1, keepdims=True)
                p = jnp.exp(energy - m)
                att = p * pl.reciprocal(jnp.sum(p, axis=-1, keepdims=True), approx=True)
                ctxs.append(jnp.dot(att, vh[r0:r1, c0:c1],
                                    preferred_element_type=jnp.float32))  # (S, D)
            rows.append(jnp.concatenate(ctxs, axis=-1))               # (S, E)
        ctx_full = jnp.concatenate(rows, axis=0)                      # (NS, E)
        # single output projection instead of a per-head serial accumulation
        return jnp.dot(ctx_full, wo_t, preferred_element_type=jnp.float32) + bo

    def layernorm(y, g, b):
        # one-pass LN: the two reductions are independent and overlap in the XLU
        inv_e = jnp.float32(1.0 / EMBED)
        mean = jnp.sum(y, axis=-1, keepdims=True) * inv_e
        ex2 = jnp.sum(y * y, axis=-1, keepdims=True) * inv_e
        var = ex2 - mean * mean
        return (y - mean) * lax.rsqrt(var + jnp.float32(LN_EPS)) * g + b

    for l in range(NUM_LAYERS):              # static unroll over layers
        # DecoderBlock self-attention: values=x, queries=x, keys=x, trg_mask
        att = attention(x, x, x, trg_negs,
                        mat(l, M_A1_WV), mat(l, M_A1_WK), mat(l, M_A1_WQ),
                        mat(l, M_A1_WO), vec(l, R_A1_BO))
        query = layernorm(att + x, vec(l, R_NRM_W), vec(l, R_NRM_B))
        # TransformerBlock attention -- faithfully reproduces the reference's
        # swapped call order: values=enc_out, queries=enc_out, keys=query.
        att2 = attention(enc, enc, query, src_negs,
                         mat(l, M_A2_WV), mat(l, M_A2_WK), mat(l, M_A2_WQ),
                         mat(l, M_A2_WO), vec(l, R_A2_BO))
        x2 = layernorm(att2 + query, vec(l, R_N1_W), vec(l, R_N1_B))
        hdn = jnp.maximum(
            jnp.dot(x2, ffw1_ref[l], preferred_element_type=jnp.float32)
            + vec(l, R_FFB1, FF_HID), 0.0)
        ff = jnp.dot(hdn, ffw2_ref[l], preferred_element_type=jnp.float32) + vec(l, R_FFB2)
        x = layernorm(ff + x2, vec(l, R_N2_W), vec(l, R_N2_B))
        # nn.Dropout: identity at inference

    # Final projection: lane-dense (padded to OUT_PAD=128) -> unmasked stores.
    o_ref[...] = jnp.dot(x, fcw_ref[...], preferred_element_type=jnp.float32) + fcb_ref[...]


# --------------------------- wrapper -----------------------------------------

@jax.jit
def decoder_forward(packed, tokens, enc_out, src_mask, trg_mask):
    """Fused decoder forward.

    Returns lane-dense padded logits of shape (N, S, OUT_PAD); consumers slice
    [:, :, :TRG_VOCAB] (kept padded per perf feedback to avoid an extra HBM copy).
    """
    n, s = tokens.shape
    # cheap bitcast-reshapes only; no gather / broadcast / slice ops out here
    tok_col = tokens.reshape(n * s, 1).astype(jnp.int32)
    enc_flat = enc_out.reshape(n * s, EMBED).astype(jnp.float32)
    src_m = src_mask.astype(jnp.float32).reshape(n, 1, s)      # un-broadcast
    trg_m = trg_mask.astype(jnp.float32).reshape(n, s, s)      # un-broadcast

    args = (tok_col, enc_flat, src_m, trg_m,
            packed["word_emb"], packed["pos_slab"], packed["w_slab"],
            packed["ff_w1"], packed["ff_w2"], packed["vec_slab"],
            packed["fc_w"], packed["fc_b"])

    out = pl.pallas_call(
        _decoder_kernel,
        out_shape=jax.ShapeDtypeStruct((n * s, OUT_PAD), jnp.float32),
        in_specs=[pl.BlockSpec(memory_space=pltpu.MemorySpace.VMEM)] * len(args),
        out_specs=pl.BlockSpec(memory_space=pltpu.MemorySpace.VMEM),
    )(*args)
    return out.reshape(n, s, OUT_PAD)


# --------------------------- parameter packing (once, at init) ---------------

def pack_params(params):
    """Pre-transpose / block-diagonalize / pad / consolidate all weights once."""
    scale = jnp.float32(1.0 / (float(EMBED) ** 0.5))
    eye_h = jnp.eye(HEADS, dtype=jnp.float32)

    def attn_mats(a):
        return [jnp.kron(eye_h, a["wv"].T),            # (E, E) block-diagonal
                jnp.kron(eye_h, a["wk"].T),
                jnp.kron(eye_h, a["wq"].T) * scale,    # softmax scale folded in
                a["wo"].T]                             # (E, E)

    def pad_row(v):
        return jnp.zeros((VEC_PAD,), jnp.float32).at[:v.shape[0]].set(v)

    w_list, vec_rows, ffw1, ffw2 = [], [], [], []
    for lp in params["layers"]:
        tb = lp["tb"]
        w_list += attn_mats(lp["attn"]) + attn_mats(tb["attn"])
        vec_rows += [pad_row(lp["attn"]["bo"]),
                     pad_row(lp["norm_w"]), pad_row(lp["norm_b"]),
                     pad_row(tb["attn"]["bo"]),
                     pad_row(tb["norm1_w"]), pad_row(tb["norm1_b"]),
                     pad_row(tb["ff_b1"]), pad_row(tb["ff_b2"]),
                     pad_row(tb["norm2_w"]), pad_row(tb["norm2_b"])]
        ffw1.append(tb["ff_w1"].T)                     # (E, FF)
        ffw2.append(tb["ff_w2"].T)                     # (FF, E)

    word_emb_pad = jnp.zeros((VOCAB_PAD, EMBED), jnp.float32).at[:MASK_VOCAB].set(
        params["word_emb"])
    # positional rows pre-tiled for the fixed (N, S) of this kernel instance
    pos_slab = jnp.tile(params["pos_emb"][:S], (N, 1))               # (NS, E)
    fc_w_pad = jnp.zeros((EMBED, OUT_PAD), jnp.float32).at[:, :TRG_VOCAB].set(params["fc_w"].T)
    fc_b_pad = jnp.zeros((1, OUT_PAD), jnp.float32).at[:, :TRG_VOCAB].set(params["fc_b"][None, :])

    return dict(
        word_emb=word_emb_pad,                         # (VOCAB_PAD, E)
        pos_slab=pos_slab,                             # (NS, E)
        w_slab=jnp.stack(w_list, axis=0),              # (L*8, E, E)
        vec_slab=jnp.stack(vec_rows, axis=0),          # (L*10, 128)
        ff_w1=jnp.stack(ffw1, axis=0),                 # (L, E, FF)
        ff_w2=jnp.stack(ffw2, axis=0),                 # (L, FF, E)
        fc_w=fc_w_pad, fc_b=fc_b_pad,
    )


# --------------------------- deterministic parameter init --------------------

def _dense(key, out_f, in_f):
    kw, kb = jax.random.split(key)
    w = jax.random.normal(kw, (out_f, in_f), jnp.float32) * 0.05
    b = jax.random.normal(kb, (out_f,), jnp.float32) * 0.05
    return w, b


def _init_attention(key):
    k1, k2, k3, k4 = jax.random.split(key, 4)
    wv = jax.random.normal(k1, (HEAD_DIM, HEAD_DIM), jnp.float32) * 0.05
    wk = jax.random.normal(k2, (HEAD_DIM, HEAD_DIM), jnp.float32) * 0.05
    wq = jax.random.normal(k3, (HEAD_DIM, HEAD_DIM), jnp.float32) * 0.05
    wo, bo = _dense(k4, EMBED, EMBED)
    return dict(wv=wv, wk=wk, wq=wq, wo=wo, bo=bo)


def _init_layer(key):
    k1, k2, k3, k4 = jax.random.split(key, 4)
    w1, b1 = _dense(k3, FF_HID, EMBED)
    w2, b2 = _dense(k4, EMBED, FF_HID)
    return dict(
        attn=_init_attention(k1),
        norm_w=jnp.ones((EMBED,), jnp.float32),
        norm_b=jnp.zeros((EMBED,), jnp.float32),
        tb=dict(
            attn=_init_attention(k2),
            norm1_w=jnp.ones((EMBED,), jnp.float32),
            norm1_b=jnp.zeros((EMBED,), jnp.float32),
            norm2_w=jnp.ones((EMBED,), jnp.float32),
            norm2_b=jnp.zeros((EMBED,), jnp.float32),
            ff_w1=w1, ff_b1=b1, ff_w2=w2, ff_b2=b2,
        ),
    )


def init_params(key):
    k_we, k_pe, k_fc, *k_layers = jax.random.split(key, 3 + NUM_LAYERS)
    word_emb = jax.random.normal(k_we, (MASK_VOCAB, EMBED), jnp.float32) * 0.05
    pos_emb = jax.random.normal(k_pe, (MAX_LEN, EMBED), jnp.float32) * 0.05
    fc_w, fc_b = _dense(k_fc, TRG_VOCAB, EMBED)
    layers = [_init_layer(k) for k in k_layers]
    return dict(word_emb=word_emb, pos_emb=pos_emb, fc_w=fc_w, fc_b=fc_b, layers=layers)


# --------------------------- pure-JAX reference (for a sanity check) ---------

def _ref_layernorm(x, g, b):
    m = jnp.mean(x, axis=-1, keepdims=True)
    v = jnp.mean(jnp.square(x - m), axis=-1, keepdims=True)
    return (x - m) / jnp.sqrt(v + LN_EPS) * g + b


def _ref_attention(p, values, queries, keys, mask):
    n, lv, _ = values.shape
    lq, lk = queries.shape[1], keys.shape[1]
    v = values.reshape(n, lv, HEADS, HEAD_DIM) @ p["wv"].T
    k = keys.reshape(n, lk, HEADS, HEAD_DIM) @ p["wk"].T
    q = queries.reshape(n, lq, HEADS, HEAD_DIM) @ p["wq"].T
    energy = jnp.einsum('nqhd,nkhd->nhqk', q, k)
    energy = jnp.where(mask == 0, jnp.float32(-1e20), energy)
    att = jax.nn.softmax(energy / (float(EMBED) ** 0.5), axis=3)
    out = jnp.einsum('nhql,nlhd->nqhd', att, v).reshape(n, lq, EMBED)
    return out @ p["wo"].T + p["bo"]


def _ref_transformer_block(p, value, key_, query, mask):
    attention = _ref_attention(p["attn"], value, key_, query, mask)
    x = _ref_layernorm(attention + query, p["norm1_w"], p["norm1_b"])
    fwd = jnp.maximum(x @ p["ff_w1"].T + p["ff_b1"], 0.0) @ p["ff_w2"].T + p["ff_b2"]
    return _ref_layernorm(fwd + x, p["norm2_w"], p["norm2_b"])


def decoder_reference(params, tokens, enc_out, src_mask, trg_mask):
    n, s = tokens.shape
    x = params["word_emb"][tokens] + params["pos_emb"][jnp.arange(s)][None, :, :]
    for lp in params["layers"]:
        attention = _ref_attention(lp["attn"], x, x, x, trg_mask)
        query = _ref_layernorm(attention + x, lp["norm_w"], lp["norm_b"])
        x = _ref_transformer_block(lp["tb"], enc_out, enc_out, query, src_mask)
    return x @ params["fc_w"].T + params["fc_b"]


# --------------------------- main --------------------------------------------

if __name__ == "__main__":
    key = jax.random.PRNGKey(0)
    kp, kt, ke = jax.random.split(key, 3)
    params = init_params(kp)
    packed = pack_params(params)   # one-time weight preprocessing

    tokens = jax.random.randint(kt, (N, S), 0, MASK_VOCAB, dtype=jnp.int32)
    enc_out = jax.random.normal(ke, (N, S, EMBED), jnp.float32)
    src_mask = jnp.ones((N, 1, 1, S), jnp.float32)
    trg_mask = jnp.broadcast_to(jnp.tril(jnp.ones((S, S), jnp.float32)), (N, 1, S, S))

    out_pad = decoder_forward(packed, tokens, enc_out, src_mask, trg_mask)
    out_pad = jax.block_until_ready(out_pad)
    assert out_pad.shape == (N, S, OUT_PAD), out_pad.shape

    # consumer-side slice to the module's logical output width
    logits = out_pad[:, :, :TRG_VOCAB]
    assert logits.shape == (N, S, TRG_VOCAB), logits.shape
    assert bool(jnp.all(jnp.isfinite(logits)))

    # loose tolerance: kernel uses the approximate EUP reciprocal for softmax
    ref = decoder_reference(params, tokens, enc_out, src_mask, trg_mask)
    max_err = float(jnp.max(jnp.abs(logits - ref)))
    assert max_err < 5e-2, f"max abs err vs reference: {max_err}"

    print("KERNEL_OK")
</pallas_src>

<mosaic_0001>
module attributes {stable_mosaic.version = 11 : i64} {
  func.func @_decoder_kernel(%arg0: memref<16x1xi32, #tpu.memory_space<vmem>>, %arg1: memref<16x32xf32, #tpu.memory_space<vmem>>, %arg2: memref<2x1x8xf32, #tpu.memory_space<vmem>>, %arg3: memref<2x8x8xf32, #tpu.memory_space<vmem>>, %arg4: memref<64x32xf32, #tpu.memory_space<vmem>>, %arg5: memref<16x32xf32, #tpu.memory_space<vmem>>, %arg6: memref<16x32x32xf32, #tpu.memory_space<vmem>>, %arg7: memref<2x32x64xf32, #tpu.memory_space<vmem>>, %arg8: memref<2x64x32xf32, #tpu.memory_space<vmem>>, %arg9: memref<20x128xf32, #tpu.memory_space<vmem>>, %arg10: memref<32x128xf32, #tpu.memory_space<vmem>>, %arg11: memref<1x128xf32, #tpu.memory_space<vmem>>, %arg12: memref<16x128xf32, #tpu.memory_space<vmem>>) attributes {dimension_semantics = [], scalar_prefetch = 0 : i64, scratch_operands = 0 : i64, tpu.core_type = #tpu.core_type<tc>} {
    %c0 = arith.constant 0 : index
    %c0_0 = arith.constant 0 : index
    %0 = vector.load %arg0[%c0, %c0_0] : memref<16x1xi32, #tpu.memory_space<vmem>>, vector<16x1xi32>
    %1 = tpu.iota {dimensions = array<i32: 1>} : vector<16x64xi32>
    %2 = vector.broadcast %0 : vector<16x1xi32> to vector<16x64xi32>
    %3 = arith.cmpi eq, %1, %2 : vector<16x64xi32>
    %4 = arith.extui %3 : vector<16x64xi1> to vector<16x64xi32>
    %5 = arith.sitofp %4 : vector<16x64xi32> to vector<16x64xf32>
    %c0_1 = arith.constant 0 : index
    %c0_2 = arith.constant 0 : index
    %6 = vector.load %arg4[%c0_1, %c0_2] : memref<64x32xf32, #tpu.memory_space<vmem>>, vector<64x32xf32>
    %cst = arith.constant dense<0.000000e+00> : vector<16x32xf32>
    %7 = tpu.matmul %5, %6, %cst {dimension_numbers = #tpu.dot_dimension_numbers<[1], [0], [0], [1], [0, 0, 1, 1], [], []>} : vector<16x64xf32>, vector<64x32xf32>, vector<16x32xf32> -> vector<16x32xf32>
    %c0_3 = arith.constant 0 : index
    %c0_4 = arith.constant 0 : index
    %8 = vector.load %arg5[%c0_3, %c0_4] : memref<16x32xf32, #tpu.memory_space<vmem>>, vector<16x32xf32>
    %9 = arith.addf %7, %8 : vector<16x32xf32>
    %c0_5 = arith.constant 0 : index
    %c0_6 = arith.constant 0 : index
    %10 = vector.load %arg1[%c0_5, %c0_6] : memref<16x32xf32, #tpu.memory_space<vmem>>, vector<16x32xf32>
    %c0_7 = arith.constant 0 : index
    %c0_8 = arith.constant 0 : index
    %c0_9 = arith.constant 0 : index
    %11 = vector.load %arg3[%c0_7, %c0_8, %c0_9] : memref<2x8x8xf32, #tpu.memory_space<vmem>>, vector<1x8x8xf32>
    %12 = vector.shape_cast %11 : vector<1x8x8xf32> to vector<8x8xf32>
    %cst_10 = arith.constant 0.000000e+00 : f32
    %13 = vector.broadcast %cst_10 : f32 to vector<8x8xf32>
    %14 = arith.cmpf oeq, %12, %13 : vector<8x8xf32>
    %cst_11 = arith.constant -1.000000e+20 : f32
    %cst_12 = arith.constant 0.000000e+00 : f32
    %15 = vector.broadcast %cst_11 : f32 to vector<8x8xf32>
    %16 = vector.broadcast %cst_12 : f32 to vector<8x8xf32>
    %17 = arith.select %14, %15, %16 : vector<8x8xi1>, vector<8x8xf32>
    %c1 = arith.constant 1 : index
    %c0_13 = arith.constant 0 : index
    %c0_14 = arith.constant 0 : index
    %18 = vector.load %arg3[%c1, %c0_13, %c0_14] : memref<2x8x8xf32, #tpu.memory_space<vmem>>, vector<1x8x8xf32>
    %19 = vector.shape_cast %18 : vector<1x8x8xf32> to vector<8x8xf32>
    %cst_15 = arith.constant 0.000000e+00 : f32
    %20 = vector.broadcast %cst_15 : f32 to vector<8x8xf32>
    %21 = arith.cmpf oeq, %19, %20 : vector<8x8xf32>
    %cst_16 = arith.constant -1.000000e+20 : f32
    %cst_17 = arith.constant 0.000000e+00 : f32
    %22 = vector.broadcast %cst_16 : f32 to vector<8x8xf32>
    %23 = vector.broadcast %cst_17 : f32 to vector<8x8xf32>
    %24 = arith.select %21, %22, %23 : vector<8x8xi1>, vector<8x8xf32>
    %c0_18 = arith.constant 0 : index
    %c0_19 = arith.constant 0 : index
    %c0_20 = arith.constant 0 : index
    %25 = vector.load %arg2[%c0_18, %c0_19, %c0_20] : memref<2x1x8xf32, #tpu.memory_space<vmem>>, vector<1x1x8xf32>
    %26 = vector.shape_cast %25 : vector<1x1x8xf32> to vector<1x8xf32>
    %cst_21 = arith.constant 0.000000e+00 : f32
    %27 = vector.broadcast %cst_21 : f32 to vector<1x8xf32>
    %28 = arith.cmpf oeq, %26, %27 : vector<1x8xf32>
    %cst_22 = arith.constant -1.000000e+20 : f32
    %cst_23 = arith.constant 0.000000e+00 : f32
    %29 = vector.broadcast %cst_22 : f32 to vector<1x8xf32>
    %30 = vector.broadcast %cst_23 : f32 to vector<1x8xf32>
    %31 = arith.select %28, %29, %30 : vector<1x8xi1>, vector<1x8xf32>
    %c1_24 = arith.constant 1 : index
    %c0_25 = arith.constant 0 : index
    %c0_26 = arith.constant 0 : index
    %32 = vector.load %arg2[%c1_24, %c0_25, %c0_26] : memref<2x1x8xf32, #tpu.memory_space<vmem>>, vector<1x1x8xf32>
    %33 = vector.shape_cast %32 : vector<1x1x8xf32> to vector<1x8xf32>
    %cst_27 = arith.constant 0.000000e+00 : f32
    %34 = vector.broadcast %cst_27 : f32 to vector<1x8xf32>
    %35 = arith.cmpf oeq, %33, %34 : vector<1x8xf32>
    %cst_28 = arith.constant -1.000000e+20 : f32
    %cst_29 = arith.constant 0.000000e+00 : f32
    %36 = vector.broadcast %cst_28 : f32 to vector<1x8xf32>
    %37 = vector.broadcast %cst_29 : f32 to vector<1x8xf32>
    %38 = arith.select %35, %36, %37 : vector<1x8xi1>, vector<1x8xf32>
    %c0_30 = arith.constant 0 : index
    %c0_31 = arith.constant 0 : index
    %c0_32 = arith.constant 0 : index
    %39 = vector.load %arg6[%c0_30, %c0_31, %c0_32] : memref<16x32x32xf32, #tpu.memory_space<vmem>>, vector<1x32x32xf32>
    %40 = vector.shape_cast %39 : vector<1x32x32xf32> to vector<32x32xf32>
    %c1_33 = arith.constant 1 : index
    %c0_34 = arith.constant 0 : index
    %c0_35 = arith.constant 0 : index
    %41 = vector.load %arg6[%c1_33, %c0_34, %c0_35] : memref<16x32x32xf32, #tpu.memory_space<vmem>>, vector<1x32x32xf32>
    %42 = vector.shape_cast %41 : vector<1x32x32xf32> to vector<32x32xf32>
    %c2 = arith.constant 2 : index
    %c0_36 = arith.constant 0 : index
    %c0_37 = arith.constant 0 : index
    %43 = vector.load %arg6[%c2, %c0_36, %c0_37] : memref<16x32x32xf32, #tpu.memory_space<vmem>>, vector<1x32x32xf32>
    %44 = vector.shape_cast %43 : vector<1x32x32xf32> to vector<32x32xf32>
    %c3 = arith.constant 3 : index
    %c0_38 = arith.constant 0 : index
    %c0_39 = arith.constant 0 : index
    %45 = vector.load %arg6[%c3, %c0_38, %c0_39] : memref<16x32x32xf32, #tpu.memory_space<vmem>>, vector<1x32x32xf32>
    %46 = vector.shape_cast %45 : vector<1x32x32xf32> to vector<32x32xf32>
    %c0_40 = arith.constant 0 : index
    %c0_41 = arith.constant 0 : index
    %47 = vector.load %arg9[%c0_40, %c0_41] : memref<20x128xf32, #tpu.memory_space<vmem>>, vector<1x32xf32>
    %cst_42 = arith.constant dense<0.000000e+00> : vector<16x32xf32>
    %48 = tpu.matmul %9, %40, %cst_42 {dimension_numbers = #tpu.dot_dimension_numbers<[1], [0], [0], [1], [0, 0, 1, 1], [], []>} : vector<16x32xf32>, vector<32x32xf32>, vector<16x32xf32> -> vector<16x32xf32>
    %cst_43 = arith.constant dense<0.000000e+00> : vector<16x32xf32>
    %49 = tpu.matmul %9, %42, %cst_43 {dimension_numbers = #tpu.dot_dimension_numbers<[1], [0], [0], [1], [0, 0, 1, 1], [], []>} : vector<16x32xf32>, vector<32x32xf32>, vector<16x32xf32> -> vector<16x32xf32>
    %cst_44 = arith.constant dense<0.000000e+00> : vector<16x32xf32>
    %50 = tpu.matmul %9, %44, %cst_44 {dimension_numbers = #tpu.dot_dimension_numbers<[1], [0], [0], [1], [0, 0, 1, 1], [], []>} : vector<16x32xf32>, vector<32x32xf32>, vector<16x32xf32> -> vector<16x32xf32>
    %51 = vector.extract_strided_slice %50 {offsets = [0, 0], sizes = [8, 8], strides = [1, 1]} : vector<16x32xf32> to vector<8x8xf32>
    %52 = vector.extract_strided_slice %49 {offsets = [0, 0], sizes = [8, 8], strides = [1, 1]} : vector<16x32xf32> to vector<8x8xf32>
    %cst_45 = arith.constant dense<0.000000e+00> : vector<8x8xf32>
    %53 = tpu.matmul %51, %52, %cst_45 {dimension_numbers = #tpu.dot_dimension_numbers<[1], [1], [0], [0], [0, 0, 1, 0], [], []>} : vector<8x8xf32>, vector<8x8xf32>, vector<8x8xf32> -> vector<8x8xf32>
    %54 = arith.addf %53, %17 : vector<8x8xf32>
    %cst_46 = arith.constant dense<0xFF800000> : vector<8xf32>
    %55 = vector.multi_reduction <maximumf>, %54, %cst_46 [1] : vector<8x8xf32> to vector<8xf32>
    %56 = vector.shape_cast %55 : vector<8xf32> to vector<8x1xf32>
    %57 = vector.broadcast %56 : vector<8x1xf32> to vector<8x8xf32>
    %58 = arith.subf %54, %57 : vector<8x8xf32>
    %59 = math.exp %58 : vector<8x8xf32>
    %cst_47 = arith.constant dense<0.000000e+00> : vector<8xf32>
    %60 = vector.multi_reduction <add>, %59, %cst_47 [1] : vector<8x8xf32> to vector<8xf32>
    %61 = vector.shape_cast %60 : vector<8xf32> to vector<8x1xf32>
    %62 = tpu.reciprocal %61 {approx = true} : vector<8x1xf32> -> vector<8x1xf32>
    %63 = vector.broadcast %62 : vector<8x1xf32> to vector<8x8xf32>
    %64 = arith.mulf %59, %63 : vector<8x8xf32>
    %65 = vector.extract_strided_slice %48 {offsets = [0, 0], sizes = [8, 8], strides = [1, 1]} : vector<16x32xf32> to vector<8x8xf32>
    %cst_48 = arith.constant dense<0.000000e+00> : vector<8x8xf32>
    %66 = tpu.matmul %64, %65, %cst_48 {dimension_numbers = #tpu.dot_dimension_numbers<[1], [0], [0], [1], [0, 0, 1, 1], [], []>} : vector<8x8xf32>, vector<8x8xf32>, vector<8x8xf32> -> vector<8x8xf32>
    %67 = vector.extract_strided_slice %50 {offsets = [0, 8], sizes = [8, 8], strides = [1, 1]} : vector<16x32xf32> to vector<8x8xf32>
    %68 = vector.extract_strided_slice %49 {offsets = [0, 8], sizes = [8, 8], strides = [1, 1]} : vector<16x32xf32> to vector<8x8xf32>
    %cst_49 = arith.constant dense<0.000000e+00> : vector<8x8xf32>
    %69 = tpu.matmul %67, %68, %cst_49 {dimension_numbers = #tpu.dot_dimension_numbers<[1], [1], [0], [0], [0, 0, 1, 0], [], []>} : vector<8x8xf32>, vector<8x8xf32>, vector<8x8xf32> -> vector<8x8xf32>
    %70 = arith.addf %69, %17 : vector<8x8xf32>
    %cst_50 = arith.constant dense<0xFF800000> : vector<8xf32>
    %71 = vector.multi_reduction <maximumf>, %70, %cst_50 [1] : vector<8x8xf32> to vector<8xf32>
    %72 = vector.shape_cast %71 : vector<8xf32> to vector<8x1xf32>
    %73 = vector.broadcast %72 : vector<8x1xf32> to vector<8x8xf32>
    %74 = arith.subf %70, %73 : vector<8x8xf32>
    %75 = math.exp %74 : vector<8x8xf32>
    %cst_51 = arith.constant dense<0.000000e+00> : vector<8xf32>
    %76 = vector.multi_reduction <add>, %75, %cst_51 [1] : vector<8x8xf32> to vector<8xf32>
    %77 = vector.shape_cast %76 : vector<8xf32> to vector<8x1xf32>
    %78 = tpu.reciprocal %77 {approx = true} : vector<8x1xf32> -> vector<8x1xf32>
    %79 = vector.broadcast %78 : vector<8x1xf32> to vector<8x8xf32>
    %80 = arith.mulf %75, %79 : vector<8x8xf32>
    %81 = vector.extract_strided_slice %48 {offsets = [0, 8], sizes = [8, 8], strides = [1, 1]} : vector<16x32xf32> to vector<8x8xf32>
    %cst_52 = arith.constant dense<0.000000e+00> : vector<8x8xf32>
    %82 = tpu.matmul %80, %81, %cst_52 {dimension_numbers = #tpu.dot_dimension_numbers<[1], [0], [0], [1], [0, 0, 1, 1], [], []>} : vector<8x8xf32>, vector<8x8xf32>, vector<8x8xf32> -> vector<8x8xf32>
    %83 = vector.extract_strided_slice %50 {offsets = [0, 16], sizes = [8, 8], strides = [1, 1]} : vector<16x32xf32> to vector<8x8xf32>
    %84 = vector.extract_strided_slice %49 {offsets = [0, 16], sizes = [8, 8], strides = [1, 1]} : vector<16x32xf32> to vector<8x8xf32>
    %cst_53 = arith.constant dense<0.000000e+00> : vector<8x8xf32>
    %85 = tpu.matmul %83, %84, %cst_53 {dimension_numbers = #tpu.dot_dimension_numbers<[1], [1], [0], [0], [0, 0, 1, 0], [], []>} : vector<8x8xf32>, vector<8x8xf32>, vector<8x8xf32> -> vector<8x8xf32>
    %86 = arith.addf %85, %17 : vector<8x8xf32>
    %cst_54 = arith.constant dense<0xFF800000> : vector<8xf32>
    %87 = vector.multi_reduction <maximumf>, %86, %cst_54 [1] : vector<8x8xf32> to vector<8xf32>
    %88 = vector.shape_cast %87 : vector<8xf32> to vector<8x1xf32>
    %89 = vector.broadcast %88 : vector<8x1xf32> to vector<8x8xf32>
    %90 = arith.subf %86, %89 : vector<8x8xf32>
    %91 = math.exp %90 : vector<8x8xf32>
    %cst_55 = arith.constant dense<0.000000e+00> : vector<8xf32>
    %92 = vector.multi_reduction <add>, %91, %cst_55 [1] : vector<8x8xf32> to vector<8xf32>
    %93 = vector.shape_cast %92 : vector<8xf32> to vector<8x1xf32>
    %94 = tpu.reciprocal %93 {approx = true} : vector<8x1xf32> -> vector<8x1xf32>
    %95 = vector.broadcast %94 : vector<8x1xf32> to vector<8x8xf32>
    %96 = arith.mulf %91, %95 : vector<8x8xf32>
    %97 = vector.extract_strided_slice %48 {offsets = [0, 16], sizes = [8, 8], strides = [1, 1]} : vector<16x32xf32> to vector<8x8xf32>
    %cst_56 = arith.constant dense<0.000000e+00> : vector<8x8xf32>
    %98 = tpu.matmul %96, %97, %cst_56 {dimension_numbers = #tpu.dot_dimension_numbers<[1], [0], [0], [1], [0, 0, 1, 1], [], []>} : vector<8x8xf32>, vector<8x8xf32>, vector<8x8xf32> -> vector<8x8xf32>
    %99 = vector.extract_strided_slice %50 {offsets = [0, 24], sizes = [8, 8], strides = [1, 1]} : vector<16x32xf32> to vector<8x8xf32>
    %100 = vector.extract_strided_slice %49 {offsets = [0, 24], sizes = [8, 8], strides = [1, 1]} : vector<16x32xf32> to vector<8x8xf32>
    %cst_57 = arith.constant dense<0.000000e+00> : vector<8x8xf32>
    %101 = tpu.matmul %99, %100, %cst_57 {dimension_numbers = #tpu.dot_dimension_numbers<[1], [1], [0], [0], [0, 0, 1, 0], [], []>} : vector<8x8xf32>, vector<8x8xf32>, vector<8x8xf32> -> vector<8x8xf32>
    %102 = arith.addf %101, %17 : vector<8x8xf32>
    %cst_58 = arith.constant dense<0xFF800000> : vector<8xf32>
    %103 = vector.multi_reduction <maximumf>, %102, %cst_58 [1] : vector<8x8xf32> to vector<8xf32>
    %104 = vector.shape_cast %103 : vector<8xf32> to vector<8x1xf32>
    %105 = vector.broadcast %104 : vector<8x1xf32> to vector<8x8xf32>
    %106 = arith.subf %102, %105 : vector<8x8xf32>
    %107 = math.exp %106 : vector<8x8xf32>
    %cst_59 = arith.constant dense<0.000000e+00> : vector<8xf32>
    %108 = vector.multi_reduction <add>, %107, %cst_59 [1] : vector<8x8xf32> to vector<8xf32>
    %109 = vector.shape_cast %108 : vector<8xf32> to vector<8x1xf32>
    %110 = tpu.reciprocal %109 {approx = true} : vector<8x1xf32> -> vector<8x1xf32>
    %111 = vector.broadcast %110 : vector<8x1xf32> to vector<8x8xf32>
    %112 = arith.mulf %107, %111 : vector<8x8xf32>
    %113 = vector.extract_strided_slice %48 {offsets = [0, 24], sizes = [8, 8], strides = [1, 1]} : vector<16x32xf32> to vector<8x8xf32>
    %cst_60 = arith.constant dense<0.000000e+00> : vector<8x8xf32>
    %114 = tpu.matmul %112, %113, %cst_60 {dimension_numbers = #tpu.dot_dimension_numbers<[1], [0], [0], [1], [0, 0, 1, 1], [], []>} : vector<8x8xf32>, vector<8x8xf32>, vector<8x8xf32> -> vector<8x8xf32>
    %115 = tpu.concatenate %66, %82, %98, %114 in 1 : vector<8x8xf32>, vector<8x8xf32>, vector<8x8xf32>, vector<8x8xf32> -> vector<8x32xf32>
    %116 = vector.extract_strided_slice %50 {offsets = [8, 0], sizes = [8, 8], strides = [1, 1]} : vector<16x32xf32> to vector<8x8xf32>
    %117 = vector.extract_strided_slice %49 {offsets = [8, 0], sizes = [8, 8], strides = [1, 1]} : vector<16x32xf32> to vector<8x8xf32>
    %cst_61 = arith.constant dense<0.000000e+00> : vector<8x8xf32>
    %118 = tpu.matmul %116, %117, %cst_61 {dimension_numbers = #tpu.dot_dimension_numbers<[1], [1], [0], [0], [0, 0, 1, 0], [], []>} : vector<8x8xf32>, vector<8x8xf32>, vector<8x8xf32> -> vector<8x8xf32>
    %119 = arith.addf %118, %24 : vector<8x8xf32>
    %cst_62 = arith.constant dense<0xFF800000> : vector<8xf32>
    %120 = vector.multi_reduction <maximumf>, %119, %cst_62 [1] : vector<8x8xf32> to vector<8xf32>
    %121 = vector.shape_cast %120 : vector<8xf32> to vector<8x1xf32>
    %122 = vector.broadcast %121 : vector<8x1xf32> to vector<8x8xf32>
    %123 = arith.subf %119, %122 : vector<8x8xf32>
    %124 = math.exp %123 : vector<8x8xf32>
    %cst_63 = arith.constant dense<0.000000e+00> : vector<8xf32>
    %125 = vector.multi_reduction <add>, %124, %cst_63 [1] : vector<8x8xf32> to vector<8xf32>
    %126 = vector.shape_cast %125 : vector<8xf32> to vector<8x1xf32>
    %127 = tpu.reciprocal %126 {approx = true} : vector<8x1xf32> -> vector<8x1xf32>
    %128 = vector.broadcast %127 : vector<8x1xf32> to vector<8x8xf32>
    %129 = arith.mulf %124, %128 : vector<8x8xf32>
    %130 = vector.extract_strided_slice %48 {offsets = [8, 0], sizes = [8, 8], strides = [1, 1]} : vector<16x32xf32> to vector<8x8xf32>
    %cst_64 = arith.constant dense<0.000000e+00> : vector<8x8xf32>
    %131 = tpu.matmul %129, %130, %cst_64 {dimension_numbers = #tpu.dot_dimension_numbers<[1], [0], [0], [1], [0, 0, 1, 1], [], []>} : vector<8x8xf32>, vector<8x8xf32>, vector<8x8xf32> -> vector<8x8xf32>
    %132 = vector.extract_strided_slice %50 {offsets = [8, 8], sizes = [8, 8], strides = [1, 1]} : vector<16x32xf32> to vector<8x8xf32>
    %133 = vector.extract_strided_slice %49 {offsets = [8, 8], sizes = [8, 8], strides = [1, 1]} : vector<16x32xf32> to vector<8x8xf32>
    %cst_65 = arith.constant dense<0.000000e+00> : vector<8x8xf32>
    %134 = tpu.matmul %132, %133, %cst_65 {dimension_numbers = #tpu.dot_dimension_numbers<[1], [1], [0], [0], [0, 0, 1, 0], [], []>} : vector<8x8xf32>, vector<8x8xf32>, vector<8x8xf32> -> vector<8x8xf32>
    %135 = arith.addf %134, %24 : vector<8x8xf32>
    %cst_66 = arith.constant dense<0xFF800000> : vector<8xf32>
    %136 = vector.multi_reduction <maximumf>, %135, %cst_66 [1] : vector<8x8xf32> to vector<8xf32>
    %137 = vector.shape_cast %136 : vector<8xf32> to vector<8x1xf32>
    %138 = vector.broadcast %137 : vector<8x1xf32> to vector<8x8xf32>
    %139 = arith.subf %135, %138 : vector<8x8xf32>
    %140 = math.exp %139 : vector<8x8xf32>
    %cst_67 = arith.constant dense<0.000000e+00> : vector<8xf32>
    %141 = vector.multi_reduction <add>, %140, %cst_67 [1] : vector<8x8xf32> to vector<8xf32>
    %142 = vector.shape_cast %141 : vector<8xf32> to vector<8x1xf32>
    %143 = tpu.reciprocal %142 {approx = true} : vector<8x1xf32> -> vector<8x1xf32>
    %144 = vector.broadcast %143 : vector<8x1xf32> to vector<8x8xf32>
    %145 = arith.mulf %140, %144 : vector<8x8xf32>
    %146 = vector.extract_strided_slice %48 {offsets = [8, 8], sizes = [8, 8], strides = [1, 1]} : vector<16x32xf32> to vector<8x8xf32>
    %cst_68 = arith.constant dense<0.000000e+00> : vector<8x8xf32>
    %147 = tpu.matmul %145, %146, %cst_68 {dimension_numbers = #tpu.dot_dimension_numbers<[1], [0], [0], [1], [0, 0, 1, 1], [], []>} : vector<8x8xf32>, vector<8x8xf32>, vector<8x8xf32> -> vector<8x8xf32>
    %148 = vector.extract_strided_slice %50 {offsets = [8, 16], sizes = [8, 8], strides = [1, 1]} : vector<16x32xf32> to vector<8x8xf32>
    %149 = vector.extract_strided_slice %49 {offsets = [8, 16], sizes = [8, 8], strides = [1, 1]} : vector<16x32xf32> to vector<8x8xf32>
    %cst_69 = arith.constant dense<0.000000e+00> : vector<8x8xf32>
    %150 = tpu.matmul %148, %149, %cst_69 {dimension_numbers = #tpu.dot_dimension_numbers<[1], [1], [0], [0], [0, 0, 1, 0], [], []>} : vector<8x8xf32>, vector<8x8xf32>, vector<8x8xf32> -> vector<8x8xf32>
    %151 = arith.addf %150, %24 : vector<8x8xf32>
    %cst_70 = arith.constant dense<0xFF800000> : vector<8xf32>
    %152 = vector.multi_reduction <maximumf>, %151, %cst_70 [1] : vector<8x8xf32> to vector<8xf32>
    %153 = vector.shape_cast %152 : vector<8xf32> to vector<8x1xf32>
    %154 = vector.broadcast %153 : vector<8x1xf32> to vector<8x8xf32>
    %155 = arith.subf %151, %154 : vector<8x8xf32>
    %156 = math.exp %155 : vector<8x8xf32>
    %cst_71 = arith.constant dense<0.000000e+00> : vector<8xf32>
    %157 = vector.multi_reduction <add>, %156, %cst_71 [1] : vector<8x8xf32> to vector<8xf32>
    %158 = vector.shape_cast %157 : vector<8xf32> to vector<8x1xf32>
    %159 = tpu.reciprocal %158 {approx = true} : vector<8x1xf32> -> vector<8x1xf32>
    %160 = vector.broadcast %159 : vector<8x1xf32> to vector<8x8xf32>
    %161 = arith.mulf %156, %160 : vector<8x8xf32>
    %162 = vector.extract_strided_slice %48 {offsets = [8, 16], sizes = [8, 8], strides = [1, 1]} : vector<16x32xf32> to vector<8x8xf32>
    %cst_72 = arith.constant dense<0.000000e+00> : vector<8x8xf32>
    %163 = tpu.matmul %161, %162, %cst_72 {dimension_numbers = #tpu.dot_dimension_numbers<[1], [0], [0], [1], [0, 0, 1, 1], [], []>} : vector<8x8xf32>, vector<8x8xf32>, vector<8x8xf32> -> vector<8x8xf32>
    %164 = vector.extract_strided_slice %50 {offsets = [8, 24], sizes = [8, 8], strides = [1, 1]} : vector<16x32xf32> to vector<8x8xf32>
    %165 = vector.extract_strided_slice %49 {offsets = [8, 24], sizes = [8, 8], strides = [1, 1]} : vector<16x32xf32> to vector<8x8xf32>
    %cst_73 = arith.constant dense<0.000000e+00> : vector<8x8xf32>
    %166 = tpu.matmul %164, %165, %cst_73 {dimension_numbers = #tpu.dot_dimension_numbers<[1], [1], [0], [0], [0, 0, 1, 0], [], []>} : vector<8x8xf32>, vector<8x8xf32>, vector<8x8xf32> -> vector<8x8xf32>
    %167 = arith.addf %166, %24 : vector<8x8xf32>
    %cst_74 = arith.constant dense<0xFF800000> : vector<8xf32>
    %168 = vector.multi_reduction <maximumf>, %167, %cst_74 [1] : vector<8x8xf32> to vector<8xf32>
    %169 = vector.shape_cast %168 : vector<8xf32> to vector<8x1xf32>
    %170 = vector.broadcast %169 : vector<8x1xf32> to vector<8x8xf32>
    %171 = arith.subf %167, %170 : vector<8x8xf32>
    %172 = math.exp %171 : vector<8x8xf32>
    %cst_75 = arith.constant dense<0.000000e+00> : vector<8xf32>
    %173 = vector.multi_reduction <add>, %172, %cst_75 [1] : vector<8x8xf32> to vector<8xf32>
    %174 = vector.shape_cast %173 : vector<8xf32> to vector<8x1xf32>
    %175 = tpu.reciprocal %174 {approx = true} : vector<8x1xf32> -> vector<8x1xf32>
    %176 = vector.broadcast %175 : vector<8x1xf32> to vector<8x8xf32>
    %177 = arith.mulf %172, %176 : vector<8x8xf32>
    %178 = vector.extract_strided_slice %48 {offsets = [8, 24], sizes = [8, 8], strides = [1, 1]} : vector<16x32xf32> to vector<8x8xf32>
    %cst_76 = arith.constant dense<0.000000e+00> : vector<8x8xf32>
    %179 = tpu.matmul %177, %178, %cst_76 {dimension_numbers = #tpu.dot_dimension_numbers<[1], [0], [0], [1], [0, 0, 1, 1], [], []>} : vector<8x8xf32>, vector<8x8xf32>, vector<8x8xf32> -> vector<8x8xf32>
    %180 = tpu.concatenate %131, %147, %163, %179 in 1 : vector<8x8xf32>, vector<8x8xf32>, vector<8x8xf32>, vector<8x8xf32> -> vector<8x32xf32>
    %181 = tpu.concatenate %115, %180 in 0 : vector<8x32xf32>, vector<8x32xf32> -> vector<16x32xf32>
    %cst_77 = arith.constant dense<0.000000e+00> : vector<16x32xf32>
    %182 = tpu.matmul %181, %46, %cst_77 {dimension_numbers = #tpu.dot_dimension_numbers<[1], [0], [0], [1], [0, 0, 1, 1], [], []>} : vector<16x32xf32>, vector<32x32xf32>, vector<16x32xf32> -> vector<16x32xf32>
    %183 = vector.broadcast %47 : vector<1x32xf32> to vector<16x32xf32>
    %184 = arith.addf %182, %183 : vector<16x32xf32>
    %185 = arith.addf %184, %9 : vector<16x32xf32>
    %c1_78 = arith.constant 1 : index
    %c0_79 = arith.constant 0 : index
    %186 = vector.load %arg9[%c1_78, %c0_79] : memref<20x128xf32, #tpu.memory_space<vmem>>, vector<1x32xf32>
    %c2_80 = arith.constant 2 : index
    %c0_81 = arith.constant 0 : index
    %187 = vector.load %arg9[%c2_80, %c0_81] : memref<20x128xf32, #tpu.memory_space<vmem>>, vector<1x32xf32>
    %cst_82 = arith.constant dense<0.000000e+00> : vector<16xf32>
    %188 = vector.multi_reduction <add>, %185, %cst_82 [1] : vector<16x32xf32> to vector<16xf32>
    %189 = vector.shape_cast %188 : vector<16xf32> to vector<16x1xf32>
    %cst_83 = arith.constant 3.125000e-02 : f32
    %190 = vector.broadcast %cst_83 : f32 to vector<16x1xf32>
    %191 = arith.mulf %189, %190 : vector<16x1xf32>
    %192 = arith.mulf %185, %185 : vector<16x32xf32>
    %cst_84 = arith.constant dense<0.000000e+00> : vector<16xf32>
    %193 = vector.multi_reduction <add>, %192, %cst_84 [1] : vector<16x32xf32> to vector<16xf32>
    %194 = vector.shape_cast %193 : vector<16xf32> to vector<16x1xf32>
    %cst_85 = arith.constant 3.125000e-02 : f32
    %195 = vector.broadcast %cst_85 : f32 to vector<16x1xf32>
    %196 = arith.mulf %194, %195 : vector<16x1xf32>
    %197 = arith.mulf %191, %191 : vector<16x1xf32>
    %198 = arith.subf %196, %197 : vector<16x1xf32>
    %199 = vector.broadcast %191 : vector<16x1xf32> to vector<16x32xf32>
    %200 = arith.subf %185, %199 : vector<16x32xf32>
    %cst_86 = arith.constant 9.99999974E-6 : f32
    %201 = vector.broadcast %cst_86 : f32 to vector<16x1xf32>
    %202 = arith.addf %198, %201 : vector<16x1xf32>
    %203 = math.rsqrt %202 : vector<16x1xf32>
    %204 = vector.broadcast %203 : vector<16x1xf32> to vector<16x32xf32>
    %205 = arith.mulf %200, %204 : vector<16x32xf32>
    %206 = vector.broadcast %186 : vector<1x32xf32> to vector<16x32xf32>
    %207 = arith.mulf %205, %206 : vector<16x32xf32>
    %208 = vector.broadcast %187 : vector<1x32xf32> to vector<16x32xf32>
    %209 = arith.addf %207, %208 : vector<16x32xf32>
    %c4 = arith.constant 4 : index
    %c0_87 = arith.constant 0 : index
    %c0_88 = arith.constant 0 : index
    %210 = vector.load %arg6[%c4, %c0_87, %c0_88] : memref<16x32x32xf32, #tpu.memory_space<vmem>>, vector<1x32x32xf32>
    %211 = vector.shape_cast %210 : vector<1x32x32xf32> to vector<32x32xf32>
    %c5 = arith.constant 5 : index
    %c0_89 = arith.constant 0 : index
    %c0_90 = arith.constant 0 : index
    %212 = vector.load %arg6[%c5, %c0_89, %c0_90] : memref<16x32x32xf32, #tpu.memory_space<vmem>>, vector<1x32x32xf32>
    %213 = vector.shape_cast %212 : vector<1x32x32xf32> to vector<32x32xf32>
    %c6 = arith.constant 6 : index
    %c0_91 = arith.constant 0 : index
    %c0_92 = arith.constant 0 : index
    %214 = vector.load %arg6[%c6, %c0_91, %c0_92] : memref<16x32x32xf32, #tpu.memory_space<vmem>>, vector<1x32x32xf32>
    %215 = vector.shape_cast %214 : vector<1x32x32xf32> to vector<32x32xf32>
    %c7 = arith.constant 7 : index
    %c0_93 = arith.constant 0 : index
    %c0_94 = arith.constant 0 : index
    %216 = vector.load %arg6[%c7, %c0_93, %c0_94] : memref<16x32x32xf32, #tpu.memory_space<vmem>>, vector<1x32x32xf32>
    %217 = vector.shape_cast %216 : vector<1x32x32xf32> to vector<32x32xf32>
    %c3_95 = arith.constant 3 : index
    %c0_96 = arith.constant 0 : index
    %218 = vector.load %arg9[%c3_95, %c0_96] : memref<20x128xf32, #tpu.memory_space<vmem>>, vector<1x32xf32>
    %cst_97 = arith.constant dense<0.000000e+00> : vector<16x32xf32>
    %219 = tpu.matmul %10, %211, %cst_97 {dimension_numbers = #tpu.dot_dimension_numbers<[1], [0], [0], [1], [0, 0, 1, 1], [], []>} : vector<16x32xf32>, vector<32x32xf32>, vector<16x32xf32> -> vector<16x32xf32>
    %cst_98 = arith.constant dense<0.000000e+00> : vector<16x32xf32>
    %220 = tpu.matmul %209, %213, %cst_98 {dimension_numbers = #tpu.dot_dimension_numbers<[1], [0], [0], [1], [0, 0, 1, 1], [], []>} : vector<16x32xf32>, vector<32x32xf32>, vector<16x32xf32> -> vector<16x32xf32>
    %cst_99 = arith.constant dense<0.000000e+00> : vector<16x32xf32>
    %221 = tpu.matmul %10, %215, %cst_99 {dimension_numbers = #tpu.dot_dimension_numbers<[1], [0], [0], [1], [0, 0, 1, 1], [], []>} : vector<16x32xf32>, vector<32x32xf32>, vector<16x32xf32> -> vector<16x32xf32>
    %222 = vector.extract_strided_slice %221 {offsets = [0, 0], sizes = [8, 8], strides = [1, 1]} : vector<16x32xf32> to vector<8x8xf32>
    %223 = vector.extract_strided_slice %220 {offsets = [0, 0], sizes = [8, 8], strides = [1, 1]} : vector<16x32xf32> to vector<8x8xf32>
    %cst_100 = arith.constant dense<0.000000e+00> : vector<8x8xf32>
    %224 = tpu.matmul %222, %223, %cst_100 {dimension_numbers = #tpu.dot_dimension_numbers<[1], [1], [0], [0], [0, 0, 1, 0], [], []>} : vector<8x8xf32>, vector<8x8xf32>, vector<8x8xf32> -> vector<8x8xf32>
    %225 = vector.broadcast %31 : vector<1x8xf32> to vector<8x8xf32>
    %226 = arith.addf %224, %225 : vector<8x8xf32>
    %cst_101 = arith.constant dense<0xFF800000> : vector<8xf32>
    %227 = vector.multi_reduction <maximumf>, %226, %cst_101 [1] : vector<8x8xf32> to vector<8xf32>
    %228 = vector.shape_cast %227 : vector<8xf32> to vector<8x1xf32>
    %229 = vector.broadcast %228 : vector<8x1xf32> to vector<8x8xf32>
    %230 = arith.subf %226, %229 : vector<8x8xf32>
    %231 = math.exp %230 : vector<8x8xf32>
    %cst_102 = arith.constant dense<0.000000e+00> : vector<8xf32>
    %232 = vector.multi_reduction <add>, %231, %cst_102 [1] : vector<8x8xf32> to vector<8xf32>
    %233 = vector.shape_cast %232 : vector<8xf32> to vector<8x1xf32>
    %234 = tpu.reciprocal %233 {approx = true} : vector<8x1xf32> -> vector<8x1xf32>
    %235 = vector.broadcast %234 : vector<8x1xf32> to vector<8x8xf32>
    %236 = arith.mulf %231, %235 : vector<8x8xf32>
    %237 = vector.extract_strided_slice %219 {offsets = [0, 0], sizes = [8, 8], strides = [1, 1]} : vector<16x32xf32> to vector<8x8xf32>
    %cst_103 = arith.constant dense<0.000000e+00> : vector<8x8xf32>
    %238 = tpu.matmul %236, %237, %cst_103 {dimension_numbers = #tpu.dot_dimension_numbers<[1], [0], [0], [1], [0, 0, 1, 1], [], []>} : vector<8x8xf32>, vector<8x8xf32>, vector<8x8xf32> -> vector<8x8xf32>
    %239 = vector.extract_strided_slice %221 {offsets = [0, 8], sizes = [8, 8], strides = [1, 1]} : vector<16x32xf32> to vector<8x8xf32>
    %240 = vector.extract_strided_slice %220 {offsets = [0, 8], sizes = [8, 8], strides = [1, 1]} : vector<16x32xf32> to vector<8x8xf32>
    %cst_104 = arith.constant dense<0.000000e+00> : vector<8x8xf32>
    %241 = tpu.matmul %239, %240, %cst_104 {dimension_numbers = #tpu.dot_dimension_numbers<[1], [1], [0], [0], [0, 0, 1, 0], [], []>} : vector<8x8xf32>, vector<8x8xf32>, vector<8x8xf32> -> vector<8x8xf32>
    %242 = vector.broadcast %31 : vector<1x8xf32> to vector<8x8xf32>
    %243 = arith.addf %241, %242 : vector<8x8xf32>
    %cst_105 = arith.constant dense<0xFF800000> : vector<8xf32>
    %244 = vector.multi_reduction <maximumf>, %243, %cst_105 [1] : vector<8x8xf32> to vector<8xf32>
    %245 = vector.shape_cast %244 : vector<8xf32> to vector<8x1xf32>
    %246 = vector.broadcast %245 : vector<8x1xf32> to vector<8x8xf32>
    %247 = arith.subf %243, %246 : vector<8x8xf32>
    %248 = math.exp %247 : vector<8x8xf32>
    %cst_106 = arith.constant dense<0.000000e+00> : vector<8xf32>
    %249 = vector.multi_reduction <add>, %248, %cst_106 [1] : vector<8x8xf32> to vector<8xf32>
    %250 = vector.shape_cast %249 : vector<8xf32> to vector<8x1xf32>
    %251 = tpu.reciprocal %250 {approx = true} : vector<8x1xf32> -> vector<8x1xf32>
    %252 = vector.broadcast %251 : vector<8x1xf32> to vector<8x8xf32>
    %253 = arith.mulf %248, %252 : vector<8x8xf32>
    %254 = vector.extract_strided_slice %219 {offsets = [0, 8], sizes = [8, 8], strides = [1, 1]} : vector<16x32xf32> to vector<8x8xf32>
    %cst_107 = arith.constant dense<0.000000e+00> : vector<8x8xf32>
    %255 = tpu.matmul %253, %254, %cst_107 {dimension_numbers = #tpu.dot_dimension_numbers<[1], [0], [0], [1], [0, 0, 1, 1], [], []>} : vector<8x8xf32>, vector<8x8xf32>, vector<8x8xf32> -> vector<8x8xf32>
    %256 = vector.extract_strided_slice %221 {offsets = [0, 16], sizes = [8, 8], strides = [1, 1]} : vector<16x32xf32> to vector<8x8xf32>
    %257 = vector.extract_strided_slice %220 {offsets = [0, 16], sizes = [8, 8], strides = [1, 1]} : vector<16x32xf32> to vector<8x8xf32>
    %cst_108 = arith.constant dense<0.000000e+00> : vector<8x8xf32>
    %258 = tpu.matmul %256, %257, %cst_108 {dimension_numbers = #tpu.dot_dimension_numbers<[1], [1], [0], [0], [0, 0, 1, 0], [], []>} : vector<8x8xf32>, vector<8x8xf32>, vector<8x8xf32> -> vector<8x8xf32>
    %259 = vector.broadcast %31 : vector<1x8xf32> to vector<8x8xf32>
    %260 = arith.addf %258, %259 : vector<8x8xf32>
    %cst_109 = arith.constant dense<0xFF800000> : vector<8xf32>
    %261 = vector.multi_reduction <maximumf>, %260, %cst_109 [1] : vector<8x8xf32> to vector<8xf32>
    %262 = vector.shape_cast %261 : vector<8xf32> to vector<8x1xf32>
    %263 = vector.broadcast %262 : vector<8x1xf32> to vector<8x8xf32>
    %264 = arith.subf %260, %263 : vector<8x8xf32>
    %265 = math.exp %264 : vector<8x8xf32>
    %cst_110 = arith.constant dense<0.000000e+00> : vector<8xf32>
    %266 = vector.multi_reduction <add>, %265, %cst_110 [1] : vector<8x8xf32> to vector<8xf32>
    %267 = vector.shape_cast %266 : vector<8xf32> to vector<8x1xf32>
    %268 = tpu.reciprocal %267 {approx = true} : vector<8x1xf32> -> vector<8x1xf32>
    %269 = vector.broadcast %268 : vector<8x1xf32> to vector<8x8xf32>
    %270 = arith.mulf %265, %269 : vector<8x8xf32>
    %271 = vector.extract_strided_slice %219 {offsets = [0, 16], sizes = [8, 8], strides = [1, 1]} : vector<16x32xf32> to vector<8x8xf32>
    %cst_111 = arith.constant dense<0.000000e+00> : vector<8x8xf32>
    %272 = tpu.matmul %270, %271, %cst_111 {dimension_numbers = #tpu.dot_dimension_numbers<[1], [0], [0], [1], [0, 0, 1, 1], [], []>} : vector<8x8xf32>, vector<8x8xf32>, vector<8x8xf32> -> vector<8x8xf32>
    %273 = vector.extract_strided_slice %221 {offsets = [0, 24], sizes = [8, 8], strides = [1, 1]} : vector<16x32xf32> to vector<8x8xf32>
    %274 = vector.extract_strided_slice %220 {offsets = [0, 24], sizes = [8, 8], strides = [1, 1]} : vector<16x32xf32> to vector<8x8xf32>
    %cst_112 = arith.constant dense<0.000000e+00> : vector<8x8xf32>
    %275 = tpu.matmul %273, %274, %cst_112 {dimension_numbers = #tpu.dot_dimension_numbers<[1], [1], [0], [0], [0, 0, 1, 0], [], []>} : vector<8x8xf32>, vector<8x8xf32>, vector<8x8xf32> -> vector<8x8xf32>
    %276 = vector.broadcast %31 : vector<1x8xf32> to vector<8x8xf32>
    %277 = arith.addf %275, %276 : vector<8x8xf32>
    %cst_113 = arith.constant dense<0xFF800000> : vector<8xf32>
    %278 = vector.multi_reduction <maximumf>, %277, %cst_113 [1] : vector<8x8xf32> to vector<8xf32>
    %279 = vector.shape_cast %278 : vector<8xf32> to vector<8x1xf32>
    %280 = vector.broadcast %279 : vector<8x1xf32> to vector<8x8xf32>
    %281 = arith.subf %277, %280 : vector<8x8xf32>
    %282 = math.exp %281 : vector<8x8xf32>
    %cst_114 = arith.constant dense<0.000000e+00> : vector<8xf32>
    %283 = vector.multi_reduction <add>, %282, %cst_114 [1] : vector<8x8xf32> to vector<8xf32>
    %284 = vector.shape_cast %283 : vector<8xf32> to vector<8x1xf32>
    %285 = tpu.reciprocal %284 {approx = true} : vector<8x1xf32> -> vector<8x1xf32>
    %286 = vector.broadcast %285 : vector<8x1xf32> to vector<8x8xf32>
    %287 = arith.mulf %282, %286 : vector<8x8xf32>
    %288 = vector.extract_strided_slice %219 {offsets = [0, 24], sizes = [8, 8], strides = [1, 1]} : vector<16x32xf32> to vector<8x8xf32>
    %cst_115 = arith.constant dense<0.000000e+00> : vector<8x8xf32>
    %289 = tpu.matmul %287, %288, %cst_115 {dimension_numbers = #tpu.dot_dimension_numbers<[1], [0], [0], [1], [0, 0, 1, 1], [], []>} : vector<8x8xf32>, vector<8x8xf32>, vector<8x8xf32> -> vector<8x8xf32>
    %290 = tpu.concatenate %238, %255, %272, %289 in 1 : vector<8x8xf32>, vector<8x8xf32>, vector<8x8xf32>, vector<8x8xf32> -> vector<8x32xf32>
    %291 = vector.extract_strided_slice %221 {offsets = [8, 0], sizes = [8, 8], strides = [1, 1]} : vector<16x32xf32> to vector<8x8xf32>
    %292 = vector.extract_strided_slice %220 {offsets = [8, 0], sizes = [8, 8], strides = [1, 1]} : vector<16x32xf32> to vector<8x8xf32>
    %cst_116 = arith.constant dense<0.000000e+00> : vector<8x8xf32>
    %293 = tpu.matmul %291, %292, %cst_116 {dimension_numbers = #tpu.dot_dimension_numbers<[1], [1], [0], [0], [0, 0, 1, 0], [], []>} : vector<8x8xf32>, vector<8x8xf32>, vector<8x8xf32> -> vector<8x8xf32>
    %294 = vector.broadcast %38 : vector<1x8xf32> to vector<8x8xf32>
    %295 = arith.addf %293, %294 : vector<8x8xf32>
    %cst_117 = arith.constant dense<0xFF800000> : vector<8xf32>
    %296 = vector.multi_reduction <maximumf>, %295, %cst_117 [1] : vector<8x8xf32> to vector<8xf32>
    %297 = vector.shape_cast %296 : vector<8xf32> to vector<8x1xf32>
    %298 = vector.broadcast %297 : vector<8x1xf32> to vector<8x8xf32>
    %299 = arith.subf %295, %298 : vector<8x8xf32>
    %300 = math.exp %299 : vector<8x8xf32>
    %cst_118 = arith.constant dense<0.000000e+00> : vector<8xf32>
    %301 = vector.multi_reduction <add>, %300, %cst_118 [1] : vector<8x8xf32> to vector<8xf32>
    %302 = vector.shape_cast %301 : vector<8xf32> to vector<8x1xf32>
    %303 = tpu.reciprocal %302 {approx = true} : vector<8x1xf32> -> vector<8x1xf32>
    %304 = vector.broadcast %303 : vector<8x1xf32> to vector<8x8xf32>
    %305 = arith.mulf %300, %304 : vector<8x8xf32>
    %306 = vector.extract_strided_slice %219 {offsets = [8, 0], sizes = [8, 8], strides = [1, 1]} : vector<16x32xf32> to vector<8x8xf32>
    %cst_119 = arith.constant dense<0.000000e+00> : vector<8x8xf32>
    %307 = tpu.matmul %305, %306, %cst_119 {dimension_numbers = #tpu.dot_dimension_numbers<[1], [0], [0], [1], [0, 0, 1, 1], [], []>} : vector<8x8xf32>, vector<8x8xf32>, vector<8x8xf32> -> vector<8x8xf32>
    %308 = vector.extract_strided_slice %221 {offsets = [8, 8], sizes = [8, 8], strides = [1, 1]} : vector<16x32xf32> to vector<8x8xf32>
    %309 = vector.extract_strided_slice %220 {offsets = [8, 8], sizes = [8, 8], strides = [1, 1]} : vector<16x32xf32> to vector<8x8xf32>
    %cst_120 = arith.constant dense<0.000000e+00> : vector<8x8xf32>
    %310 = tpu.matmul %308, %309, %cst_120 {dimension_numbers = #tpu.dot_dimension_numbers<[1], [1], [0], [0], [0, 0, 1, 0], [], []>} : vector<8x8xf32>, vector<8x8xf32>, vector<8x8xf32> -> vector<8x8xf32>
    %311 = vector.broadcast %38 : vector<1x8xf32> to vector<8x8xf32>
    %312 = arith.addf %310, %311 : vector<8x8xf32>
    %cst_121 = arith.constant dense<0xFF800000> : vector<8xf32>
    %313 = vector.multi_reduction <maximumf>, %312, %cst_121 [1] : vector<8x8xf32> to vector<8xf32>
    %314 = vector.shape_cast %313 : vector<8xf32> to vector<8x1xf32>
    %315 = vector.broadcast %314 : vector<8x1xf32> to vector<8x8xf32>
    %316 = arith.subf %312, %315 : vector<8x8xf32>
    %317 = math.exp %316 : vector<8x8xf32>
    %cst_122 = arith.constant dense<0.000000e+00> : vector<8xf32>
    %318 = vector.multi_reduction <add>, %317, %cst_122 [1] : vector<8x8xf32> to vector<8xf32>
    %319 = vector.shape_cast %318 : vector<8xf32> to vector<8x1xf32>
    %320 = tpu.reciprocal %319 {approx = true} : vector<8x1xf32> -> vector<8x1xf32>
    %321 = vector.broadcast %320 : vector<8x1xf32> to vector<8x8xf32>
    %322 = arith.mulf %317, %321 : vector<8x8xf32>
    %323 = vector.extract_strided_slice %219 {offsets = [8, 8], sizes = [8, 8], strides = [1, 1]} : vector<16x32xf32> to vector<8x8xf32>
    %cst_123 = arith.constant dense<0.000000e+00> : vector<8x8xf32>
    %324 = tpu.matmul %322, %323, %cst_123 {dimension_numbers = #tpu.dot_dimension_numbers<[1], [0], [0], [1], [0, 0, 1, 1], [], []>} : vector<8x8xf32>, vector<8x8xf32>, vector<8x8xf32> -> vector<8x8xf32>
    %325 = vector.extract_strided_slice %221 {offsets = [8, 16], sizes = [8, 8], strides = [1, 1]} : vector<16x32xf32> to vector<8x8xf32>
    %326 = vector.extract_strided_slice %220 {offsets = [8, 16], sizes = [8, 8], strides = [1, 1]} : vector<16x32xf32> to vector<8x8xf32>
    %cst_124 = arith.constant dense<0.000000e+00> : vector<8x8xf32>
    %327 = tpu.matmul %325, %326, %cst_124 {dimension_numbers = #tpu.dot_dimension_numbers<[1], [1], [0], [0], [0, 0, 1, 0], [], []>} : vector<8x8xf32>, vector<8x8xf32>, vector<8x8xf32> -> vector<8x8xf32>
    %328 = vector.broadcast %38 : vector<1x8xf32> to vector<8x8xf32>
    %329 = arith.addf %327, %328 : vector<8x8xf32>
    %cst_125 = arith.constant dense<0xFF800000> : vector<8xf32>
    %330 = vector.multi_reduction <maximumf>, %329, %cst_125 [1] : vector<8x8xf32> to vector<8xf32>
    %331 = vector.shape_cast %330 : vector<8xf32> to vector<8x1xf32>
    %332 = vector.broadcast %331 : vector<8x1xf32> to vector<8x8xf32>
    %333 = arith.subf %329, %332 : vector<8x8xf32>
    %334 = math.exp %333 : vector<8x8xf32>
    %cst_126 = arith.constant dense<0.000000e+00> : vector<8xf32>
    %335 = vector.multi_reduction <add>, %334, %cst_126 [1] : vector<8x8xf32> to vector<8xf32>
    %336 = vector.shape_cast %335 : vector<8xf32> to vector<8x1xf32>
    %337 = tpu.reciprocal %336 {approx = true} : vector<8x1xf32> -> vector<8x1xf32>
    %338 = vector.broadcast %337 : vector<8x1xf32> to vector<8x8xf32>
    %339 = arith.mulf %334, %338 : vector<8x8xf32>
    %340 = vector.extract_strided_slice %219 {offsets = [8, 16], sizes = [8, 8], strides = [1, 1]} : vector<16x32xf32> to vector<8x8xf32>
    %cst_127 = arith.constant dense<0.000000e+00> : vector<8x8xf32>
    %341 = tpu.matmul %339, %340, %cst_127 {dimension_numbers = #tpu.dot_dimension_numbers<[1], [0], [0], [1], [0, 0, 1, 1], [], []>} : vector<8x8xf32>, vector<8x8xf32>, vector<8x8xf32> -> vector<8x8xf32>
    %342 = vector.extract_strided_slice %221 {offsets = [8, 24], sizes = [8, 8], strides = [1, 1]} : vector<16x32xf32> to vector<8x8xf32>
    %343 = vector.extract_strided_slice %220 {offsets = [8, 24], sizes = [8, 8], strides = [1, 1]} : vector<16x32xf32> to vector<8x8xf32>
    %cst_128 = arith.constant dense<0.000000e+00> : vector<8x8xf32>
    %344 = tpu.matmul %342, %343, %cst_128 {dimension_numbers = #tpu.dot_dimension_numbers<[1], [1], [0], [0], [0, 0, 1, 0], [], []>} : vector<8x8xf32>, vector<8x8xf32>, vector<8x8xf32> -> vector<8x8xf32>
    %345 = vector.broadcast %38 : vector<1x8xf32> to vector<8x8xf32>
    %346 = arith.addf %344, %345 : vector<8x8xf32>
    %cst_129 = arith.constant dense<0xFF800000> : vector<8xf32>
    %347 = vector.multi_reduction <maximumf>, %346, %cst_129 [1] : vector<8x8xf32> to vector<8xf32>
    %348 = vector.shape_cast %347 : vector<8xf32> to vector<8x1xf32>
    %349 = vector.broadcast %348 : vector<8x1xf32> to vector<8x8xf32>
    %350 = arith.subf %346, %349 : vector<8x8xf32>
    %351 = math.exp %350 : vector<8x8xf32>
    %cst_130 = arith.constant dense<0.000000e+00> : vector<8xf32>
    %352 = vector.multi_reduction <add>, %351, %cst_130 [1] : vector<8x8xf32> to vector<8xf32>
    %353 = vector.shape_cast %352 : vector<8xf32> to vector<8x1xf32>
    %354 = tpu.reciprocal %353 {approx = true} : vector<8x1xf32> -> vector<8x1xf32>
    %355 = vector.broadcast %354 : vector<8x1xf32> to vector<8x8xf32>
    %356 = arith.mulf %351, %355 : vector<8x8xf32>
    %357 = vector.extract_strided_slice %219 {offsets = [8, 24], sizes = [8, 8], strides = [1, 1]} : vector<16x32xf32> to vector<8x8xf32>
    %cst_131 = arith.constant dense<0.000000e+00> : vector<8x8xf32>
    %358 = tpu.matmul %356, %357, %cst_131 {dimension_numbers = #tpu.dot_dimension_numbers<[1], [0], [0], [1], [0, 0, 1, 1], [], []>} : vector<8x8xf32>, vector<8x8xf32>, vector<8x8xf32> -> vector<8x8xf32>
    %359 = tpu.concatenate %307, %324, %341, %358 in 1 : vector<8x8xf32>, vector<8x8xf32>, vector<8x8xf32>, vector<8x8xf32> -> vector<8x32xf32>
    %360 = tpu.concatenate %290, %359 in 0 : vector<8x32xf32>, vector<8x32xf32> -> vector<16x32xf32>
    %cst_132 = arith.constant dense<0.000000e+00> : vector<16x32xf32>
    %361 = tpu.matmul %360, %217, %cst_132 {dimension_numbers = #tpu.dot_dimension_numbers<[1], [0], [0], [1], [0, 0, 1, 1], [], []>} : vector<16x32xf32>, vector<32x32xf32>, vector<16x32xf32> -> vector<16x32xf32>
    %362 = vector.broadcast %218 : vector<1x32xf32> to vector<16x32xf32>
    %363 = arith.addf %361, %362 : vector<16x32xf32>
    %364 = arith.addf %363, %209 : vector<16x32xf32>
    %c4_133 = arith.constant 4 : index
    %c0_134 = arith.constant 0 : index
    %365 = vector.load %arg9[%c4_133, %c0_134] : memref<20x128xf32, #tpu.memory_space<vmem>>, vector<1x32xf32>
    %c5_135 = arith.constant 5 : index
    %c0_136 = arith.constant 0 : index
    %366 = vector.load %arg9[%c5_135, %c0_136] : memref<20x128xf32, #tpu.memory_space<vmem>>, vector<1x32xf32>
    %cst_137 = arith.constant dense<0.000000e+00> : vector<16xf32>
    %367 = vector.multi_reduction <add>, %364, %cst_137 [1] : vector<16x32xf32> to vector<16xf32>
    %368 = vector.shape_cast %367 : vector<16xf32> to vector<16x1xf32>
    %cst_138 = arith.constant 3.125000e-02 : f32
    %369 = vector.broadcast %cst_138 : f32 to vector<16x1xf32>
    %370 = arith.mulf %368, %369 : vector<16x1xf32>
    %371 = arith.mulf %364, %364 : vector<16x32xf32>
    %cst_139 = arith.constant dense<0.000000e+00> : vector<16xf32>
    %372 = vector.multi_reduction <add>, %371, %cst_139 [1] : vector<16x32xf32> to vector<16xf32>
    %373 = vector.shape_cast %372 : vector<16xf32> to vector<16x1xf32>
    %cst_140 = arith.constant 3.125000e-02 : f32
    %374 = vector.broadcast %cst_140 : f32 to vector<16x1xf32>
    %375 = arith.mulf %373, %374 : vector<16x1xf32>
    %376 = arith.mulf %370, %370 : vector<16x1xf32>
    %377 = arith.subf %375, %376 : vector<16x1xf32>
    %378 = vector.broadcast %370 : vector<16x1xf32> to vector<16x32xf32>
    %379 = arith.subf %364, %378 : vector<16x32xf32>
    %cst_141 = arith.constant 9.99999974E-6 : f32
    %380 = vector.broadcast %cst_141 : f32 to vector<16x1xf32>
    %381 = arith.addf %377, %380 : vector<16x1xf32>
    %382 = math.rsqrt %381 : vector<16x1xf32>
    %383 = vector.broadcast %382 : vector<16x1xf32> to vector<16x32xf32>
    %384 = arith.mulf %379, %383 : vector<16x32xf32>
    %385 = vector.broadcast %365 : vector<1x32xf32> to vector<16x32xf32>
    %386 = arith.mulf %384, %385 : vector<16x32xf32>
    %387 = vector.broadcast %366 : vector<1x32xf32> to vector<16x32xf32>
    %388 = arith.addf %386, %387 : vector<16x32xf32>
    %c0_142 = arith.constant 0 : index
    %c0_143 = arith.constant 0 : index
    %c0_144 = arith.constant 0 : index
    %389 = vector.load %arg7[%c0_142, %c0_143, %c0_144] : memref<2x32x64xf32, #tpu.memory_space<vmem>>, vector<1x32x64xf32>
    %390 = vector.shape_cast %389 : vector<1x32x64xf32> to vector<32x64xf32>
    %cst_145 = arith.constant dense<0.000000e+00> : vector<16x64xf32>
    %391 = tpu.matmul %388, %390, %cst_145 {dimension_numbers = #tpu.dot_dimension_numbers<[1], [0], [0], [1], [0, 0, 1, 1], [], []>} : vector<16x32xf32>, vector<32x64xf32>, vector<16x64xf32> -> vector<16x64xf32>
    %c6_146 = arith.constant 6 : index
    %c0_147 = arith.constant 0 : index
    %392 = vector.load %arg9[%c6_146, %c0_147] : memref<20x128xf32, #tpu.memory_space<vmem>>, vector<1x64xf32>
    %393 = vector.broadcast %392 : vector<1x64xf32> to vector<16x64xf32>
    %394 = arith.addf %391, %393 : vector<16x64xf32>
    %cst_148 = arith.constant 0.000000e+00 : f32
    %395 = vector.broadcast %cst_148 : f32 to vector<16x64xf32>
    %396 = arith.maximumf %394, %395 : vector<16x64xf32>
    %c0_149 = arith.constant 0 : index
    %c0_150 = arith.constant 0 : index
    %c0_151 = arith.constant 0 : index
    %397 = vector.load %arg8[%c0_149, %c0_150, %c0_151] : memref<2x64x32xf32, #tpu.memory_space<vmem>>, vector<1x64x32xf32>
    %398 = vector.shape_cast %397 : vector<1x64x32xf32> to vector<64x32xf32>
    %cst_152 = arith.constant dense<0.000000e+00> : vector<16x32xf32>
    %399 = tpu.matmul %396, %398, %cst_152 {dimension_numbers = #tpu.dot_dimension_numbers<[1], [0], [0], [1], [0, 0, 1, 1], [], []>} : vector<16x64xf32>, vector<64x32xf32>, vector<16x32xf32> -> vector<16x32xf32>
    %c7_153 = arith.constant 7 : index
    %c0_154 = arith.constant 0 : index
    %400 = vector.load %arg9[%c7_153, %c0_154] : memref<20x128xf32, #tpu.memory_space<vmem>>, vector<1x32xf32>
    %401 = vector.broadcast %400 : vector<1x32xf32> to vector<16x32xf32>
    %402 = arith.addf %399, %401 : vector<16x32xf32>
    %403 = arith.addf %402, %388 : vector<16x32xf32>
    %c8 = arith.constant 8 : index
    %c0_155 = arith.constant 0 : index
    %404 = vector.load %arg9[%c8, %c0_155] : memref<20x128xf32, #tpu.memory_space<vmem>>, vector<1x32xf32>
    %c9 = arith.constant 9 : index
    %c0_156 = arith.constant 0 : index
    %405 = vector.load %arg9[%c9, %c0_156] : memref<20x128xf32, #tpu.memory_space<vmem>>, vector<1x32xf32>
    %cst_157 = arith.constant dense<0.000000e+00> : vector<16xf32>
    %406 = vector.multi_reduction <add>, %403, %cst_157 [1] : vector<16x32xf32> to vector<16xf32>
    %407 = vector.shape_cast %406 : vector<16xf32> to vector<16x1xf32>
    %cst_158 = arith.constant 3.125000e-02 : f32
    %408 = vector.broadcast %cst_158 : f32 to vector<16x1xf32>
    %409 = arith.mulf %407, %408 : vector<16x1xf32>
    %410 = arith.mulf %403, %403 : vector<16x32xf32>
    %cst_159 = arith.constant dense<0.000000e+00> : vector<16xf32>
    %411 = vector.multi_reduction <add>, %410, %cst_159 [1] : vector<16x32xf32> to vector<16xf32>
    %412 = vector.shape_cast %411 : vector<16xf32> to vector<16x1xf32>
    %cst_160 = arith.constant 3.125000e-02 : f32
    %413 = vector.broadcast %cst_160 : f32 to vector<16x1xf32>
    %414 = arith.mulf %412, %413 : vector<16x1xf32>
    %415 = arith.mulf %409, %409 : vector<16x1xf32>
    %416 = arith.subf %414, %415 : vector<16x1xf32>
    %417 = vector.broadcast %409 : vector<16x1xf32> to vector<16x32xf32>
    %418 = arith.subf %403, %417 : vector<16x32xf32>
    %cst_161 = arith.constant 9.99999974E-6 : f32
    %419 = vector.broadcast %cst_161 : f32 to vector<16x1xf32>
    %420 = arith.addf %416, %419 : vector<16x1xf32>
    %421 = math.rsqrt %420 : vector<16x1xf32>
    %422 = vector.broadcast %421 : vector<16x1xf32> to vector<16x32xf32>
    %423 = arith.mulf %418, %422 : vector<16x32xf32>
    %424 = vector.broadcast %404 : vector<1x32xf32> to vector<16x32xf32>
    %425 = arith.mulf %423, %424 : vector<16x32xf32>
    %426 = vector.broadcast %405 : vector<1x32xf32> to vector<16x32xf32>
    %427 = arith.addf %425, %426 : vector<16x32xf32>
    %c8_162 = arith.constant 8 : index
    %c0_163 = arith.constant 0 : index
    %c0_164 = arith.constant 0 : index
    %428 = vector.load %arg6[%c8_162, %c0_163, %c0_164] : memref<16x32x32xf32, #tpu.memory_space<vmem>>, vector<1x32x32xf32>
    %429 = vector.shape_cast %428 : vector<1x32x32xf32> to vector<32x32xf32>
    %c9_165 = arith.constant 9 : index
    %c0_166 = arith.constant 0 : index
    %c0_167 = arith.constant 0 : index
    %430 = vector.load %arg6[%c9_165, %c0_166, %c0_167] : memref<16x32x32xf32, #tpu.memory_space<vmem>>, vector<1x32x32xf32>
    %431 = vector.shape_cast %430 : vector<1x32x32xf32> to vector<32x32xf32>
    %c10 = arith.constant 10 : index
    %c0_168 = arith.constant 0 : index
    %c0_169 = arith.constant 0 : index
    %432 = vector.load %arg6[%c10, %c0_168, %c0_169] : memref<16x32x32xf32, #tpu.memory_space<vmem>>, vector<1x32x32xf32>
    %433 = vector.shape_cast %432 : vector<1x32x32xf32> to vector<32x32xf32>
    %c11 = arith.constant 11 : index
    %c0_170 = arith.constant 0 : index
    %c0_171 = arith.constant 0 : index
    %434 = vector.load %arg6[%c11, %c0_170, %c0_171] : memref<16x32x32xf32, #tpu.memory_space<vmem>>, vector<1x32x32xf32>
    %435 = vector.shape_cast %434 : vector<1x32x32xf32> to vector<32x32xf32>
    %c10_172 = arith.constant 10 : index
    %c0_173 = arith.constant 0 : index
    %436 = vector.load %arg9[%c10_172, %c0_173] : memref<20x128xf32, #tpu.memory_space<vmem>>, vector<1x32xf32>
    %cst_174 = arith.constant dense<0.000000e+00> : vector<16x32xf32>
    %437 = tpu.matmul %427, %429, %cst_174 {dimension_numbers = #tpu.dot_dimension_numbers<[1], [0], [0], [1], [0, 0, 1, 1], [], []>} : vector<16x32xf32>, vector<32x32xf32>, vector<16x32xf32> -> vector<16x32xf32>
    %cst_175 = arith.constant dense<0.000000e+00> : vector<16x32xf32>
    %438 = tpu.matmul %427, %431, %cst_175 {dimension_numbers = #tpu.dot_dimension_numbers<[1], [0], [0], [1], [0, 0, 1, 1], [], []>} : vector<16x32xf32>, vector<32x32xf32>, vector<16x32xf32> -> vector<16x32xf32>
    %cst_176 = arith.constant dense<0.000000e+00> : vector<16x32xf32>
    %439 = tpu.matmul %427, %433, %cst_176 {dimension_numbers = #tpu.dot_dimension_numbers<[1], [0], [0], [1], [0, 0, 1, 1], [], []>} : vector<16x32xf32>, vector<32x32xf32>, vector<16x32xf32> -> vector<16x32xf32>
    %440 = vector.extract_strided_slice %439 {offsets = [0, 0], sizes = [8, 8], strides = [1, 1]} : vector<16x32xf32> to vector<8x8xf32>
    %441 = vector.extract_strided_slice %438 {offsets = [0, 0], sizes = [8, 8], strides = [1, 1]} : vector<16x32xf32> to vector<8x8xf32>
    %cst_177 = arith.constant dense<0.000000e+00> : vector<8x8xf32>
    %442 = tpu.matmul %440, %441, %cst_177 {dimension_numbers = #tpu.dot_dimension_numbers<[1], [1], [0], [0], [0, 0, 1, 0], [], []>} : vector<8x8xf32>, vector<8x8xf32>, vector<8x8xf32> -> vector<8x8xf32>
    %443 = arith.addf %442, %17 : vector<8x8xf32>
    %cst_178 = arith.constant dense<0xFF800000> : vector<8xf32>
    %444 = vector.multi_reduction <maximumf>, %443, %cst_178 [1] : vector<8x8xf32> to vector<8xf32>
    %445 = vector.shape_cast %444 : vector<8xf32> to vector<8x1xf32>
    %446 = vector.broadcast %445 : vector<8x1xf32> to vector<8x8xf32>
    %447 = arith.subf %443, %446 : vector<8x8xf32>
    %448 = math.exp %447 : vector<8x8xf32>
    %cst_179 = arith.constant dense<0.000000e+00> : vector<8xf32>
    %449 = vector.multi_reduction <add>, %448, %cst_179 [1] : vector<8x8xf32> to vector<8xf32>
    %450 = vector.shape_cast %449 : vector<8xf32> to vector<8x1xf32>
    %451 = tpu.reciprocal %450 {approx = true} : vector<8x1xf32> -> vector<8x1xf32>
    %452 = vector.broadcast %451 : vector<8x1xf32> to vector<8x8xf32>
    %453 = arith.mulf %448, %452 : vector<8x8xf32>
    %454 = vector.extract_strided_slice %437 {offsets = [0, 0], sizes = [8, 8], strides = [1, 1]} : vector<16x32xf32> to vector<8x8xf32>
    %cst_180 = arith.constant dense<0.000000e+00> : vector<8x8xf32>
    %455 = tpu.matmul %453, %454, %cst_180 {dimension_numbers = #tpu.dot_dimension_numbers<[1], [0], [0], [1], [0, 0, 1, 1], [], []>} : vector<8x8xf32>, vector<8x8xf32>, vector<8x8xf32> -> vector<8x8xf32>
    %456 = vector.extract_strided_slice %439 {offsets = [0, 8], sizes = [8, 8], strides = [1, 1]} : vector<16x32xf32> to vector<8x8xf32>
    %457 = vector.extract_strided_slice %438 {offsets = [0, 8], sizes = [8, 8], strides = [1, 1]} : vector<16x32xf32> to vector<8x8xf32>
    %cst_181 = arith.constant dense<0.000000e+00> : vector<8x8xf32>
    %458 = tpu.matmul %456, %457, %cst_181 {dimension_numbers = #tpu.dot_dimension_numbers<[1], [1], [0], [0], [0, 0, 1, 0], [], []>} : vector<8x8xf32>, vector<8x8xf32>, vector<8x8xf32> -> vector<8x8xf32>
    %459 = arith.addf %458, %17 : vector<8x8xf32>
    %cst_182 = arith.constant dense<0xFF800000> : vector<8xf32>
    %460 = vector.multi_reduction <maximumf>, %459, %cst_182 [1] : vector<8x8xf32> to vector<8xf32>
    %461 = vector.shape_cast %460 : vector<8xf32> to vector<8x1xf32>
    %462 = vector.broadcast %461 : vector<8x1xf32> to vector<8x8xf32>
    %463 = arith.subf %459, %462 : vector<8x8xf32>
    %464 = math.exp %463 : vector<8x8xf32>
    %cst_183 = arith.constant dense<0.000000e+00> : vector<8xf32>
    %465 = vector.multi_reduction <add>, %464, %cst_183 [1] : vector<8x8xf32> to vector<8xf32>
    %466 = vector.shape_cast %465 : vector<8xf32> to vector<8x1xf32>
    %467 = tpu.reciprocal %466 {approx = true} : vector<8x1xf32> -> vector<8x1xf32>
    %468 = vector.broadcast %467 : vector<8x1xf32> to vector<8x8xf32>
    %469 = arith.mulf %464, %468 : vector<8x8xf32>
    %470 = vector.extract_strided_slice %437 {offsets = [0, 8], sizes = [8, 8], strides = [1, 1]} : vector<16x32xf32> to vector<8x8xf32>
    %cst_184 = arith.constant dense<0.000000e+00> : vector<8x8xf32>
    %471 = tpu.matmul %469, %470, %cst_184 {dimension_numbers = #tpu.dot_dimension_numbers<[1], [0], [0], [1], [0, 0, 1, 1], [], []>} : vector<8x8xf32>, vector<8x8xf32>, vector<8x8xf32> -> vector<8x8xf32>
    %472 = vector.extract_strided_slice %439 {offsets = [0, 16], sizes = [8, 8], strides = [1, 1]} : vector<16x32xf32> to vector<8x8xf32>
    %473 = vector.extract_strided_slice %438 {offsets = [0, 16], sizes = [8, 8], strides = [1, 1]} : vector<16x32xf32> to vector<8x8xf32>
    %cst_185 = arith.constant dense<0.000000e+00> : vector<8x8xf32>
    %474 = tpu.matmul %472, %473, %cst_185 {dimension_numbers = #tpu.dot_dimension_numbers<[1], [1], [0], [0], [0, 0, 1, 0], [], []>} : vector<8x8xf32>, vector<8x8xf32>, vector<8x8xf32> -> vector<8x8xf32>
    %475 = arith.addf %474, %17 : vector<8x8xf32>
    %cst_186 = arith.constant dense<0xFF800000> : vector<8xf32>
    %476 = vector.multi_reduction <maximumf>, %475, %cst_186 [1] : vector<8x8xf32> to vector<8xf32>
    %477 = vector.shape_cast %476 : vector<8xf32> to vector<8x1xf32>
    %478 = vector.broadcast %477 : vector<8x1xf32> to vector<8x8xf32>
    %479 = arith.subf %475, %478 : vector<8x8xf32>
    %480 = math.exp %479 : vector<8x8xf32>
    %cst_187 = arith.constant dense<0.000000e+00> : vector<8xf32>
    %481 = vector.multi_reduction <add>, %480, %cst_187 [1] : vector<8x8xf32> to vector<8xf32>
    %482 = vector.shape_cast %481 : vector<8xf32> to vector<8x1xf32>
    %483 = tpu.reciprocal %482 {approx = true} : vector<8x1xf32> -> vector<8x1xf32>
    %484 = vector.broadcast %483 : vector<8x1xf32> to vector<8x8xf32>
    %485 = arith.mulf %480, %484 : vector<8x8xf32>
    %486 = vector.extract_strided_slice %437 {offsets = [0, 16], sizes = [8, 8], strides = [1, 1]} : vector<16x32xf32> to vector<8x8xf32>
    %cst_188 = arith.constant dense<0.000000e+00> : vector<8x8xf32>
    %487 = tpu.matmul %485, %486, %cst_188 {dimension_numbers = #tpu.dot_dimension_numbers<[1], [0], [0], [1], [0, 0, 1, 1], [], []>} : vector<8x8xf32>, vector<8x8xf32>, vector<8x8xf32> -> vector<8x8xf32>
    %488 = vector.extract_strided_slice %439 {offsets = [0, 24], sizes = [8, 8], strides = [1, 1]} : vector<16x32xf32> to vector<8x8xf32>
    %489 = vector.extract_strided_slice %438 {offsets = [0, 24], sizes = [8, 8], strides = [1, 1]} : vector<16x32xf32> to vector<8x8xf32>
    %cst_189 = arith.constant dense<0.000000e+00> : vector<8x8xf32>
    %490 = tpu.matmul %488, %489, %cst_189 {dimension_numbers = #tpu.dot_dimension_numbers<[1], [1], [0], [0], [0, 0, 1, 0], [], []>} : vector<8x8xf32>, vector<8x8xf32>, vector<8x8xf32> -> vector<8x8xf32>
    %491 = arith.addf %490, %17 : vector<8x8xf32>
    %cst_190 = arith.constant dense<0xFF800000> : vector<8xf32>
    %492 = vector.multi_reduction <maximumf>, %491, %cst_190 [1] : vector<8x8xf32> to vector<8xf32>
    %493 = vector.shape_cast %492 : vector<8xf32> to vector<8x1xf32>
    %494 = vector.broadcast %493 : vector<8x1xf32> to vector<8x8xf32>
    %495 = arith.subf %491, %494 : vector<8x8xf32>
    %496 = math.exp %495 : vector<8x8xf32>
    %cst_191 = arith.constant dense<0.000000e+00> : vector<8xf32>
    %497 = vector.multi_reduction <add>, %496, %cst_191 [1] : vector<8x8xf32> to vector<8xf32>
    %498 = vector.shape_cast %497 : vector<8xf32> to vector<8x1xf32>
    %499 = tpu.reciprocal %498 {approx = true} : vector<8x1xf32> -> vector<8x1xf32>
    %500 = vector.broadcast %499 : vector<8x1xf32> to vector<8x8xf32>
    %501 = arith.mulf %496, %500 : vector<8x8xf32>
    %502 = vector.extract_strided_slice %437 {offsets = [0, 24], sizes = [8, 8], strides = [1, 1]} : vector<16x32xf32> to vector<8x8xf32>
    %cst_192 = arith.constant dense<0.000000e+00> : vector<8x8xf32>
    %503 = tpu.matmul %501, %502, %cst_192 {dimension_numbers = #tpu.dot_dimension_numbers<[1], [0], [0], [1], [0, 0, 1, 1], [], []>} : vector<8x8xf32>, vector<8x8xf32>, vector<8x8xf32> -> vector<8x8xf32>
    %504 = tpu.concatenate %455, %471, %487, %503 in 1 : vector<8x8xf32>, vector<8x8xf32>, vector<8x8xf32>, vector<8x8xf32> -> vector<8x32xf32>
    %505 = vector.extract_strided_slice %439 {offsets = [8, 0], sizes = [8, 8], strides = [1, 1]} : vector<16x32xf32> to vector<8x8xf32>
    %506 = vector.extract_strided_slice %438 {offsets = [8, 0], sizes = [8, 8], strides = [1, 1]} : vector<16x32xf32> to vector<8x8xf32>
    %cst_193 = arith.constant dense<0.000000e+00> : vector<8x8xf32>
    %507 = tpu.matmul %505, %506, %cst_193 {dimension_numbers = #tpu.dot_dimension_numbers<[1], [1], [0], [0], [0, 0, 1, 0], [], []>} : vector<8x8xf32>, vector<8x8xf32>, vector<8x8xf32> -> vector<8x8xf32>
    %508 = arith.addf %507, %24 : vector<8x8xf32>
    %cst_194 = arith.constant dense<0xFF800000> : vector<8xf32>
    %509 = vector.multi_reduction <maximumf>, %508, %cst_194 [1] : vector<8x8xf32> to vector<8xf32>
    %510 = vector.shape_cast %509 : vector<8xf32> to vector<8x1xf32>
    %511 = vector.broadcast %510 : vector<8x1xf32> to vector<8x8xf32>
    %512 = arith.subf %508, %511 : vector<8x8xf32>
    %513 = math.exp %512 : vector<8x8xf32>
    %cst_195 = arith.constant dense<0.000000e+00> : vector<8xf32>
    %514 = vector.multi_reduction <add>, %513, %cst_195 [1] : vector<8x8xf32> to vector<8xf32>
    %515 = vector.shape_cast %514 : vector<8xf32> to vector<8x1xf32>
    %516 = tpu.reciprocal %515 {approx = true} : vector<8x1xf32> -> vector<8x1xf32>
    %517 = vector.broadcast %516 : vector<8x1xf32> to vector<8x8xf32>
    %518 = arith.mulf %513, %517 : vector<8x8xf32>
    %519 = vector.extract_strided_slice %437 {offsets = [8, 0], sizes = [8, 8], strides = [1, 1]} : vector<16x32xf32> to vector<8x8xf32>
    %cst_196 = arith.constant dense<0.000000e+00> : vector<8x8xf32>
    %520 = tpu.matmul %518, %519, %cst_196 {dimension_numbers = #tpu.dot_dimension_numbers<[1], [0], [0], [1], [0, 0, 1, 1], [], []>} : vector<8x8xf32>, vector<8x8xf32>, vector<8x8xf32> -> vector<8x8xf32>
    %521 = vector.extract_strided_slice %439 {offsets = [8, 8], sizes = [8, 8], strides = [1, 1]} : vector<16x32xf32> to vector<8x8xf32>
    %522 = vector.extract_strided_slice %438 {offsets = [8, 8], sizes = [8, 8], strides = [1, 1]} : vector<16x32xf32> to vector<8x8xf32>
    %cst_197 = arith.constant dense<0.000000e+00> : vector<8x8xf32>
    %523 = tpu.matmul %521, %522, %cst_197 {dimension_numbers = #tpu.dot_dimension_numbers<[1], [1], [0], [0], [0, 0, 1, 0], [], []>} : vector<8x8xf32>, vector<8x8xf32>, vector<8x8xf32> -> vector<8x8xf32>
    %524 = arith.addf %523, %24 : vector<8x8xf32>
    %cst_198 = arith.constant dense<0xFF800000> : vector<8xf32>
    %525 = vector.multi_reduction <maximumf>, %524, %cst_198 [1] : vector<8x8xf32> to vector<8xf32>
    %526 = vector.shape_cast %525 : vector<8xf32> to vector<8x1xf32>
    %527 = vector.broadcast %526 : vector<8x1xf32> to vector<8x8xf32>
    %528 = arith.subf %524, %527 : vector<8x8xf32>
    %529 = math.exp %528 : vector<8x8xf32>
    %cst_199 = arith.constant dense<0.000000e+00> : vector<8xf32>
    %530 = vector.multi_reduction <add>, %529, %cst_199 [1] : vector<8x8xf32> to vector<8xf32>
    %531 = vector.shape_cast %530 : vector<8xf32> to vector<8x1xf32>
    %532 = tpu.reciprocal %531 {approx = true} : vector<8x1xf32> -> vector<8x1xf32>
    %533 = vector.broadcast %532 : vector<8x1xf32> to vector<8x8xf32>
    %534 = arith.mulf %529, %533 : vector<8x8xf32>
    %535 = vector.extract_strided_slice %437 {offsets = [8, 8], sizes = [8, 8], strides = [1, 1]} : vector<16x32xf32> to vector<8x8xf32>
    %cst_200 = arith.constant dense<0.000000e+00> : vector<8x8xf32>
    %536 = tpu.matmul %534, %535, %cst_200 {dimension_numbers = #tpu.dot_dimension_numbers<[1], [0], [0], [1], [0, 0, 1, 1], [], []>} : vector<8x8xf32>, vector<8x8xf32>, vector<8x8xf32> -> vector<8x8xf32>
    %537 = vector.extract_strided_slice %439 {offsets = [8, 16], sizes = [8, 8], strides = [1, 1]} : vector<16x32xf32> to vector<8x8xf32>
    %538 = vector.extract_strided_slice %438 {offsets = [8, 16], sizes = [8, 8], strides = [1, 1]} : vector<16x32xf32> to vector<8x8xf32>
    %cst_201 = arith.constant dense<0.000000e+00> : vector<8x8xf32>
    %539 = tpu.matmul %537, %538, %cst_201 {dimension_numbers = #tpu.dot_dimension_numbers<[1], [1], [0], [0], [0, 0, 1, 0], [], []>} : vector<8x8xf32>, vector<8x8xf32>, vector<8x8xf32> -> vector<8x8xf32>
    %540 = arith.addf %539, %24 : vector<8x8xf32>
    %cst_202 = arith.constant dense<0xFF800000> : vector<8xf32>
    %541 = vector.multi_reduction <maximumf>, %540, %cst_202 [1] : vector<8x8xf32> to vector<8xf32>
    %542 = vector.shape_cast %541 : vector<8xf32> to vector<8x1xf32>
    %543 = vector.broadcast %542 : vector<8x1xf32> to vector<8x8xf32>
    %544 = arith.subf %540, %543 : vector<8x8xf32>
    %545 = math.exp %544 : vector<8x8xf32>
    %cst_203 = arith.constant dense<0.000000e+00> : vector<8xf32>
    %546 = vector.multi_reduction <add>, %545, %cst_203 [1] : vector<8x8xf32> to vector<8xf32>
    %547 = vector.shape_cast %546 : vector<8xf32> to vector<8x1xf32>
    %548 = tpu.reciprocal %547 {approx = true} : vector<8x1xf32> -> vector<8x1xf32>
    %549 = vector.broadcast %548 : vector<8x1xf32> to vector<8x8xf32>
    %550 = arith.mulf %545, %549 : vector<8x8xf32>
    %551 = vector.extract_strided_slice %437 {offsets = [8, 16], sizes = [8, 8], strides = [1, 1]} : vector<16x32xf32> to vector<8x8xf32>
    %cst_204 = arith.constant dense<0.000000e+00> : vector<8x8xf32>
    %552 = tpu.matmul %550, %551, %cst_204 {dimension_numbers = #tpu.dot_dimension_numbers<[1], [0], [0], [1], [0, 0, 1, 1], [], []>} : vector<8x8xf32>, vector<8x8xf32>, vector<8x8xf32> -> vector<8x8xf32>
    %553 = vector.extract_strided_slice %439 {offsets = [8, 24], sizes = [8, 8], strides = [1, 1]} : vector<16x32xf32> to vector<8x8xf32>
    %554 = vector.extract_strided_slice %438 {offsets = [8, 24], sizes = [8, 8], strides = [1, 1]} : vector<16x32xf32> to vector<8x8xf32>
    %cst_205 = arith.constant dense<0.000000e+00> : vector<8x8xf32>
    %555 = tpu.matmul %553, %554, %cst_205 {dimension_numbers = #tpu.dot_dimension_numbers<[1], [1], [0], [0], [0, 0, 1, 0], [], []>} : vector<8x8xf32>, vector<8x8xf32>, vector<8x8xf32> -> vector<8x8xf32>
    %556 = arith.addf %555, %24 : vector<8x8xf32>
    %cst_206 = arith.constant dense<0xFF800000> : vector<8xf32>
    %557 = vector.multi_reduction <maximumf>, %556, %cst_206 [1] : vector<8x8xf32> to vector<8xf32>
    %558 = vector.shape_cast %557 : vector<8xf32> to vector<8x1xf32>
    %559 = vector.broadcast %558 : vector<8x1xf32> to vector<8x8xf32>
    %560 = arith.subf %556, %559 : vector<8x8xf32>
    %561 = math.exp %560 : vector<8x8xf32>
    %cst_207 = arith.constant dense<0.000000e+00> : vector<8xf32>
    %562 = vector.multi_reduction <add>, %561, %cst_207 [1] : vector<8x8xf32> to vector<8xf32>
    %563 = vector.shape_cast %562 : vector<8xf32> to vector<8x1xf32>
    %564 = tpu.reciprocal %563 {approx = true} : vector<8x1xf32> -> vector<8x1xf32>
    %565 = vector.broadcast %564 : vector<8x1xf32> to vector<8x8xf32>
    %566 = arith.mulf %561, %565 : vector<8x8xf32>
    %567 = vector.extract_strided_slice %437 {offsets = [8, 24], sizes = [8, 8], strides = [1, 1]} : vector<16x32xf32> to vector<8x8xf32>
    %cst_208 = arith.constant dense<0.000000e+00> : vector<8x8xf32>
    %568 = tpu.matmul %566, %567, %cst_208 {dimension_numbers = #tpu.dot_dimension_numbers<[1], [0], [0], [1], [0, 0, 1, 1], [], []>} : vector<8x8xf32>, vector<8x8xf32>, vector<8x8xf32> -> vector<8x8xf32>
    %569 = tpu.concatenate %520, %536, %552, %568 in 1 : vector<8x8xf32>, vector<8x8xf32>, vector<8x8xf32>, vector<8x8xf32> -> vector<8x32xf32>
    %570 = tpu.concatenate %504, %569 in 0 : vector<8x32xf32>, vector<8x32xf32> -> vector<16x32xf32>
    %cst_209 = arith.constant dense<0.000000e+00> : vector<16x32xf32>
    %571 = tpu.matmul %570, %435, %cst_209 {dimension_numbers = #tpu.dot_dimension_numbers<[1], [0], [0], [1], [0, 0, 1, 1], [], []>} : vector<16x32xf32>, vector<32x32xf32>, vector<16x32xf32> -> vector<16x32xf32>
    %572 = vector.broadcast %436 : vector<1x32xf32> to vector<16x32xf32>
    %573 = arith.addf %571, %572 : vector<16x32xf32>
    %574 = arith.addf %573, %427 : vector<16x32xf32>
    %c11_210 = arith.constant 11 : index
    %c0_211 = arith.constant 0 : index
    %575 = vector.load %arg9[%c11_210, %c0_211] : memref<20x128xf32, #tpu.memory_space<vmem>>, vector<1x32xf32>
    %c12 = arith.constant 12 : index
    %c0_212 = arith.constant 0 : index
    %576 = vector.load %arg9[%c12, %c0_212] : memref<20x128xf32, #tpu.memory_space<vmem>>, vector<1x32xf32>
    %cst_213 = arith.constant dense<0.000000e+00> : vector<16xf32>
    %577 = vector.multi_reduction <add>, %574, %cst_213 [1] : vector<16x32xf32> to vector<16xf32>
    %578 = vector.shape_cast %577 : vector<16xf32> to vector<16x1xf32>
    %cst_214 = arith.constant 3.125000e-02 : f32
    %579 = vector.broadcast %cst_214 : f32 to vector<16x1xf32>
    %580 = arith.mulf %578, %579 : vector<16x1xf32>
    %581 = arith.mulf %574, %574 : vector<16x32xf32>
    %cst_215 = arith.constant dense<0.000000e+00> : vector<16xf32>
    %582 = vector.multi_reduction <add>, %581, %cst_215 [1] : vector<16x32xf32> to vector<16xf32>
    %583 = vector.shape_cast %582 : vector<16xf32> to vector<16x1xf32>
    %cst_216 = arith.constant 3.125000e-02 : f32
    %584 = vector.broadcast %cst_216 : f32 to vector<16x1xf32>
    %585 = arith.mulf %583, %584 : vector<16x1xf32>
    %586 = arith.mulf %580, %580 : vector<16x1xf32>
    %587 = arith.subf %585, %586 : vector<16x1xf32>
    %588 = vector.broadcast %580 : vector<16x1xf32> to vector<16x32xf32>
    %589 = arith.subf %574, %588 : vector<16x32xf32>
    %cst_217 = arith.constant 9.99999974E-6 : f32
    %590 = vector.broadcast %cst_217 : f32 to vector<16x1xf32>
    %591 = arith.addf %587, %590 : vector<16x1xf32>
    %592 = math.rsqrt %591 : vector<16x1xf32>
    %593 = vector.broadcast %592 : vector<16x1xf32> to vector<16x32xf32>
    %594 = arith.mulf %589, %593 : vector<16x32xf32>
    %595 = vector.broadcast %575 : vector<1x32xf32> to vector<16x32xf32>
    %596 = arith.mulf %594, %595 : vector<16x32xf32>
    %597 = vector.broadcast %576 : vector<1x32xf32> to vector<16x32xf32>
    %598 = arith.addf %596, %597 : vector<16x32xf32>
    %c12_218 = arith.constant 12 : index
    %c0_219 = arith.constant 0 : index
    %c0_220 = arith.constant 0 : index
    %599 = vector.load %arg6[%c12_218, %c0_219, %c0_220] : memref<16x32x32xf32, #tpu.memory_space<vmem>>, vector<1x32x32xf32>
    %600 = vector.shape_cast %599 : vector<1x32x32xf32> to vector<32x32xf32>
    %c13 = arith.constant 13 : index
    %c0_221 = arith.constant 0 : index
    %c0_222 = arith.constant 0 : index
    %601 = vector.load %arg6[%c13, %c0_221, %c0_222] : memref<16x32x32xf32, #tpu.memory_space<vmem>>, vector<1x32x32xf32>
    %602 = vector.shape_cast %601 : vector<1x32x32xf32> to vector<32x32xf32>
    %c14 = arith.constant 14 : index
    %c0_223 = arith.constant 0 : index
    %c0_224 = arith.constant 0 : index
    %603 = vector.load %arg6[%c14, %c0_223, %c0_224] : memref<16x32x32xf32, #tpu.memory_space<vmem>>, vector<1x32x32xf32>
    %604 = vector.shape_cast %603 : vector<1x32x32xf32> to vector<32x32xf32>
    %c15 = arith.constant 15 : index
    %c0_225 = arith.constant 0 : index
    %c0_226 = arith.constant 0 : index
    %605 = vector.load %arg6[%c15, %c0_225, %c0_226] : memref<16x32x32xf32, #tpu.memory_space<vmem>>, vector<1x32x32xf32>
    %606 = vector.shape_cast %605 : vector<1x32x32xf32> to vector<32x32xf32>
    %c13_227 = arith.constant 13 : index
    %c0_228 = arith.constant 0 : index
    %607 = vector.load %arg9[%c13_227, %c0_228] : memref<20x128xf32, #tpu.memory_space<vmem>>, vector<1x32xf32>
    %cst_229 = arith.constant dense<0.000000e+00> : vector<16x32xf32>
    %608 = tpu.matmul %10, %600, %cst_229 {dimension_numbers = #tpu.dot_dimension_numbers<[1], [0], [0], [1], [0, 0, 1, 1], [], []>} : vector<16x32xf32>, vector<32x32xf32>, vector<16x32xf32> -> vector<16x32xf32>
    %cst_230 = arith.constant dense<0.000000e+00> : vector<16x32xf32>
    %609 = tpu.matmul %598, %602, %cst_230 {dimension_numbers = #tpu.dot_dimension_numbers<[1], [0], [0], [1], [0, 0, 1, 1], [], []>} : vector<16x32xf32>, vector<32x32xf32>, vector<16x32xf32> -> vector<16x32xf32>
    %cst_231 = arith.constant dense<0.000000e+00> : vector<16x32xf32>
    %610 = tpu.matmul %10, %604, %cst_231 {dimension_numbers = #tpu.dot_dimension_numbers<[1], [0], [0], [1], [0, 0, 1, 1], [], []>} : vector<16x32xf32>, vector<32x32xf32>, vector<16x32xf32> -> vector<16x32xf32>
    %611 = vector.extract_strided_slice %610 {offsets = [0, 0], sizes = [8, 8], strides = [1, 1]} : vector<16x32xf32> to vector<8x8xf32>
    %612 = vector.extract_strided_slice %609 {offsets = [0, 0], sizes = [8, 8], strides = [1, 1]} : vector<16x32xf32> to vector<8x8xf32>
    %cst_232 = arith.constant dense<0.000000e+00> : vector<8x8xf32>
    %613 = tpu.matmul %611, %612, %cst_232 {dimension_numbers = #tpu.dot_dimension_numbers<[1], [1], [0], [0], [0, 0, 1, 0], [], []>} : vector<8x8xf32>, vector<8x8xf32>, vector<8x8xf32> -> vector<8x8xf32>
    %614 = vector.broadcast %31 : vector<1x8xf32> to vector<8x8xf32>
    %615 = arith.addf %613, %614 : vector<8x8xf32>
    %cst_233 = arith.constant dense<0xFF800000> : vector<8xf32>
    %616 = vector.multi_reduction <maximumf>, %615, %cst_233 [1] : vector<8x8xf32> to vector<8xf32>
    %617 = vector.shape_cast %616 : vector<8xf32> to vector<8x1xf32>
    %618 = vector.broadcast %617 : vector<8x1xf32> to vector<8x8xf32>
    %619 = arith.subf %615, %618 : vector<8x8xf32>
    %620 = math.exp %619 : vector<8x8xf32>
    %cst_234 = arith.constant dense<0.000000e+00> : vector<8xf32>
    %621 = vector.multi_reduction <add>, %620, %cst_234 [1] : vector<8x8xf32> to vector<8xf32>
    %622 = vector.shape_cast %621 : vector<8xf32> to vector<8x1xf32>
    %623 = tpu.reciprocal %622 {approx = true} : vector<8x1xf32> -> vector<8x1xf32>
    %624 = vector.broadcast %623 : vector<8x1xf32> to vector<8x8xf32>
    %625 = arith.mulf %620, %624 : vector<8x8xf32>
    %626 = vector.extract_strided_slice %608 {offsets = [0, 0], sizes = [8, 8], strides = [1, 1]} : vector<16x32xf32> to vector<8x8xf32>
    %cst_235 = arith.constant dense<0.000000e+00> : vector<8x8xf32>
    %627 = tpu.matmul %625, %626, %cst_235 {dimension_numbers = #tpu.dot_dimension_numbers<[1], [0], [0], [1], [0, 0, 1, 1], [], []>} : vector<8x8xf32>, vector<8x8xf32>, vector<8x8xf32> -> vector<8x8xf32>
    %628 = vector.extract_strided_slice %610 {offsets = [0, 8], sizes = [8, 8], strides = [1, 1]} : vector<16x32xf32> to vector<8x8xf32>
    %629 = vector.extract_strided_slice %609 {offsets = [0, 8], sizes = [8, 8], strides = [1, 1]} : vector<16x32xf32> to vector<8x8xf32>
    %cst_236 = arith.constant dense<0.000000e+00> : vector<8x8xf32>
    %630 = tpu.matmul %628, %629, %cst_236 {dimension_numbers = #tpu.dot_dimension_numbers<[1], [1], [0], [0], [0, 0, 1, 0], [], []>} : vector<8x8xf32>, vector<8x8xf32>, vector<8x8xf32> -> vector<8x8xf32>
    %631 = vector.broadcast %31 : vector<1x8xf32> to vector<8x8xf32>
    %632 = arith.addf %630, %631 : vector<8x8xf32>
    %cst_237 = arith.constant dense<0xFF800000> : vector<8xf32>
    %633 = vector.multi_reduction <maximumf>, %632, %cst_237 [1] : vector<8x8xf32> to vector<8xf32>
    %634 = vector.shape_cast %633 : vector<8xf32> to vector<8x1xf32>
    %635 = vector.broadcast %634 : vector<8x1xf32> to vector<8x8xf32>
    %636 = arith.subf %632, %635 : vector<8x8xf32>
    %637 = math.exp %636 : vector<8x8xf32>
    %cst_238 = arith.constant dense<0.000000e+00> : vector<8xf32>
    %638 = vector.multi_reduction <add>, %637, %cst_238 [1] : vector<8x8xf32> to vector<8xf32>
    %639 = vector.shape_cast %638 : vector<8xf32> to vector<8x1xf32>
    %640 = tpu.reciprocal %639 {approx = true} : vector<8x1xf32> -> vector<8x1xf32>
    %641 = vector.broadcast %640 : vector<8x1xf32> to vector<8x8xf32>
    %642 = arith.mulf %637, %641 : vector<8x8xf32>
    %643 = vector.extract_strided_slice %608 {offsets = [0, 8], sizes = [8, 8], strides = [1, 1]} : vector<16x32xf32> to vector<8x8xf32>
    %cst_239 = arith.constant dense<0.000000e+00> : vector<8x8xf32>
    %644 = tpu.matmul %642, %643, %cst_239 {dimension_numbers = #tpu.dot_dimension_numbers<[1], [0], [0], [1], [0, 0, 1, 1], [], []>} : vector<8x8xf32>, vector<8x8xf32>, vector<8x8xf32> -> vector<8x8xf32>
    %645 = vector.extract_strided_slice %610 {offsets = [0, 16], sizes = [8, 8], strides = [1, 1]} : vector<16x32xf32> to vector<8x8xf32>
    %646 = vector.extract_strided_slice %609 {offsets = [0, 16], sizes = [8, 8], strides = [1, 1]} : vector<16x32xf32> to vector<8x8xf32>
    %cst_240 = arith.constant dense<0.000000e+00> : vector<8x8xf32>
    %647 = tpu.matmul %645, %646, %cst_240 {dimension_numbers = #tpu.dot_dimension_numbers<[1], [1], [0], [0], [0, 0, 1, 0], [], []>} : vector<8x8xf32>, vector<8x8xf32>, vector<8x8xf32> -> vector<8x8xf32>
    %648 = vector.broadcast %31 : vector<1x8xf32> to vector<8x8xf32>
    %649 = arith.addf %647, %648 : vector<8x8xf32>
    %cst_241 = arith.constant dense<0xFF800000> : vector<8xf32>
    %650 = vector.multi_reduction <maximumf>, %649, %cst_241 [1] : vector<8x8xf32> to vector<8xf32>
    %651 = vector.shape_cast %650 : vector<8xf32> to vector<8x1xf32>
    %652 = vector.broadcast %651 : vector<8x1xf32> to vector<8x8xf32>
    %653 = arith.subf %649, %652 : vector<8x8xf32>
    %654 = math.exp %653 : vector<8x8xf32>
    %cst_242 = arith.constant dense<0.000000e+00> : vector<8xf32>
    %655 = vector.multi_reduction <add>, %654, %cst_242 [1] : vector<8x8xf32> to vector<8xf32>
    %656 = vector.shape_cast %655 : vector<8xf32> to vector<8x1xf32>
    %657 = tpu.reciprocal %656 {approx = true} : vector<8x1xf32> -> vector<8x1xf32>
    %658 = vector.broadcast %657 : vector<8x1xf32> to vector<8x8xf32>
    %659 = arith.mulf %654, %658 : vector<8x8xf32>
    %660 = vector.extract_strided_slice %608 {offsets = [0, 16], sizes = [8, 8], strides = [1, 1]} : vector<16x32xf32> to vector<8x8xf32>
    %cst_243 = arith.constant dense<0.000000e+00> : vector<8x8xf32>
    %661 = tpu.matmul %659, %660, %cst_243 {dimension_numbers = #tpu.dot_dimension_numbers<[1], [0], [0], [1], [0, 0, 1, 1], [], []>} : vector<8x8xf32>, vector<8x8xf32>, vector<8x8xf32> -> vector<8x8xf32>
    %662 = vector.extract_strided_slice %610 {offsets = [0, 24], sizes = [8, 8], strides = [1, 1]} : vector<16x32xf32> to vector<8x8xf32>
    %663 = vector.extract_strided_slice %609 {offsets = [0, 24], sizes = [8, 8], strides = [1, 1]} : vector<16x32xf32> to vector<8x8xf32>
    %cst_244 = arith.constant dense<0.000000e+00> : vector<8x8xf32>
    %664 = tpu.matmul %662, %663, %cst_244 {dimension_numbers = #tpu.dot_dimension_numbers<[1], [1], [0], [0], [0, 0, 1, 0], [], []>} : vector<8x8xf32>, vector<8x8xf32>, vector<8x8xf32> -> vector<8x8xf32>
    %665 = vector.broadcast %31 : vector<1x8xf32> to vector<8x8xf32>
    %666 = arith.addf %664, %665 : vector<8x8xf32>
    %cst_245 = arith.constant dense<0xFF800000> : vector<8xf32>
    %667 = vector.multi_reduction <maximumf>, %666, %cst_245 [1] : vector<8x8xf32> to vector<8xf32>
    %668 = vector.shape_cast %667 : vector<8xf32> to vector<8x1xf32>
    %669 = vector.broadcast %668 : vector<8x1xf32> to vector<8x8xf32>
    %670 = arith.subf %666, %669 : vector<8x8xf32>
    %671 = math.exp %670 : vector<8x8xf32>
    %cst_246 = arith.constant dense<0.000000e+00> : vector<8xf32>
    %672 = vector.multi_reduction <add>, %671, %cst_246 [1] : vector<8x8xf32> to vector<8xf32>
    %673 = vector.shape_cast %672 : vector<8xf32> to vector<8x1xf32>
    %674 = tpu.reciprocal %673 {approx = true} : vector<8x1xf32> -> vector<8x1xf32>
    %675 = vector.broadcast %674 : vector<8x1xf32> to vector<8x8xf32>
    %676 = arith.mulf %671, %675 : vector<8x8xf32>
    %677 = vector.extract_strided_slice %608 {offsets = [0, 24], sizes = [8, 8], strides = [1, 1]} : vector<16x32xf32> to vector<8x8xf32>
    %cst_247 = arith.constant dense<0.000000e+00> : vector<8x8xf32>
    %678 = tpu.matmul %676, %677, %cst_247 {dimension_numbers = #tpu.dot_dimension_numbers<[1], [0], [0], [1], [0, 0, 1, 1], [], []>} : vector<8x8xf32>, vector<8x8xf32>, vector<8x8xf32> -> vector<8x8xf32>
    %679 = tpu.concatenate %627, %644, %661, %678 in 1 : vector<8x8xf32>, vector<8x8xf32>, vector<8x8xf32>, vector<8x8xf32> -> vector<8x32xf32>
    %680 = vector.extract_strided_slice %610 {offsets = [8, 0], sizes = [8, 8], strides = [1, 1]} : vector<16x32xf32> to vector<8x8xf32>
    %681 = vector.extract_strided_slice %609 {offsets = [8, 0], sizes = [8, 8], strides = [1, 1]} : vector<16x32xf32> to vector<8x8xf32>
    %cst_248 = arith.constant dense<0.000000e+00> : vector<8x8xf32>
    %682 = tpu.matmul %680, %681, %cst_248 {dimension_numbers = #tpu.dot_dimension_numbers<[1], [1], [0], [0], [0, 0, 1, 0], [], []>} : vector<8x8xf32>, vector<8x8xf32>, vector<8x8xf32> -> vector<8x8xf32>
    %683 = vector.broadcast %38 : vector<1x8xf32> to vector<8x8xf32>
    %684 = arith.addf %682, %683 : vector<8x8xf32>
    %cst_249 = arith.constant dense<0xFF800000> : vector<8xf32>
    %685 = vector.multi_reduction <maximumf>, %684, %cst_249 [1] : vector<8x8xf32> to vector<8xf32>
    %686 = vector.shape_cast %685 : vector<8xf32> to vector<8x1xf32>
    %687 = vector.broadcast %686 : vector<8x1xf32> to vector<8x8xf32>
    %688 = arith.subf %684, %687 : vector<8x8xf32>
    %689 = math.exp %688 : vector<8x8xf32>
    %cst_250 = arith.constant dense<0.000000e+00> : vector<8xf32>
    %690 = vector.multi_reduction <add>, %689, %cst_250 [1] : vector<8x8xf32> to vector<8xf32>
    %691 = vector.shape_cast %690 : vector<8xf32> to vector<8x1xf32>
    %692 = tpu.reciprocal %691 {approx = true} : vector<8x1xf32> -> vector<8x1xf32>
    %693 = vector.broadcast %692 : vector<8x1xf32> to vector<8x8xf32>
    %694 = arith.mulf %689, %693 : vector<8x8xf32>
    %695 = vector.extract_strided_slice %608 {offsets = [8, 0], sizes = [8, 8], strides = [1, 1]} : vector<16x32xf32> to vector<8x8xf32>
    %cst_251 = arith.constant dense<0.000000e+00> : vector<8x8xf32>
    %696 = tpu.matmul %694, %695, %cst_251 {dimension_numbers = #tpu.dot_dimension_numbers<[1], [0], [0], [1], [0, 0, 1, 1], [], []>} : vector<8x8xf32>, vector<8x8xf32>, vector<8x8xf32> -> vector<8x8xf32>
    %697 = vector.extract_strided_slice %610 {offsets = [8, 8], sizes = [8, 8], strides = [1, 1]} : vector<16x32xf32> to vector<8x8xf32>
    %698 = vector.extract_strided_slice %609 {offsets = [8, 8], sizes = [8, 8], strides = [1, 1]} : vector<16x32xf32> to vector<8x8xf32>
    %cst_252 = arith.constant dense<0.000000e+00> : vector<8x8xf32>
    %699 = tpu.matmul %697, %698, %cst_252 {dimension_numbers = #tpu.dot_dimension_numbers<[1], [1], [0], [0], [0, 0, 1, 0], [], []>} : vector<8x8xf32>, vector<8x8xf32>, vector<8x8xf32> -> vector<8x8xf32>
    %700 = vector.broadcast %38 : vector<1x8xf32> to vector<8x8xf32>
    %701 = arith.addf %699, %700 : vector<8x8xf32>
    %cst_253 = arith.constant dense<0xFF800000> : vector<8xf32>
    %702 = vector.multi_reduction <maximumf>, %701, %cst_253 [1] : vector<8x8xf32> to vector<8xf32>
    %703 = vector.shape_cast %702 : vector<8xf32> to vector<8x1xf32>
    %704 = vector.broadcast %703 : vector<8x1xf32> to vector<8x8xf32>
    %705 = arith.subf %701, %704 : vector<8x8xf32>
    %706 = math.exp %705 : vector<8x8xf32>
    %cst_254 = arith.constant dense<0.000000e+00> : vector<8xf32>
    %707 = vector.multi_reduction <add>, %706, %cst_254 [1] : vector<8x8xf32> to vector<8xf32>
    %708 = vector.shape_cast %707 : vector<8xf32> to vector<8x1xf32>
    %709 = tpu.reciprocal %708 {approx = true} : vector<8x1xf32> -> vector<8x1xf32>
    %710 = vector.broadcast %709 : vector<8x1xf32> to vector<8x8xf32>
    %711 = arith.mulf %706, %710 : vector<8x8xf32>
    %712 = vector.extract_strided_slice %608 {offsets = [8, 8], sizes = [8, 8], strides = [1, 1]} : vector<16x32xf32> to vector<8x8xf32>
    %cst_255 = arith.constant dense<0.000000e+00> : vector<8x8xf32>
    %713 = tpu.matmul %711, %712, %cst_255 {dimension_numbers = #tpu.dot_dimension_numbers<[1], [0], [0], [1], [0, 0, 1, 1], [], []>} : vector<8x8xf32>, vector<8x8xf32>, vector<8x8xf32> -> vector<8x8xf32>
    %714 = vector.extract_strided_slice %610 {offsets = [8, 16], sizes = [8, 8], strides = [1, 1]} : vector<16x32xf32> to vector<8x8xf32>
    %715 = vector.extract_strided_slice %609 {offsets = [8, 16], sizes = [8, 8], strides = [1, 1]} : vector<16x32xf32> to vector<8x8xf32>
    %cst_256 = arith.constant dense<0.000000e+00> : vector<8x8xf32>
    %716 = tpu.matmul %714, %715, %cst_256 {dimension_numbers = #tpu.dot_dimension_numbers<[1], [1], [0], [0], [0, 0, 1, 0], [], []>} : vector<8x8xf32>, vector<8x8xf32>, vector<8x8xf32> -> vector<8x8xf32>
    %717 = vector.broadcast %38 : vector<1x8xf32> to vector<8x8xf32>
    %718 = arith.addf %716, %717 : vector<8x8xf32>
    %cst_257 = arith.constant dense<0xFF800000> : vector<8xf32>
    %719 = vector.multi_reduction <maximumf>, %718, %cst_257 [1] : vector<8x8xf32> to vector<8xf32>
    %720 = vector.shape_cast %719 : vector<8xf32> to vector<8x1xf32>
    %721 = vector.broadcast %720 : vector<8x1xf32> to vector<8x8xf32>
    %722 = arith.subf %718, %721 : vector<8x8xf32>
    %723 = math.exp %722 : vector<8x8xf32>
    %cst_258 = arith.constant dense<0.000000e+00> : vector<8xf32>
    %724 = vector.multi_reduction <add>, %723, %cst_258 [1] : vector<8x8xf32> to vector<8xf32>
    %725 = vector.shape_cast %724 : vector<8xf32> to vector<8x1xf32>
    %726 = tpu.reciprocal %725 {approx = true} : vector<8x1xf32> -> vector<8x1xf32>
    %727 = vector.broadcast %726 : vector<8x1xf32> to vector<8x8xf32>
    %728 = arith.mulf %723, %727 : vector<8x8xf32>
    %729 = vector.extract_strided_slice %608 {offsets = [8, 16], sizes = [8, 8], strides = [1, 1]} : vector<16x32xf32> to vector<8x8xf32>
    %cst_259 = arith.constant dense<0.000000e+00> : vector<8x8xf32>
    %730 = tpu.matmul %728, %729, %cst_259 {dimension_numbers = #tpu.dot_dimension_numbers<[1], [0], [0], [1], [0, 0, 1, 1], [], []>} : vector<8x8xf32>, vector<8x8xf32>, vector<8x8xf32> -> vector<8x8xf32>
    %731 = vector.extract_strided_slice %610 {offsets = [8, 24], sizes = [8, 8], strides = [1, 1]} : vector<16x32xf32> to vector<8x8xf32>
    %732 = vector.extract_strided_slice %609 {offsets = [8, 24], sizes = [8, 8], strides = [1, 1]} : vector<16x32xf32> to vector<8x8xf32>
    %cst_260 = arith.constant dense<0.000000e+00> : vector<8x8xf32>
    %733 = tpu.matmul %731, %732, %cst_260 {dimension_numbers = #tpu.dot_dimension_numbers<[1], [1], [0], [0], [0, 0, 1, 0], [], []>} : vector<8x8xf32>, vector<8x8xf32>, vector<8x8xf32> -> vector<8x8xf32>
    %734 = vector.broadcast %38 : vector<1x8xf32> to vector<8x8xf32>
    %735 = arith.addf %733, %734 : vector<8x8xf32>
    %cst_261 = arith.constant dense<0xFF800000> : vector<8xf32>
    %736 = vector.multi_reduction <maximumf>, %735, %cst_261 [1] : vector<8x8xf32> to vector<8xf32>
    %737 = vector.shape_cast %736 : vector<8xf32> to vector<8x1xf32>
    %738 = vector.broadcast %737 : vector<8x1xf32> to vector<8x8xf32>
    %739 = arith.subf %735, %738 : vector<8x8xf32>
    %740 = math.exp %739 : vector<8x8xf32>
    %cst_262 = arith.constant dense<0.000000e+00> : vector<8xf32>
    %741 = vector.multi_reduction <add>, %740, %cst_262 [1] : vector<8x8xf32> to vector<8xf32>
    %742 = vector.shape_cast %741 : vector<8xf32> to vector<8x1xf32>
    %743 = tpu.reciprocal %742 {approx = true} : vector<8x1xf32> -> vector<8x1xf32>
    %744 = vector.broadcast %743 : vector<8x1xf32> to vector<8x8xf32>
    %745 = arith.mulf %740, %744 : vector<8x8xf32>
    %746 = vector.extract_strided_slice %608 {offsets = [8, 24], sizes = [8, 8], strides = [1, 1]} : vector<16x32xf32> to vector<8x8xf32>
    %cst_263 = arith.constant dense<0.000000e+00> : vector<8x8xf32>
    %747 = tpu.matmul %745, %746, %cst_263 {dimension_numbers = #tpu.dot_dimension_numbers<[1], [0], [0], [1], [0, 0, 1, 1], [], []>} : vector<8x8xf32>, vector<8x8xf32>, vector<8x8xf32> -> vector<8x8xf32>
    %748 = tpu.concatenate %696, %713, %730, %747 in 1 : vector<8x8xf32>, vector<8x8xf32>, vector<8x8xf32>, vector<8x8xf32> -> vector<8x32xf32>
    %749 = tpu.concatenate %679, %748 in 0 : vector<8x32xf32>, vector<8x32xf32> -> vector<16x32xf32>
    %cst_264 = arith.constant dense<0.000000e+00> : vector<16x32xf32>
    %750 = tpu.matmul %749, %606, %cst_264 {dimension_numbers = #tpu.dot_dimension_numbers<[1], [0], [0], [1], [0, 0, 1, 1], [], []>} : vector<16x32xf32>, vector<32x32xf32>, vector<16x32xf32> -> vector<16x32xf32>
    %751 = vector.broadcast %607 : vector<1x32xf32> to vector<16x32xf32>
    %752 = arith.addf %750, %751 : vector<16x32xf32>
    %753 = arith.addf %752, %598 : vector<16x32xf32>
    %c14_265 = arith.constant 14 : index
    %c0_266 = arith.constant 0 : index
    %754 = vector.load %arg9[%c14_265, %c0_266] : memref<20x128xf32, #tpu.memory_space<vmem>>, vector<1x32xf32>
    %c15_267 = arith.constant 15 : index
    %c0_268 = arith.constant 0 : index
    %755 = vector.load %arg9[%c15_267, %c0_268] : memref<20x128xf32, #tpu.memory_space<vmem>>, vector<1x32xf32>
    %cst_269 = arith.constant dense<0.000000e+00> : vector<16xf32>
    %756 = vector.multi_reduction <add>, %753, %cst_269 [1] : vector<16x32xf32> to vector<16xf32>
    %757 = vector.shape_cast %756 : vector<16xf32> to vector<16x1xf32>
    %cst_270 = arith.constant 3.125000e-02 : f32
    %758 = vector.broadcast %cst_270 : f32 to vector<16x1xf32>
    %759 = arith.mulf %757, %758 : vector<16x1xf32>
    %760 = arith.mulf %753, %753 : vector<16x32xf32>
    %cst_271 = arith.constant dense<0.000000e+00> : vector<16xf32>
    %761 = vector.multi_reduction <add>, %760, %cst_271 [1] : vector<16x32xf32> to vector<16xf32>
    %762 = vector.shape_cast %761 : vector<16xf32> to vector<16x1xf32>
    %cst_272 = arith.constant 3.125000e-02 : f32
    %763 = vector.broadcast %cst_272 : f32 to vector<16x1xf32>
    %764 = arith.mulf %762, %763 : vector<16x1xf32>
    %765 = arith.mulf %759, %759 : vector<16x1xf32>
    %766 = arith.subf %764, %765 : vector<16x1xf32>
    %767 = vector.broadcast %759 : vector<16x1xf32> to vector<16x32xf32>
    %768 = arith.subf %753, %767 : vector<16x32xf32>
    %cst_273 = arith.constant 9.99999974E-6 : f32
    %769 = vector.broadcast %cst_273 : f32 to vector<16x1xf32>
    %770 = arith.addf %766, %769 : vector<16x1xf32>
    %771 = math.rsqrt %770 : vector<16x1xf32>
    %772 = vector.broadcast %771 : vector<16x1xf32> to vector<16x32xf32>
    %773 = arith.mulf %768, %772 : vector<16x32xf32>
    %774 = vector.broadcast %754 : vector<1x32xf32> to vector<16x32xf32>
    %775 = arith.mulf %773, %774 : vector<16x32xf32>
    %776 = vector.broadcast %755 : vector<1x32xf32> to vector<16x32xf32>
    %777 = arith.addf %775, %776 : vector<16x32xf32>
    %c1_274 = arith.constant 1 : index
    %c0_275 = arith.constant 0 : index
    %c0_276 = arith.constant 0 : index
    %778 = vector.load %arg7[%c1_274, %c0_275, %c0_276] : memref<2x32x64xf32, #tpu.memory_space<vmem>>, vector<1x32x64xf32>
    %779 = vector.shape_cast %778 : vector<1x32x64xf32> to vector<32x64xf32>
    %cst_277 = arith.constant dense<0.000000e+00> : vector<16x64xf32>
    %780 = tpu.matmul %777, %779, %cst_277 {dimension_numbers = #tpu.dot_dimension_numbers<[1], [0], [0], [1], [0, 0, 1, 1], [], []>} : vector<16x32xf32>, vector<32x64xf32>, vector<16x64xf32> -> vector<16x64xf32>
    %c16 = arith.constant 16 : index
    %c0_278 = arith.constant 0 : index
    %781 = vector.load %arg9[%c16, %c0_278] : memref<20x128xf32, #tpu.memory_space<vmem>>, vector<1x64xf32>
    %782 = vector.broadcast %781 : vector<1x64xf32> to vector<16x64xf32>
    %783 = arith.addf %780, %782 : vector<16x64xf32>
    %cst_279 = arith.constant 0.000000e+00 : f32
    %784 = vector.broadcast %cst_279 : f32 to vector<16x64xf32>
    %785 = arith.maximumf %783, %784 : vector<16x64xf32>
    %c1_280 = arith.constant 1 : index
    %c0_281 = arith.constant 0 : index
    %c0_282 = arith.constant 0 : index
    %786 = vector.load %arg8[%c1_280, %c0_281, %c0_282] : memref<2x64x32xf32, #tpu.memory_space<vmem>>, vector<1x64x32xf32>
    %787 = vector.shape_cast %786 : vector<1x64x32xf32> to vector<64x32xf32>
    %cst_283 = arith.constant dense<0.000000e+00> : vector<16x32xf32>
    %788 = tpu.matmul %785, %787, %cst_283 {dimension_numbers = #tpu.dot_dimension_numbers<[1], [0], [0], [1], [0, 0, 1, 1], [], []>} : vector<16x64xf32>, vector<64x32xf32>, vector<16x32xf32> -> vector<16x32xf32>
    %c17 = arith.constant 17 : index
    %c0_284 = arith.constant 0 : index
    %789 = vector.load %arg9[%c17, %c0_284] : memref<20x128xf32, #tpu.memory_space<vmem>>, vector<1x32xf32>
    %790 = vector.broadcast %789 : vector<1x32xf32> to vector<16x32xf32>
    %791 = arith.addf %788, %790 : vector<16x32xf32>
    %792 = arith.addf %791, %777 : vector<16x32xf32>
    %c18 = arith.constant 18 : index
    %c0_285 = arith.constant 0 : index
    %793 = vector.load %arg9[%c18, %c0_285] : memref<20x128xf32, #tpu.memory_space<vmem>>, vector<1x32xf32>
    %c19 = arith.constant 19 : index
    %c0_286 = arith.constant 0 : index
    %794 = vector.load %arg9[%c19, %c0_286] : memref<20x128xf32, #tpu.memory_space<vmem>>, vector<1x32xf32>
    %cst_287 = arith.constant dense<0.000000e+00> : vector<16xf32>
    %795 = vector.multi_reduction <add>, %792, %cst_287 [1] : vector<16x32xf32> to vector<16xf32>
    %796 = vector.shape_cast %795 : vector<16xf32> to vector<16x1xf32>
    %cst_288 = arith.constant 3.125000e-02 : f32
    %797 = vector.broadcast %cst_288 : f32 to vector<16x1xf32>
    %798 = arith.mulf %796, %797 : vector<16x1xf32>
    %799 = arith.mulf %792, %792 : vector<16x32xf32>
    %cst_289 = arith.constant dense<0.000000e+00> : vector<16xf32>
    %800 = vector.multi_reduction <add>, %799, %cst_289 [1] : vector<16x32xf32> to vector<16xf32>
    %801 = vector.shape_cast %800 : vector<16xf32> to vector<16x1xf32>
    %cst_290 = arith.constant 3.125000e-02 : f32
    %802 = vector.broadcast %cst_290 : f32 to vector<16x1xf32>
    %803 = arith.mulf %801, %802 : vector<16x1xf32>
    %804 = arith.mulf %798, %798 : vector<16x1xf32>
    %805 = arith.subf %803, %804 : vector<16x1xf32>
    %806 = vector.broadcast %798 : vector<16x1xf32> to vector<16x32xf32>
    %807 = arith.subf %792, %806 : vector<16x32xf32>
    %cst_291 = arith.constant 9.99999974E-6 : f32
    %808 = vector.broadcast %cst_291 : f32 to vector<16x1xf32>
    %809 = arith.addf %805, %808 : vector<16x1xf32>
    %810 = math.rsqrt %809 : vector<16x1xf32>
    %811 = vector.broadcast %810 : vector<16x1xf32> to vector<16x32xf32>
    %812 = arith.mulf %807, %811 : vector<16x32xf32>
    %813 = vector.broadcast %793 : vector<1x32xf32> to vector<16x32xf32>
    %814 = arith.mulf %812, %813 : vector<16x32xf32>
    %815 = vector.broadcast %794 : vector<1x32xf32> to vector<16x32xf32>
    %816 = arith.addf %814, %815 : vector<16x32xf32>
    %c0_292 = arith.constant 0 : index
    %c0_293 = arith.constant 0 : index
    %817 = vector.load %arg10[%c0_292, %c0_293] : memref<32x128xf32, #tpu.memory_space<vmem>>, vector<32x128xf32>
    %cst_294 = arith.constant dense<0.000000e+00> : vector<16x128xf32>
    %818 = tpu.matmul %816, %817, %cst_294 {dimension_numbers = #tpu.dot_dimension_numbers<[1], [0], [0], [1], [0, 0, 1, 1], [], []>} : vector<16x32xf32>, vector<32x128xf32>, vector<16x128xf32> -> vector<16x128xf32>
    %c0_295 = arith.constant 0 : index
    %c0_296 = arith.constant 0 : index
    %819 = vector.load %arg11[%c0_295, %c0_296] : memref<1x128xf32, #tpu.memory_space<vmem>>, vector<1x128xf32>
    %820 = vector.broadcast %819 : vector<1x128xf32> to vector<16x128xf32>
    %821 = arith.addf %818, %820 : vector<16x128xf32>
    %c0_297 = arith.constant 0 : index
    %c0_298 = arith.constant 0 : index
    %822 = vector.load %arg12[%c0_297, %c0_298] : memref<16x128xf32, #tpu.memory_space<vmem>>, vector<16x128xf32>
    tpu.vector_store %arg12[%c0_297, %c0_298], %821 {strides = array<i32>} : memref<16x128xf32, #tpu.memory_space<vmem>>, vector<16x128xf32>,
    return
  }
}

</mosaic_0001>

<bundles_post_ra>
// kernel: decoder_forward.1
= control target key start
LH: loop header
LB: loop body
LE: loop exit
PB: predicated region body
PF: predicated region fallthrough
CT: control target
= control target key end

     0   :  { %17 = vsyncpa [#allocation3], 0  ;;  %s10223_s0 = inlined_call_operand.vmem [shape: s32[16,1], index: 0, kind: input, shape index: {}]   ;;  %s10224_s1 = inlined_call_operand.vmem [shape: f32[16,32], index: 1, kind: input, shape index: {}]   ;;  %s10225_s2 = inlined_call_operand.vmem [shape: f32[2,1,8], index: 2, kind: input, shape index: {}]   ;;  %s10226_s3 = inlined_call_operand.vmem [shape: f32[2,8,8], index: 3, kind: input, shape index: {}]   ;;  %s10227_s4 = inlined_call_operand.vmem [shape: f32[64,32], index: 4, kind: input, shape index: {}]   ;;  %s10228_s5 = inlined_call_operand.vmem [shape: f32[16,32], index: 5, kind: input, shape index: {}]   ;;  %s10229_s6 = inlined_call_operand.hbm [shape: f32[16,32,32], index: 6, kind: input, shape index: {}]   ;;  %s10230_s7 = inlined_call_operand.vmem [shape: f32[2,32,64], index: 7, kind: input, shape index: {}]   ;;  %s10231_s8 = inlined_call_operand.vmem [shape: f32[2,64,32], index: 8, kind: input, shape index: {}]   ;;  %s10232_s9 = inlined_call_operand.vmem [shape: f32[20,128], index: 9, kind: input, shape index: {}]   ;;  %s10233_s10 = inlined_call_operand.vmem [shape: f32[32,128], index: 10, kind: input, shape index: {}]   ;;  %s10234_s11 = inlined_call_operand.vmem [shape: f32[1,128], index: 11, kind: input, shape index: {}]   ;;  %s10235_s12 = inlined_call_operand.hbm [shape: f32[16,128], index: 12, kind: output, shape index: {}]  }
   0x1   :  { %18 = vsyncpa [#allocation4], 0  ;;  %s9128_s21 = smov [#allocation2]   ;;  %s9080_s25 = scalar_lea.hbm %s10229_s6, 8192 }
   0x2   :  { %s36_s22 = sshll.u32 %s9128_s21, 4  ;;  %p9081_p0 = scmp.ne.s32.totalorder %s10229_s6, %s9080_s25  ;;  %s37_s22 = int_to_ptr.vmem [resolvable:$true] %s36_s22 }
   0x3   :  { %p9084_p1 = scmp.lt.u32.totalorder %s9080_s25, %s10229_s6 }
   0x5   :  { %p9086_p2 = pnand %p9084_p1, %p9081_p0 }
   0x7   :  { %9089 = shalt.err (!%p9086_p2)
}
   0x8   :  { %s9090_s30 = scalar_lea.vmem %s37_s22, 8192  ;;  %p9095_p4 = scmp.lt.s32.totalorder %s37_s22, %s37_s22 }
   0x9   :  { %p9091_p3 = scmp.ne.s32.totalorder %s37_s22, %s9090_s30  ;;  %p9096_p5 = scmp.lt.s32.totalorder %s9090_s30, %s9090_s30 }
   0xb   :  { %p9097_p6 = por %p9096_p5, %p9095_p4 }
   0xd   :  { %p9098_p7 = pnand %p9097_p6, %p9091_p3 }
   0xf   :  { %9101 = shalt.err (!%p9098_p7)
}
  0x10   :  { %s9129_s13 = smov 128   ;;  %s9130_s14 = smov 8  }
  0x11   :  { %42 = dma.hbm_to_vmem [thread:$0]  %s10229_s6, 8192, %s37_s22, [#allocation3], %s9129_s13, %s9129_s13, %s9130_s14  }
  0x12   :  { %9124 = dma.done.wait [#allocation3], 8192  }
  0x13   :  { %9125 = vsyncadd [#allocation3], 4294959104  ;;  %v9131_v0 = vmov 0   ;;  %v56_v1 = vld [vmem:[%s10223_s0] sm:$0xff]  ;;  %v73_v3 = vld [vmem:[%s10227_s4 + $0x8] sm:$0xff]  ;;  %v58_v21 = vlaneseq  ;;  %vm82_vm0 = vcmask 523264  }
  0x14   :  { %8925 = vset.pattern.permute.xlu0 %v9131_v0  ;;  %v72_v2 = vld [vmem:[%s10227_s4] sm:$0xff]  ;;  %v74_v4 = vld [vmem:[%s10227_s4 + $0x10] sm:$0xff]  ;;  %v75_v5 = vld [vmem:[%s10227_s4 + $0x18] sm:$0xff]  ;;  %v9132_v24 = vmov 0.0   ;;  %vm200_vm3 = vcmask 261120   ;;  %vm9133_vm4 = vmmov 0  }
  0x15   :  { %61 = vperm.xlu0 %8925, %v56_v1   ;;  %v57_v6 = vld [vmem:[%s10223_s0 + $0x8] sm:$0xff]  ;;  %v8713_v7 = vpack.c.bf16 %v73_v3, %v72_v2  ;;  %v8717_v8 = vpack.c.bf16 %v75_v5, %v74_v4  ;;  %v76_v9 = vld [vmem:[%s10227_s4 + $0x20] sm:$0xff]  ;;  %v78_v12 = vld [vmem:[%s10227_s4 + $0x30] sm:$0xff]  ;;  %v59_v22 = vand.u32 127, %v58_v21  ;;  %vm432_vm5 = vcmask 64512   ;;  %s9135_s23 = smov 112  }
  0x16   :  { %v77_v10 = vld [vmem:[%s10227_s4 + $0x28] sm:$0xff]  ;;  %v79_v13 = vld [vmem:[%s10227_s4 + $0x38] sm:$0xff]  ;;  %v180_v14 = vld [vmem:[#allocation2] sm:$0xff]  ;;  %s9136_s24 = smov 104   ;;  %s9138_s27 = smov 24   ;;  %vm1102_vm8 = vcmask 130048  }
  0x17   :  { %8714 = vmatprep.subr.bf16.mxu0 %v8713_v7  ;;  %v8721_v11 = vpack.c.bf16 %v77_v10, %v76_v9  ;;  %v181_v15 = vld [vmem:[#allocation2 + $0x8] sm:$0xff]  ;;  %v8725_v17 = vpack.c.bf16 %v79_v13, %v78_v12  ;;  %v190_v18 = vld [vmem:[#allocation2 + $0x40] sm:$0xff]  ;;  %v182_v28 = vld [vmem:[#allocation2 + $0x10] sm:$0xff]  ;;  %vm1104_vm9 = vcmask 195584   ;;  %s9139_s4 = smov [#allocation5]  }
  0x18   :  { %8716 = vmatpush3.bf16.msra.mxu0 %v8713_v7  ;;  %v8729_v16 = vpack.c.bf16 %v181_v15, %v180_v14  ;;  %v191_v19 = vld [vmem:[#allocation2 + $0x48] sm:$0xff]  ;;  %v183_v29 = vld [vmem:[#allocation2 + $0x18] sm:$0xff]  ;;  %v192_v31 = vld [vmem:[#allocation2 + $0x50] sm:$0xff]  ;;  %s7666_s19 = sshll.u32 %s9139_s4, 4  ;;  %s7667_s19 = int_to_ptr.vmem [resolvable:$true] %s7666_s19 }
  0x19   :  { %64 = vperm.xlu0 %8925, %v57_v6   ;;  %8718 = vmatprep.subr.bf16.mxu0 %v8717_v8  ;;  %v8745_v20 = vpack.c.bf16 %v191_v19, %v190_v18  ;;  %v8733_v30 = vpack.c.bf16 %v183_v29, %v182_v28  ;;  %v193_v32 = vld [vmem:[#allocation2 + $0x58] sm:$0xff]  ;;  %v185_v34 = vld [vmem:[#allocation2 + $0x20] sm:$0xff]  ;;  %v186_v35 = vld [vmem:[#allocation2 + $0x28] sm:$0xff]  ;;  %p9107_p9 = scmp.lt.s32.totalorder %s7667_s19, %s7667_s19 }
  0x1a   :  { %8730 = vmatprep.subr.bf16.mxu1 %v8729_v16  ;;  %v8749_v33 = vpack.c.bf16 %v193_v32, %v192_v31  ;;  %v8737_v36 = vpack.c.bf16 %v186_v35, %v185_v34  ;;  %v80_v37 = vld [vmem:[%s10228_s5] sm:$0xff]  ;;  %v81_v38 = vld [vmem:[%s10228_s5 + $0x8] sm:$0xff]  ;;  %v187_v40 = vld [vmem:[#allocation2 + $0x30] sm:$0xff]  ;;  %s9134_s5 = smov 120  }
  0x1b   :  { %8732 = vmatpush3.bf16.msra.mxu1 %v8729_v16  ;;  %v188_v41 = vld [vmem:[#allocation2 + $0x38] sm:$0xff]  ;;  %v166_v57 = vld [vmem:[%s10226_s3] sm:$0xff] }
  0x1c   :  { %8720 = vmatpush3.bf16.msra.mxu0 %v8717_v8  ;;  %8734 = vmatprep.subr.bf16.mxu1 %v8733_v30  ;;  %v8741_v45 = vpack.c.bf16 %v188_v41, %v187_v40  ;;  %vm167_vm6 = vcmp.eq.f32.partialorder %v166_v57, 0.0 }
  0x1d   :  { %8722 = vmatprep.subr.bf16.mxu0 %v8721_v11  ;;  %v9331_v58 = vsel %vm167_vm6, -1e+20, %v9132_v24 }
  0x1f   :  { %8736 = vmatpush3.bf16.msra.mxu1 %v8733_v30 }
  0x20   :  { %8724 = vmatpush3.bf16.msra.mxu0 %v8721_v11  ;;  %8738 = vmatprep.subr.bf16.mxu1 %v8737_v36 }
  0x21   :  { %8726 = vmatprep.subr.bf16.mxu0 %v8725_v17 }
  0x24   :  { %8728 = vmatpush3.bf16.msra.mxu0 %v8725_v17 }
  0x25   :  { %8746 = vmatprep.subr.bf16.mxu0 %v8745_v20 }
  0x94   :  { %v62_v23 = vpop.permute.xlu0 %61 }
  0x95   :  { %vm66_vm1 = vcmp.eq.s32.totalorder %v59_v22, %v62_v23 }
  0x96   :  { %v7678_v25 = vsel %vm66_vm1, 1.0, %v9132_v24 }
  0x97   :  { %8143 = vmatprep.mubr.msk.f32.mxu0 %vm82_vm0, %v7678_v25 }
  0x98   :  { %v65_v26 = vpop.permute.xlu0 %64 }
  0x99   :  { %vm67_vm2 = vcmp.eq.s32.totalorder %v59_v22, %v65_v26 }
  0x9a   :  { %v7679_v27 = vsel %vm67_vm2, 1.0, %v9132_v24 }
  0x9b   :  { %8144 = vmatmul.mubr.msk.f32.vlgmr.msra.gmra.mrb[0].mxu0 %vm82_vm0, %v7679_v27  ;;  %v7682_v27 = vld [vmem:[%s10226_s3 + $0x8] sm:$0xff]  ;;  %s9137_s3 = smov 16  }
  0x9c   :  { %8748 = vmatpush3.bf16.msra.mxu0 %v8745_v20  ;;  %vm171_vm7 = vcmp.eq.f32.partialorder %v7682_v27, 0.0 }
  0x9d   :  { %8750 = vmatprep.subr.bf16.mxu0 %v8749_v33  ;;  %v9375_v31 = vsel %vm171_vm7, -1e+20, %v9132_v24 }
  0xa0   :  { %8752 = vmatpush3.bf16.msra.mxu0 %v8749_v33 }
  0xa1   :  { %8199 = vmatprep.subr.mxu0 %v9132_v24 }
 0x16e   :  { %v8145_v39 = vpop.f32.mrb[0].mxu0 }
 0x16f   :  { %v155_v42 = vpop.f32.mrb[1].mxu0  ;;  %v9264_v44 = vadd.f32 %v8145_v39, %v81_v38 }
 0x170   :  { %v9262_v43 = vadd.f32 %v155_v42, %v80_v37 }
 0x172   :  { %8154 = vmatprep.mubr.msk.f32.mxu1 %vm200_vm3, %v9262_v43  ;;  %8176 = vmatprep.mubr.msk.f32.mxu0 %vm200_vm3, %v9262_v43 }
 0x173   :  { %8155 = vmatmul.mubr.msk.f32.vlgmr.msra.gmra.mrb[0].mxu1 %vm200_vm3, %v9264_v44  ;;  %8177 = vmatmul.mubr.msk.f32.vlgmr.msra.gmra.mrb[2].mxu0 %vm200_vm3, %v9264_v44 }
 0x174   :  { %8740 = vmatpush3.bf16.msra.mxu1 %v8737_v36  ;;  %8165 = vmatprep.mubr.msk.f32.mxu1 %vm200_vm3, %v9262_v43 }
 0x175   :  { %8742 = vmatprep.subr.bf16.mxu1 %v8741_v45  ;;  %8201 = vmatprep.mubr.msk.f32.mxu0 %vm9133_vm4, %v9132_v24 }
 0x178   :  { %8744 = vmatpush3.bf16.msra.mxu1 %v8741_v45 }
 0x179   :  { %8179 = vmatprep.subr.mxu1 %v9132_v24 }
 0x17b   :  { %8166 = vmatmul.mubr.msk.f32.vlgmr.msra.gmra.mrb[2].mxu1 %vm200_vm3, %v9264_v44 }
 0x17c   :  { %8181 = vmatprep.mubr.msk.f32.mxu1 %vm9133_vm4, %v9132_v24 }
 0x246   :  { %v9283_v46 = vpop.f32.mrb[0].mxu1  ;;  %v8178_v47 = vpop.f32.mrb[2].mxu0 }
 0x247   :  { %v9285_v48 = vpop.f32.mrb[1].mxu1  ;;  %v9287_v49 = vpop.f32.mrb[3].mxu0 }
 0x24e   :  { %v9289_v50 = vpop.f32.mrb[2].mxu1 }
 0x24f   :  { %v348_v51 = vpop.f32.mrb[3].mxu1 }
 0x250   :  { %595 = vrot.lane.b32.xlu0 %v348_v51, %s9134_s5  ;;  %8180 = vmatpush3.xpose.msk.msra.mxu1 %vm432_vm5, %v348_v51 }
 0x251   :  { %8184 = vmatprep.subr.mxu1 %v9132_v24 }
 0x253   :  { %8182 = vmatmul.mubr.msk.f32.vlgmr.msra.gmra.mrb[4].mxu1 %vm432_vm5, %v9287_v49 }
 0x254   :  { %761 = vrot.lane.b32.xlu0 %v348_v51, %s9135_s23  ;;  %8185 = vmatpush3.msra.mxu1 %v9285_v48 }
 0x255   :  { %8186 = vmatprep.mubr.msk.f32.mxu1 %vm9133_vm4, %v9132_v24  ;;  %8189 = vmatprep.subr.mxu1 %v9132_v24 }
 0x258   :  { %759 = vrot.lane.b32.xlu0 %v9287_v49, %s9135_s23 }
 0x25c   :  { %926 = vrot.lane.b32.xlu0 %v348_v51, %s9136_s24 }
 0x260   :  { %924 = vrot.lane.b32.xlu0 %v9287_v49, %s9136_s24 }
 0x264   :  { %1266 = vrot.lane.b32.xlu0 %v8178_v47, %s9134_s5 }
 0x268   :  { %1432 = vrot.lane.b32.xlu0 %v8178_v47, %s9135_s23 }
 0x26c   :  { %1597 = vrot.lane.b32.xlu0 %v8178_v47, %s9136_s24 }
 0x2c2   :  { %v9309_v52 = vpop.permute.xlu0 %595 }
 0x2c6   :  { %v762_v53 = vpop.permute.xlu0 %761 }
 0x2c7   :  { %8200 = vmatpush3.xpose.msk.msra.mxu0 %vm432_vm5, %v762_v53 }
 0x2c8   :  { %8209 = vmatprep.subr.mxu0 %v9132_v24 }
 0x2ca   :  { %v760_v54 = vpop.permute.xlu0 %759 }
 0x2cb   :  { %8202 = vmatmul.mubr.msk.f32.vlgmr.msra.gmra.mrb[4].mxu0 %vm432_vm5, %v760_v54 }
 0x2cc   :  { %8211 = vmatprep.mubr.msk.f32.mxu0 %vm9133_vm4, %v9132_v24 }
 0x2ce   :  { %v927_v55 = vpop.permute.xlu0 %926 }
 0x2cf   :  { %8210 = vmatpush3.xpose.msk.msra.mxu0 %vm432_vm5, %v927_v55 }
 0x2d0   :  { %8219 = vmatprep.subr.mxu0 %v9132_v24 }
 0x2d2   :  { %v925_v56 = vpop.permute.xlu0 %924 }
 0x2d3   :  { %8212 = vmatmul.mubr.msk.f32.vlgmr.msra.gmra.mrb[6].mxu0 %vm432_vm5, %v925_v56 }
 0x2d4   :  { %8220 = vmatpush3.xpose.msk.msra.mxu0 %vm432_vm5, %v9289_v50  ;;  %8221 = vmatprep.mubr.msk.f32.mxu0 %vm9133_vm4, %v9132_v24 }
 0x2d5   :  { %8229 = vmatprep.subr.mxu0 %v9132_v24 }
 0x2d6   :  { %v1267_v16 = vpop.permute.xlu0 %1266 }
 0x2d7   :  { %8222 = vmatmul.mubr.msk.f32.vlgmr.msra.gmra.mrb[8].mxu0 %vm432_vm5, %v8178_v47 }
 0x2d8   :  { %8231 = vmatprep.mubr.msk.f32.mxu0 %vm9133_vm4, %v9132_v24 }
 0x2da   :  { %v1433_v22 = vpop.permute.xlu0 %1432 }
 0x2de   :  { %v1598_v25 = vpop.permute.xlu0 %1597 }
 0x326   :  { %v505_v59 = vpop.f32.mrb[4].mxu1 }
 0x327   :  { %v506_v60 = vadd.f32 %v505_v59, %v9331_v58  ;;  %v8183_v61 = vpop.f32.mrb[5].mxu1 }
 0x329   :  { %v509_v62 = vsel %vm432_vm5, %v506_v60, -inf }
 0x32a   :  { %510 = vmax.xlane.f32.xlu1 %v509_v62 }
 0x39e   :  { %v833_v63 = vpop.f32.mrb[4].mxu0 }
 0x39f   :  { %v834_v0 = vadd.f32 %v833_v63, %v9331_v58  ;;  %v8203_v1 = vpop.f32.mrb[5].mxu0 }
 0x3a1   :  { %v837_v2 = vsel %vm432_vm5, %v834_v0, -inf }
 0x3a2   :  { %838 = vmax.xlane.f32.xlu0 %v837_v2 }
 0x3a6   :  { %v998_v3 = vpop.f32.mrb[6].mxu0 }
 0x3a7   :  { %v999_v4 = vadd.f32 %v998_v3, %v9331_v58  ;;  %v8213_v5 = vpop.f32.mrb[7].mxu0 }
 0x3a9   :  { %v1002_v6 = vsel %vm432_vm5, %v999_v4, -inf }
 0x3aa   :  { %1003 = vmax.xlane.f32.xlu0 %v1002_v6  ;;  %v9339_v7 = vpop.f32.mrb[8].mxu0 }
 0x3ab   :  { %v8223_v8 = vpop.f32.mrb[9].mxu0 }
 0x3b7   :  { %v511_v9 = vpop.xlane.xlu1 %510 }
 0x3b8   :  { %v512_v10 = vsub.f32 %v506_v60, %v511_v9 }
 0x3ba   :  { %v513_v11 = vmul.f32 1.442695, %v512_v10 }
 0x3bc   :  { %8926 = vpow2.f32 %v513_v11 }
 0x3c6   :  { %v8927_v12 = vpop.eup %8926 }
 0x3c7   :  { %v515_v13 = vsel %vm432_vm5, %v8927_v12, 0.0 }
 0x3c8   :  { %516 = vadd.xlane.f32.xlu1 %v515_v13 }
 0x3d9   :  { %593 = vrot.lane.b32.xlu1 %v9287_v49, %s9134_s5 }
 0x3dd   :  { %1268 = vrot.lane.b32.xlu1 %v9289_v50, %s9134_s5 }
 0x3e1   :  { %1434 = vrot.lane.b32.xlu1 %v9289_v50, %s9135_s23 }
 0x3e5   :  { %1599 = vrot.lane.b32.xlu1 %v9289_v50, %s9136_s24  ;;  %v1179_v50 = vadd.f32 %v9339_v7, %v9375_v31 }
 0x3e7   :  { %v1182_v57 = vsel %vm432_vm5, %v1179_v50, -inf }
 0x42f   :  { %v839_v26 = vpop.xlane.xlu0 %838 }
 0x430   :  { %v840_v28 = vsub.f32 %v834_v0, %v839_v26 }
 0x432   :  { %v841_v30 = vmul.f32 1.442695, %v840_v28 }
 0x437   :  { %v1004_v29 = vpop.xlane.xlu0 %1003 }
 0x438   :  { %v1005_v32 = vsub.f32 %v999_v4, %v1004_v29 }
 0x43a   :  { %v1006_v39 = vmul.f32 1.442695, %v1005_v32 }
 0x455   :  { %v517_v14 = vpop.xlane.xlu1 %516 }
 0x456   :  { %8928 = vrcp.f32 %v517_v14 }
 0x457   :  { %8930 = vpow2.f32 %v841_v30 }
 0x458   :  { %8932 = vpow2.f32 %v1006_v39 }
 0x459   :  { %v594_v15 = vpop.permute.xlu1 %593 }
 0x45d   :  { %v1269_v17 = vpop.permute.xlu1 %1268 }
 0x45e   :  { %8230 = vmatpush3.xpose.msk.msra.mxu0 %vm432_vm5, %v1269_v17 }
 0x45f   :  { %8239 = vmatprep.subr.mxu0 %v9132_v24 }
 0x460   :  { %v8929_v18 = vpop.eup %8928 }
 0x461   :  { %8232 = vmatmul.mubr.msk.f32.vlgmr.msra.gmra.mrb[10].mxu0 %vm432_vm5, %v1267_v16  ;;  %v1435_v19 = vpop.permute.xlu1 %1434  ;;  %v519_v20 = vmul.f32 %v8929_v18, %v8927_v12  ;;  %v9387_v55 = vpop.eup %8930 }
 0x462   :  { %8240 = vmatpush3.xpose.msk.msra.mxu0 %vm432_vm5, %v1435_v19  ;;  %8241 = vmatprep.mubr.msk.f32.mxu0 %vm9133_vm4, %v9132_v24  ;;  %v843_v59 = vsel %vm432_vm5, %v9387_v55, 0.0  ;;  %v9394_v61 = vpop.eup %8932 }
 0x463   :  { %8187 = vmatmul.mubr.msk.f32.vlgmr.msra.gmra.mrb[6].mxu1 %vm432_vm5, %v519_v20  ;;  %8249 = vmatprep.subr.mxu0 %v9132_v24  ;;  %v1008_v62 = vsel %vm432_vm5, %v9394_v61, 0.0 }
 0x464   :  { %8190 = vmatpush3.xpose.msk.msra.mxu1 %vm432_vm5, %v9309_v52  ;;  %8191 = vmatprep.mubr.msk.f32.mxu1 %vm9133_vm4, %v9132_v24 }
 0x465   :  { %8242 = vmatmul.mubr.msk.f32.vlgmr.msra.gmra.mrb[12].mxu0 %vm432_vm5, %v1433_v22  ;;  %v1600_v23 = vpop.permute.xlu1 %1599  ;;  %8194 = vmatprep.subr.mxu1 %v9132_v24 }
 0x466   :  { %8250 = vmatpush3.xpose.msk.msra.mxu0 %vm432_vm5, %v1600_v23  ;;  %8251 = vmatprep.mubr.msk.f32.mxu0 %vm9133_vm4, %v9132_v24 }
 0x467   :  { %8192 = vmatmul.mubr.msk.f32.vlgmr.msra.gmra.mrb[8].mxu1 %vm432_vm5, %v594_v15 }
 0x468   :  { %8196 = vmatprep.mubr.msk.f32.mxu1 %vm9133_vm4, %v9132_v24 }
 0x469   :  { %8252 = vmatmul.mubr.msk.f32.vlgmr.msra.gmra.mrb[14].mxu0 %vm432_vm5, %v1598_v25 }
 0x534   :  { %v1340_v33 = vpop.f32.mrb[10].mxu0 }
 0x535   :  { %v1341_v34 = vadd.f32 %v1340_v33, %v9375_v31  ;;  %v8233_v35 = vpop.f32.mrb[11].mxu0 }
 0x536   :  { %v9378_v36 = vpop.f32.mrb[6].mxu1 }
 0x537   :  { %v8188_v37 = vpop.f32.mrb[7].mxu1  ;;  %v1344_v38 = vsel %vm432_vm5, %v1341_v34, -inf }
 0x538   :  { %1345 = vmax.xlane.f32.xlu0 %v1344_v38  ;;  %v1506_v40 = vpop.f32.mrb[12].mxu0 }
 0x539   :  { %v8243_v41 = vpop.f32.mrb[13].mxu0  ;;  %v1507_v56 = vadd.f32 %v1506_v40, %v9375_v31 }
 0x53a   :  { %v667_v42 = vpop.f32.mrb[8].mxu1 }
 0x53b   :  { %v668_v45 = vadd.f32 %v667_v42, %v9331_v58  ;;  %v8193_v47 = vpop.f32.mrb[9].mxu1  ;;  %v1510_v60 = vsel %vm432_vm5, %v1507_v56, -inf }
 0x53c   :  { %v1671_v49 = vpop.f32.mrb[14].mxu0 }
 0x53d   :  { %v1672_v51 = vadd.f32 %v1671_v49, %v9375_v31  ;;  %v8253_v52 = vpop.f32.mrb[15].mxu0  ;;  %v671_v53 = vsel %vm432_vm5, %v668_v45, -inf }
 0x53e   :  { %672 = vmax.xlane.f32.xlu1 %v671_v53 }
 0x53f   :  { %v1675_v54 = vsel %vm432_vm5, %v1672_v51, -inf }
 0x540   :  { %1676 = vmax.xlane.f32.xlu0 %v1675_v54 }
 0x542   :  { %1183 = vmax.xlane.f32.xlu1 %v1182_v57 }
 0x544   :  { %844 = vadd.xlane.f32.xlu0 %v843_v59 }
 0x546   :  { %1511 = vmax.xlane.f32.xlu1 %v1510_v60  ;;  %v195_v60 = vld [vmem:[#allocation2 + $0x60] sm:$0xff] }
 0x54a   :  { %1009 = vadd.xlane.f32.xlu1 %v1008_v62 }
 0x5c5   :  { %v1346_v63 = vpop.xlane.xlu0 %1345 }
 0x5c6   :  { %v1347_v0 = vsub.f32 %v1341_v34, %v1346_v63 }
 0x5c8   :  { %v1348_v1 = vmul.f32 1.442695, %v1347_v0 }
 0x5ca   :  { %8934 = vpow2.f32 %v1348_v1  ;;  %v197_v1 = vld [vmem:[#allocation2 + $0x70] sm:$0xff] }
 0x5cb   :  { %v673_v2 = vpop.xlane.xlu1 %672 }
 0x5cc   :  { %v674_v20 = vsub.f32 %v668_v45, %v673_v2  ;;  %v198_v2 = vld [vmem:[#allocation2 + $0x78] sm:$0xff] }
 0x5cd   :  { %v1677_v3 = vpop.xlane.xlu0 %1676 }
 0x5ce   :  { %v1678_v4 = vsub.f32 %v1672_v51, %v1677_v3  ;;  %v675_v22 = vmul.f32 1.442695, %v674_v20 }
 0x5cf   :  { %v1184_v5 = vpop.xlane.xlu1 %1183 }
 0x5d0   :  { %v1679_v6 = vmul.f32 1.442695, %v1678_v4  ;;  %v1185_v7 = vsub.f32 %v1179_v50, %v1184_v5  ;;  %v8757_v4 = vpack.c.bf16 %v198_v2, %v197_v1 }
 0x5d1   :  { %v845_v26 = vpop.xlane.xlu0 %844 }
 0x5d2   :  { %8936 = vpow2.f32 %v1679_v6  ;;  %v1186_v8 = vmul.f32 1.442695, %v1185_v7 }
 0x5d3   :  { %v1512_v9 = vpop.xlane.xlu1 %1511 }
 0x5d4   :  { %v9398_v10 = vpop.eup %8934  ;;  %8938 = vpow2.f32 %v1186_v8  ;;  %v1513_v11 = vsub.f32 %v1507_v56, %v1512_v9 }
 0x5d5   :  { %v1350_v12 = vsel %vm432_vm5, %v9398_v10, 0.0 }
 0x5d6   :  { %v1514_v13 = vmul.f32 1.442695, %v1513_v11  ;;  %1351 = vadd.xlane.f32.xlu1 %v1350_v12 }
 0x5d7   :  { %v1010_v30 = vpop.xlane.xlu1 %1009 }
 0x5d8   :  { %8940 = vpow2.f32 %v1514_v13 }
 0x5d9   :  { %8942 = vpow2.f32 %v675_v22 }
 0x5dc   :  { %v9402_v14 = vpop.eup %8936 }
 0x5dd   :  { %v1681_v15 = vsel %vm432_vm5, %v9402_v14, 0.0 }
 0x5de   :  { %v8939_v16 = vpop.eup %8938  ;;  %1682 = vadd.xlane.f32.xlu1 %v1681_v15 }
 0x5df   :  { %v1188_v17 = vsel %vm432_vm5, %v8939_v16, 0.0 }
 0x5e0   :  { %1189 = vadd.xlane.f32.xlu0 %v1188_v17 }
 0x5e2   :  { %v9407_v18 = vpop.eup %8940 }
 0x5e3   :  { %v1516_v19 = vsel %vm432_vm5, %v9407_v18, 0.0  ;;  %v8943_v23 = vpop.eup %8942 }
 0x5e4   :  { %1517 = vadd.xlane.f32.xlu0 %v1516_v19  ;;  %v677_v25 = vsel %vm432_vm5, %v8943_v23, 0.0 }
 0x5ef   :  { %848 = vrot.lane.b32.xlu1 %v9285_v48, %s9135_s23 }
 0x5fa   :  { %683 = vrot.lane.b32.xlu0 %v9285_v48, %s9134_s5 }
 0x5fe   :  { %1356 = vrot.lane.b32.xlu0 %v9283_v46, %s9134_s5 }
 0x602   :  { %1686 = vrot.lane.b32.xlu0 %v9283_v46, %s9136_s24 }
 0x613   :  { %678 = vadd.xlane.f32.xlu1 %v677_v25 }
 0x624   :  { %1013 = vrot.lane.b32.xlu1 %v9285_v48, %s9136_s24 }
 0x628   :  { %1521 = vrot.lane.b32.xlu1 %v9283_v46, %s9135_s23 }
 0x663   :  { %v1352_v32 = vpop.xlane.xlu1 %1351 }
 0x66b   :  { %v1683_v33 = vpop.xlane.xlu1 %1682 }
 0x66d   :  { %v1190_v27 = vpop.xlane.xlu0 %1189 }
 0x66f   :  { %v849_v34 = vpop.permute.xlu1 %848 }
 0x671   :  { %v1518_v28 = vpop.xlane.xlu0 %1517 }
 0x675   :  { %v684_v29 = vpop.permute.xlu0 %683 }
 0x676   :  { %8195 = vmatpush3.msra.mxu1 %v684_v29 }
 0x677   :  { %8204 = vmatprep.subr.mxu1 %v9132_v24 }
 0x679   :  { %v1357_v50 = vpop.permute.xlu0 %1356 }
 0x6a0   :  { %v679_v35 = vpop.xlane.xlu1 %678 }
 0x6a1   :  { %8944 = vrcp.f32 %v679_v35 }
 0x6a2   :  { %8946 = vrcp.f32 %v845_v26 }
 0x6a3   :  { %8948 = vrcp.f32 %v1010_v30 }
 0x6a4   :  { %8950 = vrcp.f32 %v1190_v27  ;;  %v1014_v41 = vpop.permute.xlu1 %1013 }
 0x6a5   :  { %8952 = vrcp.f32 %v1352_v32 }
 0x6a6   :  { %8954 = vrcp.f32 %v1518_v28 }
 0x6a7   :  { %8956 = vrcp.f32 %v1683_v33 }
 0x6ab   :  { %v8945_v37 = vpop.eup %8944 }
 0x6ac   :  { %v681_v48 = vmul.f32 %v8945_v37, %v8943_v23  ;;  %v8947_v38 = vpop.eup %8946 }
 0x6ad   :  { %v847_v39 = vmul.f32 %v8947_v38, %v9387_v55  ;;  %v8949_v40 = vpop.eup %8948  ;;  %v1687_v55 = vpop.permute.xlu0 %1686 }
 0x6ae   :  { %8197 = vmatmul.mubr.msk.f32.vlgmr.msra.gmra.mrb[10].mxu1 %vm432_vm5, %v681_v48  ;;  %v1012_v42 = vmul.f32 %v8949_v40, %v9394_v61  ;;  %v8951_v45 = vpop.eup %8950  ;;  %v196_v61 = vld [vmem:[#allocation2 + $0x68] sm:$0xff] }
 0x6af   :  { %8205 = vmatpush3.msra.mxu1 %v849_v34  ;;  %8206 = vmatprep.mubr.msk.f32.mxu1 %vm9133_vm4, %v9132_v24  ;;  %v1192_v47 = vmul.f32 %v8951_v45, %v8939_v16  ;;  %v8953_v49 = vpop.eup %8952  ;;  %v8753_v63 = vpack.c.bf16 %v196_v61, %v195_v60  ;;  %v1910_v40 = vld [vmem:[#allocation2 + $0x88] sm:$0xff]  ;;  %v1912_v45 = vld [vmem:[#allocation2 + $0x98] sm:$0xff] }
 0x6b0   :  { %8214 = vmatprep.subr.mxu1 %v9132_v24  ;;  %v1354_v51 = vmul.f32 %v8953_v49, %v9398_v10  ;;  %v8955_v52 = vpop.eup %8954  ;;  %v164_v49 = vld [vmem:[%s10224_s1] sm:$0xff]  ;;  %v1917_v60 = vld [vmem:[#allocation2 + $0xb8] sm:$0xff] }
 0x6b1   :  { %v1520_v53 = vmul.f32 %v8955_v52, %v9407_v18  ;;  %v8957_v54 = vpop.eup %8956  ;;  %8754 = vmatprep.subr.bf16.mxu0 %v8753_v63 }
 0x6b2   :  { %8207 = vmatmul.mubr.msk.f32.vlgmr.msra.gmra.mrb[12].mxu1 %vm432_vm5, %v847_v39  ;;  %v1685_v56 = vmul.f32 %v8957_v54, %v9402_v14  ;;  %8756 = vmatpush3.bf16.msra.mxu0 %v8753_v63  ;;  %v1909_v39 = vld [vmem:[#allocation2 + $0x80] sm:$0xff] }
 0x6b3   :  { %8215 = vmatpush3.msra.mxu1 %v1014_v41  ;;  %8216 = vmatprep.mubr.msk.f32.mxu1 %vm9133_vm4, %v9132_v24  ;;  %v8761_v41 = vpack.c.bf16 %v1910_v40, %v1909_v39 }
 0x6b4   :  { %8224 = vmatprep.subr.mxu1 %v9132_v24  ;;  %8758 = vmatprep.subr.bf16.mxu0 %v8757_v4 }
 0x6b6   :  { %8217 = vmatmul.mubr.msk.f32.vlgmr.msra.gmra.mrb[14].mxu1 %vm432_vm5, %v1012_v42  ;;  %8760 = vmatpush3.bf16.msra.mxu0 %v8757_v4  ;;  %v1911_v42 = vld [vmem:[#allocation2 + $0x90] sm:$0xff] }
 0x6b7   :  { %8225 = vmatpush3.msra.mxu1 %v9283_v46  ;;  %8226 = vmatprep.mubr.msk.f32.mxu1 %vm9133_vm4, %v9132_v24  ;;  %v1522_v46 = vpop.permute.xlu1 %1521 }
 0x6b8   :  { %8234 = vmatprep.subr.mxu1 %v9132_v24 }
 0x6ba   :  { %8227 = vmatmul.mubr.msk.f32.vlgmr.msra.gmra.mrb[16].mxu1 %vm432_vm5, %v1192_v47  ;;  %v8765_v47 = vpack.c.bf16 %v1912_v45, %v1911_v42  ;;  %v173_v45 = vld [vmem:[%s10225_s2] sm:$0x1] }
 0x6bb   :  { %8235 = vmatpush3.msra.mxu1 %v1357_v50  ;;  %8236 = vmatprep.mubr.msk.f32.mxu1 %vm9133_vm4, %v9132_v24  ;;  %v1919_v50 = vld [vmem:[#allocation2 + $0xc0] sm:$0xff]  ;;  %vm174_vm10 = vcmp.eq.f32.partialorder %v173_v45, 0.0 }
 0x6bc   :  { %8244 = vmatprep.subr.mxu1 %v9132_v24 }
 0x6be   :  { %8237 = vmatmul.mubr.msk.f32.vlgmr.msra.gmra.mrb[18].mxu1 %vm432_vm5, %v1354_v51  ;;  %v1920_v51 = vld [vmem:[#allocation2 + $0xc8] sm:$0xff] }
 0x6bf   :  { %8245 = vmatpush3.msra.mxu1 %v1522_v46  ;;  %8246 = vmatprep.mubr.msk.f32.mxu1 %vm9133_vm4, %v9132_v24  ;;  %v8777_v52 = vpack.c.bf16 %v1920_v51, %v1919_v50  ;;  %v1914_v46 = vld [vmem:[#allocation2 + $0xa0] sm:$0xff]  ;;  %v175_v50 = vsel %vm174_vm10, -1e+20, %v9132_v24 }
 0x6c0   :  { %8254 = vmatprep.subr.mxu1 %v9132_v24 }
 0x6c2   :  { %8247 = vmatmul.mubr.msk.f32.vlgmr.msra.gmra.mrb[20].mxu1 %vm432_vm5, %v1520_v53  ;;  %v1915_v53 = vld [vmem:[#allocation2 + $0xa8] sm:$0xff] }
 0x6c3   :  { %8255 = vmatpush3.msra.mxu1 %v1687_v55  ;;  %8256 = vmatprep.mubr.msk.f32.mxu1 %vm9133_vm4, %v9132_v24  ;;  %v8769_v54 = vpack.c.bf16 %v1915_v53, %v1914_v46  ;;  %v1921_v55 = vld [vmem:[#allocation2 + $0xd0] sm:$0xff] }
 0x6c4   :  { %8762 = vmatprep.subr.bf16.mxu1 %v8761_v41 }
 0x6c5   :  { %8770 = vmatprep.subr.bf16.mxu0 %v8769_v54 }
 0x6c6   :  { %8257 = vmatmul.mubr.msk.f32.vlgmr.msra.gmra.mrb[22].mxu1 %vm432_vm5, %v1685_v56  ;;  %v1922_v56 = vld [vmem:[#allocation2 + $0xd8] sm:$0xff] }
 0x6c7   :  { %8764 = vmatpush3.bf16.msra.mxu1 %v8761_v41  ;;  %8278 = vmatprep.mubr.msk.f32.mxu1 %vm200_vm3, %v164_v49  ;;  %v8781_v61 = vpack.c.bf16 %v1922_v56, %v1921_v55  ;;  %v7683_v55 = vld [vmem:[%s10225_s2 + $0x1] sm:$0x1] }
 0x6c8   :  { %8766 = vmatprep.subr.bf16.mxu1 %v8765_v47  ;;  %vm178_vm11 = vcmp.eq.f32.partialorder %v7683_v55, 0.0 }
 0x6cb   :  { %8768 = vmatpush3.bf16.msra.mxu1 %v8765_v47  ;;  %v2168_v47 = vshrl.u32 %v58_v21, 7 }
 0x6cc   :  { %8778 = vmatprep.subr.bf16.mxu1 %v8777_v52 }
 0x781   :  { %v755_v57 = vpop.f32.mrb[10].mxu1 }
 0x782   :  { %1090 = vrot.lane.b32.xlu1 %v755_v57, %s9130_s14  ;;  %v8198_v59 = vpop.f32.mrb[11].mxu1  ;;  %v1916_v57 = vld [vmem:[#allocation2 + $0xb0] sm:$0xff] }
 0x783   :  { %v165_v59 = vld [vmem:[%s10224_s1 + $0x8] sm:$0xff] }
 0x784   :  { %8279 = vmatmul.mubr.msk.f32.vlgmr.msra.gmra.mrb[24].mxu1 %vm200_vm3, %v165_v59 }
 0x785   :  { %v920_v62 = vpop.f32.mrb[12].mxu1  ;;  %8780 = vmatpush3.bf16.msra.mxu1 %v8777_v52  ;;  %8300 = vmatprep.mubr.msk.f32.mxu1 %vm200_vm3, %v164_v49  ;;  %v2169_v49 = vsub.s32 0, %v2168_v47 }
 0x786   :  { %1094 = vrot.lane.b32.xlu0 %v920_v62, %s9137_s3  ;;  %v8208_v0 = vpop.f32.mrb[13].mxu1  ;;  %v8773_v62 = vpack.c.bf16 %v1917_v60, %v1916_v57  ;;  %8782 = vmatprep.subr.bf16.mxu1 %v8781_v61 }
 0x787   :  { %v9581_v51 = vrot.slane %v175_v50, %v2169_v49 }
 0x789   :  { %v1085_v3 = vpop.f32.mrb[14].mxu1  ;;  %8784 = vmatpush3.bf16.msra.mxu1 %v8781_v61 }
 0x78a   :  { %1098 = vrot.lane.b32.xlu0 %v1085_v3, %s9138_s27  ;;  %v8218_v5 = vpop.f32.mrb[15].mxu1  ;;  %8308 = vmatprep.subr.mxu1 %v9132_v24 }
 0x78c   :  { %8301 = vmatmul.mubr.msk.f32.vlgmr.msra.gmra.mrb[26].mxu1 %vm200_vm3, %v165_v59 }
 0x78d   :  { %v1262_v6 = vpop.f32.mrb[16].mxu1  ;;  %8310 = vmatprep.mubr.msk.f32.mxu1 %vm9133_vm4, %v9132_v24 }
 0x78e   :  { %v8228_v7 = vpop.f32.mrb[17].mxu1 }
 0x791   :  { %v1428_v8 = vpop.f32.mrb[18].mxu1 }
 0x792   :  { %1763 = vrot.lane.b32.xlu1 %v1428_v8, %s9130_s14  ;;  %v8238_v9 = vpop.f32.mrb[19].mxu1 }
 0x795   :  { %v1593_v10 = vpop.f32.mrb[20].mxu1 }
 0x796   :  { %1767 = vrot.lane.b32.xlu1 %v1593_v10, %s9137_s3  ;;  %v8248_v11 = vpop.f32.mrb[21].mxu1 }
 0x799   :  { %v1758_v12 = vpop.f32.mrb[22].mxu1 }
 0x79a   :  { %1771 = vrot.lane.b32.xlu0 %v1758_v12, %s9138_s27  ;;  %v8258_v13 = vpop.f32.mrb[23].mxu1 }
 0x7f4   :  { %v1091_v14 = vpop.permute.xlu1 %1090 }
 0x7f5   :  { %v1101_v16 = vsel %vm432_vm5, %v9378_v36, %v1091_v14  ;;  %v7714_v36 = vld [vmem:[%s10232_s9] ss:$0 sm:$0xff] }
 0x7f8   :  { %v1095_v15 = vpop.permute.xlu0 %1094 }
 0x7f9   :  { %v1103_v17 = vsel %vm1102_vm8, %v1101_v16, %v1095_v15  ;;  %v7717_v16 = vld [vmem:[%s10232_s9 + $0x1] ss:$0 sm:$0xff] }
 0x7fc   :  { %v1099_v18 = vpop.permute.xlu0 %1098 }
 0x7fd   :  { %v1105_v19 = vsel %vm1104_vm9, %v1103_v17, %v1099_v18 }
 0x7fe   :  { %8267 = vmatprep.mubr.msk.f32.mxu0 %vm200_vm3, %v1105_v19  ;;  %v7718_v19 = vld [vmem:[%s10232_s9 + $0x2] ss:$0 sm:$0xff] }
 0x804   :  { %v1764_v20 = vpop.permute.xlu1 %1763 }
 0x805   :  { %v1774_v23 = vsel %vm432_vm5, %v1262_v6, %v1764_v20 }
 0x808   :  { %v1768_v22 = vpop.permute.xlu1 %1767 }
 0x809   :  { %v1775_v25 = vsel %vm1102_vm8, %v1774_v23, %v1768_v22 }
 0x80c   :  { %v1772_v26 = vpop.permute.xlu0 %1771 }
 0x80d   :  { %v1776_v27 = vsel %vm1104_vm9, %v1775_v25, %v1772_v26 }
 0x80e   :  { %8268 = vmatmul.mubr.msk.f32.vlgmr.msra.gmra.mrb[16].mxu0 %vm200_vm3, %v1776_v27 }
 0x80f   :  { %8772 = vmatpush3.bf16.msra.mxu0 %v8769_v54 }
 0x810   :  { %8774 = vmatprep.subr.bf16.mxu0 %v8773_v62 }
 0x813   :  { %8776 = vmatpush3.bf16.msra.mxu0 %v8773_v62 }
 0x814   :  { %8303 = vmatprep.subr.mxu0 %v9132_v24 }
 0x857   :  { %v9521_v27 = vpop.f32.mrb[24].mxu1 }
 0x8e1   :  { %v8269_v28 = vpop.f32.mrb[16].mxu0 }
 0x8e2   :  { %v1859_v29 = vadd.f32 %v8269_v28, %v7714_v36  ;;  %v1853_v30 = vpop.f32.mrb[17].mxu0 }
 0x8e3   :  { %v1854_v32 = vadd.f32 %v7714_v36, %v1853_v30  ;;  %v9523_v36 = vpop.f32.mrb[25].mxu1 }
 0x8e4   :  { %v9474_v33 = vadd.f32 %v1859_v29, %v9264_v44  ;;  %8309 = vmatpush3.msra.mxu1 %v9523_v36  ;;  %v8302_v28 = vpop.f32.mrb[26].mxu1 }
 0x8e5   :  { %v9477_v34 = vadd.f32 %v1854_v32, %v9262_v43  ;;  %8318 = vmatprep.subr.mxu1 %v9132_v24  ;;  %v2157_v29 = vpop.f32.mrb[27].mxu1 }
 0x8e6   :  { %v1869_v35 = vsel %vm200_vm3, %v9474_v33, 0.0  ;;  %v1875_v38 = vmul.f32 %v9474_v33, %v9474_v33 }
 0x8e7   :  { %1870 = vadd.xlane.f32.xlu0 %v1869_v35  ;;  %v1866_v37 = vsel %vm200_vm3, %v9477_v34, 0.0  ;;  %v1874_v48 = vmul.f32 %v9477_v34, %v9477_v34 }
 0x8e8   :  { %1867 = vadd.xlane.f32.xlu1 %v1866_v37  ;;  %v1879_v43 = vsel %vm200_vm3, %v1875_v38, 0.0 }
 0x8e9   :  { %v1876_v44 = vsel %vm200_vm3, %v1874_v48, 0.0 }
 0x8eb   :  { %1877 = vadd.xlane.f32.xlu0 %v1876_v44 }
 0x8ec   :  { %1880 = vadd.xlane.f32.xlu1 %v1879_v43 }
 0x8fd   :  { %2332 = vrot.lane.b32.xlu1 %v2157_v29, %s9134_s5 }
 0x974   :  { %v1871_v63 = vpop.xlane.xlu0 %1870 }
 0x975   :  { %v1868_v0 = vpop.xlane.xlu1 %1867  ;;  %v1873_v1 = vmul.f32 0.03125, %v1871_v63  ;;  %v179_v63 = vsel %vm178_vm11, -1e+20, %v9132_v24 }
 0x976   :  { %v1872_v2 = vmul.f32 0.03125, %v1868_v0 }
 0x977   :  { %v1885_v7 = vmul.f32 %v1873_v1, %v1873_v1  ;;  %v1889_v15 = vsub.f32 %v9474_v33, %v1873_v1 }
 0x978   :  { %v1884_v3 = vmul.f32 %v1872_v2, %v1872_v2  ;;  %v1878_v4 = vpop.xlane.xlu0 %1877  ;;  %v1888_v13 = vsub.f32 %v9477_v34, %v1872_v2  ;;  %v9593_v2 = vrot.slane %v179_v63, %v2169_v49 }
 0x979   :  { %v1882_v5 = vmul.f32 0.03125, %v1878_v4  ;;  %v1881_v6 = vpop.xlane.xlu1 %1880 }
 0x97a   :  { %v1883_v8 = vmul.f32 0.03125, %v1881_v6 }
 0x97b   :  { %v1886_v9 = vsub.f32 %v1882_v5, %v1884_v3 }
 0x97c   :  { %v1887_v10 = vsub.f32 %v1883_v8, %v1885_v7 }
 0x97d   :  { %v1890_v11 = vadd.f32 1e-05, %v1886_v9  ;;  %v2333_v33 = vpop.permute.xlu1 %2332 }
 0x97e   :  { %v1891_v12 = vadd.f32 1e-05, %v1887_v10 }
 0x97f   :  { %8958 = vrsqrt.f32 %v1890_v11 }
 0x980   :  { %8960 = vrsqrt.f32 %v1891_v12 }
 0x989   :  { %v8959_v14 = vpop.eup %8958 }
 0x98a   :  { %v8961_v17 = vpop.eup %8960  ;;  %v1894_v18 = vmul.f32 %v8959_v14, %v1888_v13 }
 0x98b   :  { %v1895_v20 = vmul.f32 %v8961_v17, %v1889_v15 }
 0x98c   :  { %v1900_v22 = vmul.f32 %v7717_v16, %v1894_v18 }
 0x98d   :  { %v1901_v23 = vmul.f32 %v7717_v16, %v1895_v20 }
 0x98e   :  { %v9511_v25 = vadd.f32 %v7718_v19, %v1900_v22 }
 0x98f   :  { %v9513_v26 = vadd.f32 %v7718_v19, %v1901_v23 }
 0x990   :  { %8289 = vmatprep.mubr.msk.f32.mxu0 %vm200_vm3, %v9511_v25 }
 0x991   :  { %8290 = vmatmul.mubr.msk.f32.vlgmr.msra.gmra.mrb[18].mxu0 %vm200_vm3, %v9513_v26 }
 0x992   :  { %8305 = vmatprep.mubr.msk.f32.mxu0 %vm9133_vm4, %v9132_v24 }
 0xa64   :  { %v8291_v30 = vpop.f32.mrb[18].mxu0 }
 0xa65   :  { %v2082_v32 = vpop.f32.mrb[19].mxu0 }
 0xa66   :  { %2334 = vrot.lane.b32.xlu0 %v2082_v32, %s9134_s5  ;;  %8304 = vmatpush3.xpose.msk.msra.mxu0 %vm432_vm5, %v2082_v32 }
 0xa67   :  { %2500 = vrot.lane.b32.xlu1 %v2082_v32, %s9135_s23  ;;  %8313 = vmatprep.subr.mxu0 %v9132_v24 }
 0xa69   :  { %8306 = vmatmul.mubr.msk.f32.vlgmr.msra.gmra.mrb[20].mxu0 %vm432_vm5, %v2157_v29 }
 0xa6a   :  { %2498 = vrot.lane.b32.xlu0 %v2157_v29, %s9135_s23  ;;  %8315 = vmatprep.mubr.msk.f32.mxu0 %vm9133_vm4, %v9132_v24 }
 0xa6b   :  { %2665 = vrot.lane.b32.xlu1 %v2082_v32, %s9136_s24 }
 0xa6e   :  { %2663 = vrot.lane.b32.xlu0 %v2157_v29, %s9136_s24 }
 0xa6f   :  { %3011 = vrot.lane.b32.xlu1 %v8291_v30, %s9134_s5 }
 0xa72   :  { %3009 = vrot.lane.b32.xlu0 %v8302_v28, %s9134_s5 }
 0xa73   :  { %3177 = vrot.lane.b32.xlu1 %v8291_v30, %s9135_s23 }
 0xa76   :  { %3175 = vrot.lane.b32.xlu0 %v8302_v28, %s9135_s23 }
 0xa77   :  { %3342 = vrot.lane.b32.xlu1 %v8291_v30, %s9136_s24 }
 0xa7a   :  { %3340 = vrot.lane.b32.xlu0 %v8302_v28, %s9136_s24 }
 0xad8   :  { %v2335_v34 = vpop.permute.xlu0 %2334 }
 0xad9   :  { %v2501_v35 = vpop.permute.xlu1 %2500  ;;  %8314 = vmatpush3.xpose.msk.msra.mxu0 %vm432_vm5, %v2335_v34 }
 0xada   :  { %8323 = vmatprep.subr.mxu0 %v9132_v24 }
 0xadc   :  { %v2499_v37 = vpop.permute.xlu0 %2498  ;;  %8316 = vmatmul.mubr.msk.f32.vlgmr.msra.gmra.mrb[22].mxu0 %vm432_vm5, %v2333_v33 }
 0xadd   :  { %8324 = vmatpush3.xpose.msk.msra.mxu0 %vm432_vm5, %v2501_v35  ;;  %8325 = vmatprep.mubr.msk.f32.mxu0 %vm9133_vm4, %v9132_v24  ;;  %v2666_v48 = vpop.permute.xlu1 %2665 }
 0xade   :  { %8333 = vmatprep.subr.mxu0 %v9132_v24 }
 0xae0   :  { %8326 = vmatmul.mubr.msk.f32.vlgmr.msra.gmra.mrb[24].mxu0 %vm432_vm5, %v2499_v37  ;;  %v2664_v38 = vpop.permute.xlu0 %2663 }
 0xae1   :  { %8334 = vmatpush3.xpose.msk.msra.mxu0 %vm432_vm5, %v2666_v48  ;;  %8335 = vmatprep.mubr.msk.f32.mxu0 %vm9133_vm4, %v9132_v24  ;;  %v3012_v44 = vpop.permute.xlu1 %3011 }
 0xae2   :  { %8343 = vmatprep.subr.mxu0 %v9132_v24 }
 0xae4   :  { %8336 = vmatmul.mubr.msk.f32.vlgmr.msra.gmra.mrb[26].mxu0 %vm432_vm5, %v2664_v38  ;;  %v3010_v43 = vpop.permute.xlu0 %3009 }
 0xae5   :  { %8344 = vmatpush3.xpose.msk.msra.mxu0 %vm432_vm5, %v8291_v30  ;;  %8345 = vmatprep.mubr.msk.f32.mxu0 %vm9133_vm4, %v9132_v24  ;;  %v3178_v39 = vpop.permute.xlu1 %3177 }
 0xae6   :  { %8353 = vmatprep.subr.mxu0 %v9132_v24 }
 0xae8   :  { %8346 = vmatmul.mubr.msk.f32.vlgmr.msra.gmra.mrb[28].mxu0 %vm432_vm5, %v8302_v28  ;;  %v3176_v40 = vpop.permute.xlu0 %3175 }
 0xae9   :  { %8354 = vmatpush3.xpose.msk.msra.mxu0 %vm432_vm5, %v3012_v44  ;;  %8355 = vmatprep.mubr.msk.f32.mxu0 %vm9133_vm4, %v9132_v24  ;;  %v3343_v41 = vpop.permute.xlu1 %3342 }
 0xaea   :  { %8363 = vmatprep.subr.mxu0 %v9132_v24 }
 0xaec   :  { %8356 = vmatmul.mubr.msk.f32.vlgmr.msra.gmra.mrb[30].mxu0 %vm432_vm5, %v3010_v43  ;;  %v3341_v42 = vpop.permute.xlu0 %3340 }
 0xaed   :  { %8364 = vmatpush3.xpose.msk.msra.mxu0 %vm432_vm5, %v3178_v39  ;;  %8365 = vmatprep.mubr.msk.f32.mxu0 %vm9133_vm4, %v9132_v24 }
 0xaee   :  { %8373 = vmatprep.subr.mxu0 %v9132_v24 }
 0xaf0   :  { %8366 = vmatmul.mubr.msk.f32.vlgmr.msra.gmra.mrb[32].mxu0 %vm432_vm5, %v3176_v40 }
 0xaf1   :  { %8374 = vmatpush3.xpose.msk.msra.mxu0 %vm432_vm5, %v3343_v41  ;;  %8375 = vmatprep.mubr.msk.f32.mxu0 %vm9133_vm4, %v9132_v24 }
 0xaf4   :  { %8376 = vmatmul.mubr.msk.f32.vlgmr.msra.gmra.mrb[34].mxu0 %vm432_vm5, %v3341_v42 }
 0xb3c   :  { %v2244_v52 = vpop.f32.mrb[20].mxu0 }
 0xb3d   :  { %v2245_v46 = vadd.f32 %v2244_v52, %v9581_v51  ;;  %v8307_v53 = vpop.f32.mrb[21].mxu0 }
 0xb3f   :  { %v2248_v54 = vsel %vm432_vm5, %v2245_v46, -inf }
 0xb40   :  { %2249 = vmax.xlane.f32.xlu1 %v2248_v54 }
 0xbaf   :  { %v2406_v56 = vpop.f32.mrb[22].mxu0 }
 0xbb0   :  { %v2407_v21 = vadd.f32 %v2406_v56, %v9581_v51  ;;  %v8317_v57 = vpop.f32.mrb[23].mxu0 }
 0xbb2   :  { %v2410_v59 = vsel %vm432_vm5, %v2407_v21, -inf }
 0xbb3   :  { %2411 = vmax.xlane.f32.xlu0 %v2410_v59  ;;  %v2572_v60 = vpop.f32.mrb[24].mxu0 }
 0xbb4   :  { %v2573_v61 = vadd.f32 %v2572_v60, %v9581_v51  ;;  %v8327_v62 = vpop.f32.mrb[25].mxu0 }
 0xbb6   :  { %v2576_v0 = vsel %vm432_vm5, %v2573_v61, -inf }
 0xbb7   :  { %2577 = vmax.xlane.f32.xlu0 %v2576_v0  ;;  %v2737_v1 = vpop.f32.mrb[26].mxu0 }
 0xbb8   :  { %v2738_v3 = vadd.f32 %v2737_v1, %v9581_v51  ;;  %v8337_v4 = vpop.f32.mrb[27].mxu0 }
 0xbba   :  { %v2741_v5 = vsel %vm432_vm5, %v2738_v3, -inf }
 0xbbb   :  { %2742 = vmax.xlane.f32.xlu1 %v2741_v5  ;;  %v2921_v6 = vpop.f32.mrb[28].mxu0 }
 0xbbc   :  { %v2922_v7 = vadd.f32 %v2921_v6, %v9593_v2  ;;  %v8347_v8 = vpop.f32.mrb[29].mxu0 }
 0xbbe   :  { %v2925_v9 = vsel %vm432_vm5, %v2922_v7, -inf }
 0xbbf   :  { %2926 = vmax.xlane.f32.xlu0 %v2925_v9  ;;  %v3083_v10 = vpop.f32.mrb[30].mxu0 }
 0xbc0   :  { %v3084_v11 = vadd.f32 %v3083_v10, %v9593_v2  ;;  %v8357_v12 = vpop.f32.mrb[31].mxu0 }
 0xbc2   :  { %v3087_v13 = vsel %vm432_vm5, %v3084_v11, -inf }
 0xbc3   :  { %3088 = vmax.xlane.f32.xlu1 %v3087_v13  ;;  %v3249_v14 = vpop.f32.mrb[32].mxu0 }
 0xbc4   :  { %v9602_v15 = vadd.f32 %v3249_v14, %v9593_v2  ;;  %v8367_v16 = vpop.f32.mrb[33].mxu0 }
 0xbc6   :  { %v3253_v17 = vsel %vm432_vm5, %v9602_v15, -inf }
 0xbc7   :  { %3254 = vmax.xlane.f32.xlu0 %v3253_v17  ;;  %v3414_v18 = vpop.f32.mrb[34].mxu0 }
 0xbc8   :  { %v3415_v19 = vadd.f32 %v3414_v18, %v9593_v2  ;;  %v8377_v20 = vpop.f32.mrb[35].mxu0 }
 0xbca   :  { %v3418_v22 = vsel %vm432_vm5, %v3415_v19, -inf }
 0xbcb   :  { %3419 = vmax.xlane.f32.xlu1 %v3418_v22 }
 0xbcd   :  { %v2250_v23 = vpop.xlane.xlu1 %2249 }
 0xbce   :  { %v2251_v28 = vsub.f32 %v2245_v46, %v2250_v23 }
 0xbd0   :  { %v2252_v29 = vmul.f32 1.442695, %v2251_v28 }
 0xbd2   :  { %8962 = vpow2.f32 %v2252_v29 }
 0xbdc   :  { %2587 = vrot.lane.b32.xlu1 %v9523_v36, %s9135_s23  ;;  %v8963_v30 = vpop.eup %8962 }
 0xbdd   :  { %2422 = vrot.lane.b32.xlu0 %v9523_v36, %s9134_s5  ;;  %v2254_v32 = vsel %vm432_vm5, %v8963_v30, 0.0 }
 0xbe0   :  { %2752 = vrot.lane.b32.xlu1 %v9523_v36, %s9136_s24 }
 0xbfc   :  { %2255 = vadd.xlane.f32.xlu0 %v2254_v32 }
 0xc40   :  { %v2412_v33 = vpop.xlane.xlu0 %2411 }
 0xc41   :  { %v2413_v34 = vsub.f32 %v2407_v21, %v2412_v33 }
 0xc43   :  { %v2414_v35 = vmul.f32 1.442695, %v2413_v34 }
 0xc44   :  { %v2578_v37 = vpop.xlane.xlu0 %2577 }
 0xc45   :  { %8964 = vpow2.f32 %v2414_v35  ;;  %v2579_v48 = vsub.f32 %v2573_v61, %v2578_v37 }
 0xc47   :  { %v2580_v38 = vmul.f32 1.442695, %v2579_v48 }
 0xc48   :  { %v2743_v44 = vpop.xlane.xlu1 %2742 }
 0xc49   :  { %8966 = vpow2.f32 %v2580_v38  ;;  %v2744_v43 = vsub.f32 %v2738_v3, %v2743_v44 }
 0xc4b   :  { %v2745_v39 = vmul.f32 1.442695, %v2744_v43 }
 0xc4c   :  { %v2927_v36 = vpop.xlane.xlu0 %2926 }
 0xc4d   :  { %8968 = vpow2.f32 %v2745_v39  ;;  %v2928_v40 = vsub.f32 %v2922_v7, %v2927_v36 }
 0xc4f   :  { %v8965_v41 = vpop.eup %8964  ;;  %v2929_v42 = vmul.f32 1.442695, %v2928_v40 }
 0xc50   :  { %v3089_v45 = vpop.xlane.xlu1 %3088  ;;  %v2416_v47 = vsel %vm432_vm5, %v8965_v41, 0.0 }
 0xc51   :  { %8970 = vpow2.f32 %v2929_v42  ;;  %v3090_v49 = vsub.f32 %v3084_v11, %v3089_v45  ;;  %2417 = vadd.xlane.f32.xlu1 %v2416_v47  ;;  %v1924_v45 = vld [vmem:[#allocation2 + $0xe0] sm:$0xff]  ;;  %v1925_v47 = vld [vmem:[#allocation2 + $0xe8] sm:$0xff] }
 0xc53   :  { %v8967_v50 = vpop.eup %8966  ;;  %v3091_v52 = vmul.f32 1.442695, %v3090_v49 }
 0xc54   :  { %v2582_v46 = vsel %vm432_vm5, %v8967_v50, 0.0  ;;  %v3255_v0 = vpop.xlane.xlu0 %3254 }
 0xc55   :  { %8972 = vpow2.f32 %v3091_v52  ;;  %2583 = vadd.xlane.f32.xlu0 %v2582_v46  ;;  %v3256_v1 = vsub.f32 %v9602_v15, %v3255_v0 }
 0xc57   :  { %v8969_v53 = vpop.eup %8968  ;;  %v3257_v3 = vmul.f32 1.442695, %v3256_v1 }
 0xc58   :  { %v3420_v54 = vpop.xlane.xlu1 %3419  ;;  %v2747_v55 = vsel %vm432_vm5, %v8969_v53, 0.0  ;;  %v2423_v4 = vpop.permute.xlu0 %2422 }
 0xc59   :  { %v3421_v56 = vsub.f32 %v3415_v19, %v3420_v54  ;;  %2748 = vadd.xlane.f32.xlu1 %v2747_v55 }
 0xc5b   :  { %v8971_v21 = vpop.eup %8970  ;;  %v3422_v57 = vmul.f32 1.442695, %v3421_v56 }
 0xc5c   :  { %v2931_v59 = vsel %vm432_vm5, %v8971_v21, 0.0  ;;  %v2588_v10 = vpop.permute.xlu1 %2587 }
 0xc5d   :  { %8974 = vpow2.f32 %v3422_v57  ;;  %2932 = vadd.xlane.f32.xlu0 %v2931_v59  ;;  %v1927_v57 = vld [vmem:[#allocation2 + $0xf8] sm:$0xff] }
 0xc5e   :  { %8976 = vpow2.f32 %v3257_v3 }
 0xc5f   :  { %v9619_v60 = vpop.eup %8972 }
 0xc60   :  { %v3093_v61 = vsel %vm432_vm5, %v9619_v60, 0.0  ;;  %v2753_v11 = vpop.permute.xlu1 %2752 }
 0xc61   :  { %3094 = vadd.xlane.f32.xlu1 %v3093_v61 }
 0xc67   :  { %v9623_v62 = vpop.eup %8974 }
 0xc68   :  { %v3424_v63 = vsel %vm432_vm5, %v9623_v62, 0.0  ;;  %v8977_v6 = vpop.eup %8976 }
 0xc69   :  { %3425 = vadd.xlane.f32.xlu1 %v3424_v63  ;;  %v3259_v7 = vsel %vm432_vm5, %v8977_v6, 0.0 }
 0xc73   :  { %3099 = vrot.lane.b32.xlu0 %v9521_v27, %s9134_s5 }
 0xc7a   :  { %3264 = vrot.lane.b32.xlu1 %v9521_v27, %s9135_s23 }
 0xc89   :  { %v2256_v5 = vpop.xlane.xlu0 %2255 }
 0xc8a   :  { %8978 = vrcp.f32 %v2256_v5 }
 0xc92   :  { %3260 = vadd.xlane.f32.xlu0 %v3259_v7 }
 0xc94   :  { %v8979_v8 = vpop.eup %8978 }
 0xc95   :  { %v2258_v9 = vmul.f32 %v8979_v8, %v8963_v30 }
 0xc97   :  { %8311 = vmatmul.mubr.msk.f32.vlgmr.msra.gmra.mrb[28].mxu1 %vm432_vm5, %v2258_v9 }
 0xc98   :  { %8319 = vmatpush3.msra.mxu1 %v2423_v4  ;;  %8320 = vmatprep.mubr.msk.f32.mxu1 %vm9133_vm4, %v9132_v24 }
 0xc99   :  { %8328 = vmatprep.subr.mxu1 %v9132_v24 }
 0xca8   :  { %3429 = vrot.lane.b32.xlu0 %v9521_v27, %s9136_s24 }
 0xcde   :  { %v2418_v12 = vpop.xlane.xlu1 %2417 }
 0xcdf   :  { %8980 = vrcp.f32 %v2418_v12 }
 0xce2   :  { %v2584_v13 = vpop.xlane.xlu0 %2583 }
 0xce3   :  { %8982 = vrcp.f32 %v2584_v13  ;;  %v7749_v13 = vld [vmem:[%s10232_s9 + $0x3] ss:$0 sm:$0xff] }
 0xce6   :  { %v2749_v14 = vpop.xlane.xlu1 %2748 }
 0xce7   :  { %8984 = vrcp.f32 %v2749_v14 }
 0xce9   :  { %v8981_v15 = vpop.eup %8980 }
 0xcea   :  { %v2933_v16 = vpop.xlane.xlu0 %2932  ;;  %v2420_v17 = vmul.f32 %v8981_v15, %v8965_v41 }
 0xceb   :  { %8986 = vrcp.f32 %v2933_v16 }
 0xcec   :  { %8321 = vmatmul.mubr.msk.f32.vlgmr.msra.gmra.mrb[30].mxu1 %vm432_vm5, %v2420_v17 }
 0xced   :  { %v8983_v18 = vpop.eup %8982  ;;  %8329 = vmatpush3.msra.mxu1 %v2588_v10  ;;  %8330 = vmatprep.mubr.msk.f32.mxu1 %vm9133_vm4, %v9132_v24 }
 0xcee   :  { %v3095_v19 = vpop.xlane.xlu1 %3094  ;;  %8338 = vmatprep.subr.mxu1 %v9132_v24  ;;  %v2586_v20 = vmul.f32 %v8983_v18, %v8967_v50  ;;  %v3100_v32 = vpop.permute.xlu0 %3099  ;;  %v8785_v50 = vpack.c.bf16 %v1925_v47, %v1924_v45 }
 0xcef   :  { %8988 = vrcp.f32 %v3095_v19 }
 0xcf0   :  { %8331 = vmatmul.mubr.msk.f32.vlgmr.msra.gmra.mrb[32].mxu1 %vm432_vm5, %v2586_v20  ;;  %8786 = vmatprep.subr.bf16.mxu0 %v8785_v50 }
 0xcf1   :  { %v8985_v22 = vpop.eup %8984  ;;  %8339 = vmatpush3.msra.mxu1 %v2753_v11  ;;  %8340 = vmatprep.mubr.msk.f32.mxu1 %vm9133_vm4, %v9132_v24 }
 0xcf2   :  { %8348 = vmatprep.subr.mxu1 %v9132_v24  ;;  %v2751_v23 = vmul.f32 %v8985_v22, %v8969_v53  ;;  %8788 = vmatpush3.bf16.msra.mxu0 %v8785_v50 }
 0xcf4   :  { %8341 = vmatmul.mubr.msk.f32.vlgmr.msra.gmra.mrb[34].mxu1 %vm432_vm5, %v2751_v23 }
 0xcf5   :  { %v8987_v28 = vpop.eup %8986  ;;  %8349 = vmatpush3.msra.mxu1 %v9521_v27  ;;  %8350 = vmatprep.mubr.msk.f32.mxu1 %vm9133_vm4, %v9132_v24 }
 0xcf6   :  { %v3426_v29 = vpop.xlane.xlu1 %3425  ;;  %8358 = vmatprep.subr.mxu1 %v9132_v24  ;;  %v2935_v30 = vmul.f32 %v8987_v28, %v8971_v21  ;;  %v1926_v21 = vld [vmem:[#allocation2 + $0xf0] sm:$0xff] }
 0xcf7   :  { %v8789_v59 = vpack.c.bf16 %v1927_v57, %v1926_v21 }
 0xcf8   :  { %8351 = vmatmul.mubr.msk.f32.vlgmr.msra.gmra.mrb[36].mxu1 %vm432_vm5, %v2935_v30 }
 0xcf9   :  { %v8989_v33 = vpop.eup %8988  ;;  %8359 = vmatpush3.msra.mxu1 %v3100_v32  ;;  %8360 = vmatprep.mubr.msk.f32.mxu1 %vm9133_vm4, %v9132_v24  ;;  %v3653_v32 = vld [vmem:[%s10230_s7 + $0x10] sm:$0xff] }
 0xcfa   :  { %v3265_v34 = vpop.permute.xlu1 %3264  ;;  %8368 = vmatprep.subr.mxu1 %v9132_v24  ;;  %v3097_v27 = vmul.f32 %v8989_v33, %v9619_v60  ;;  %8790 = vmatprep.subr.bf16.mxu0 %v8789_v59 }
 0xcfb   :  { %8792 = vmatpush3.bf16.msra.mxu0 %v8789_v59 }
 0xcfc   :  { %8361 = vmatmul.mubr.msk.f32.vlgmr.msra.gmra.mrb[38].mxu1 %vm432_vm5, %v3097_v27 }
 0xcfd   :  { %8369 = vmatpush3.msra.mxu1 %v3265_v34  ;;  %8370 = vmatprep.mubr.msk.f32.mxu1 %vm9133_vm4, %v9132_v24  ;;  %v3654_v34 = vld [vmem:[%s10230_s7 + $0x18] sm:$0xff] }
 0xcfe   :  { %8378 = vmatprep.subr.mxu1 %v9132_v24  ;;  %v8797_v27 = vpack.c.bf16 %v3654_v34, %v3653_v32 }
 0xd1f   :  { %v3261_v35 = vpop.xlane.xlu0 %3260 }
 0xd20   :  { %8990 = vrcp.f32 %v3261_v35  ;;  %v3743_v35 = vld [vmem:[%s10231_s8] sm:$0xff] }
 0xd21   :  { %8992 = vrcp.f32 %v3426_v29 }
 0xd23   :  { %v3430_v44 = vpop.permute.xlu0 %3429 }
 0xd2a   :  { %v8991_v37 = vpop.eup %8990 }
 0xd2b   :  { %v3263_v48 = vmul.f32 %v8991_v37, %v8977_v6  ;;  %v8993_v38 = vpop.eup %8992  ;;  %v3744_v37 = vld [vmem:[%s10231_s8 + $0x8] sm:$0xff] }
 0xd2c   :  { %v3428_v43 = vmul.f32 %v8993_v38, %v9623_v62  ;;  %v8801_v38 = vpack.c.bf16 %v3744_v37, %v3743_v35  ;;  %v3885_v35 = vld [vmem:[#allocation2 + $0x108] sm:$0xff]  ;;  %v3894_v37 = vld [vmem:[#allocation2 + $0x140] sm:$0xff] }
 0xd2d   :  { %8371 = vmatmul.mubr.msk.f32.vlgmr.msra.gmra.mrb[40].mxu1 %vm432_vm5, %v3263_v48  ;;  %v3745_v48 = vld [vmem:[%s10231_s8 + $0x10] sm:$0xff] }
 0xd2e   :  { %8379 = vmatpush3.msra.mxu1 %v3430_v44  ;;  %8380 = vmatprep.mubr.msk.f32.mxu1 %vm9133_vm4, %v9132_v24  ;;  %v3746_v44 = vld [vmem:[%s10231_s8 + $0x18] sm:$0xff] }
 0xd2f   :  { %8802 = vmatprep.subr.bf16.mxu0 %v8801_v38 }
 0xd31   :  { %8381 = vmatmul.mubr.msk.f32.vlgmr.msra.gmra.mrb[42].mxu1 %vm432_vm5, %v3428_v43  ;;  %v8805_v43 = vpack.c.bf16 %v3746_v44, %v3745_v48  ;;  %v3886_v44 = vld [vmem:[#allocation2 + $0x110] sm:$0xff] }
 0xd6a   :  { %v2328_v39 = vpop.f32.mrb[28].mxu1 }
 0xd6b   :  { %v8312_v36 = vpop.f32.mrb[29].mxu1 }
 0xd6c   :  { %v3748_v36 = vld [vmem:[%s10231_s8 + $0x28] sm:$0xff] }
 0xdbf   :  { %v2494_v40 = vpop.f32.mrb[30].mxu1 }
 0xdc0   :  { %2829 = vrot.lane.b32.xlu1 %v2494_v40, %s9130_s14  ;;  %v8322_v41 = vpop.f32.mrb[31].mxu1 }
 0xdc3   :  { %v2659_v42 = vpop.f32.mrb[32].mxu1 }
 0xdc4   :  { %2833 = vrot.lane.b32.xlu0 %v2659_v42, %s9137_s3  ;;  %v8332_v49 = vpop.f32.mrb[33].mxu1 }
 0xdc7   :  { %v2824_v52 = vpop.f32.mrb[34].mxu1 }
 0xdc8   :  { %2837 = vrot.lane.b32.xlu0 %v2824_v52, %s9138_s27  ;;  %v8342_v46 = vpop.f32.mrb[35].mxu1 }
 0xdcb   :  { %v3005_v53 = vpop.f32.mrb[36].mxu1 }
 0xdcc   :  { %v8352_v54 = vpop.f32.mrb[37].mxu1 }
 0xdcf   :  { %v3171_v55 = vpop.f32.mrb[38].mxu1 }
 0xdd0   :  { %3506 = vrot.lane.b32.xlu1 %v3171_v55, %s9130_s14  ;;  %v8362_v56 = vpop.f32.mrb[39].mxu1 }
 0xe00   :  { %v3336_v60 = vpop.f32.mrb[40].mxu1 }
 0xe01   :  { %3510 = vrot.lane.b32.xlu1 %v3336_v60, %s9137_s3  ;;  %v8372_v61 = vpop.f32.mrb[41].mxu1 }
 0xe04   :  { %v3501_v62 = vpop.f32.mrb[42].mxu1 }
 0xe05   :  { %3514 = vrot.lane.b32.xlu0 %v3501_v62, %s9138_s27  ;;  %v8382_v63 = vpop.f32.mrb[43].mxu1  ;;  %v7752_v62 = vld [vmem:[%s10232_s9 + $0x4] ss:$0 sm:$0xff] }
 0xe32   :  { %v2830_v0 = vpop.permute.xlu1 %2829 }
 0xe33   :  { %v2840_v3 = vsel %vm432_vm5, %v2328_v39, %v2830_v0  ;;  %v3747_v39 = vld [vmem:[%s10231_s8 + $0x20] sm:$0xff] }
 0xe34   :  { %v8809_v40 = vpack.c.bf16 %v3748_v36, %v3747_v39 }
 0xe36   :  { %v2834_v1 = vpop.permute.xlu0 %2833 }
 0xe37   :  { %v2841_v4 = vsel %vm1102_vm8, %v2840_v3, %v2834_v1  ;;  %v7753_v1 = vld [vmem:[%s10232_s9 + $0x5] ss:$0 sm:$0xff] }
 0xe3a   :  { %v2838_v5 = vpop.permute.xlu0 %2837 }
 0xe3b   :  { %v2842_v6 = vsel %vm1104_vm9, %v2841_v4, %v2838_v5 }
 0xe3c   :  { %8391 = vmatprep.mubr.msk.f32.mxu0 %vm200_vm3, %v2842_v6 }
 0xe42   :  { %v3507_v7 = vpop.permute.xlu1 %3506 }
 0xe43   :  { %v3517_v9 = vsel %vm432_vm5, %v3005_v53, %v3507_v7 }
 0xe73   :  { %v3511_v8 = vpop.permute.xlu1 %3510 }
 0xe74   :  { %v3518_v10 = vsel %vm1102_vm8, %v3517_v9, %v3511_v8  ;;  %v3749_v8 = vld [vmem:[%s10231_s8 + $0x30] sm:$0xff]  ;;  %v3750_v9 = vld [vmem:[%s10231_s8 + $0x38] sm:$0xff] }
 0xe77   :  { %v3515_v11 = vpop.permute.xlu0 %3514 }
 0xe78   :  { %v3519_v12 = vsel %vm1104_vm9, %v3518_v10, %v3515_v11  ;;  %v8813_v10 = vpack.c.bf16 %v3750_v9, %v3749_v8  ;;  %v7754_v11 = vld [vmem:[%s10232_s9 + $0x6] ss:$0 sm:$0xff]  ;;  %v7761_v8 = vld [vmem:[%s10232_s9 + $0x9] ss:$0 sm:$0xff] }
 0xe79   :  { %8392 = vmatmul.mubr.msk.f32.vlgmr.msra.gmra.mrb[36].mxu0 %vm200_vm3, %v3519_v12 }
 0xe7a   :  { %8804 = vmatpush3.bf16.msra.mxu0 %v8801_v38  ;;  %v3895_v38 = vld [vmem:[#allocation2 + $0x148] sm:$0xff] }
 0xe7b   :  { %8806 = vmatprep.subr.bf16.mxu0 %v8805_v43  ;;  %v8833_v39 = vpack.c.bf16 %v3895_v38, %v3894_v37 }
 0xe7e   :  { %8808 = vmatpush3.bf16.msra.mxu0 %v8805_v43  ;;  %v3887_v43 = vld [vmem:[#allocation2 + $0x118] sm:$0xff] }
 0xe7f   :  { %8810 = vmatprep.subr.bf16.mxu0 %v8809_v40  ;;  %v8821_v36 = vpack.c.bf16 %v3887_v43, %v3886_v44 }
 0xe82   :  { %8812 = vmatpush3.bf16.msra.mxu0 %v8809_v40  ;;  %v3896_v40 = vld [vmem:[#allocation2 + $0x150] sm:$0xff] }
 0xe83   :  { %8814 = vmatprep.subr.bf16.mxu0 %v8813_v10 }
 0xe86   :  { %8816 = vmatpush3.bf16.msra.mxu0 %v8813_v10 }
 0xe87   :  { %8834 = vmatprep.subr.bf16.mxu0 %v8833_v39 }
 0xf4c   :  { %v8393_v14 = vpop.f32.mrb[36].mxu0 }
 0xf4d   :  { %v3602_v15 = vadd.f32 %v8393_v14, %v7749_v13  ;;  %v3596_v16 = vpop.f32.mrb[37].mxu0 }
 0xf4e   :  { %v3597_v17 = vadd.f32 %v7749_v13, %v3596_v16 }
 0xf4f   :  { %v3606_v18 = vadd.f32 %v3602_v15, %v9513_v26  ;;  %v3651_v26 = vld [vmem:[%s10230_s7] sm:$0xff] }
 0xf50   :  { %v3605_v19 = vadd.f32 %v3597_v17, %v9511_v25  ;;  %v3652_v25 = vld [vmem:[%s10230_s7 + $0x8] sm:$0xff] }
 0xf51   :  { %v3612_v20 = vsel %vm200_vm3, %v3606_v18, 0.0  ;;  %v3618_v28 = vmul.f32 %v3606_v18, %v3606_v18  ;;  %v8793_v33 = vpack.c.bf16 %v3652_v25, %v3651_v26 }
 0xf52   :  { %3613 = vadd.xlane.f32.xlu0 %v3612_v20  ;;  %v3609_v22 = vsel %vm200_vm3, %v3605_v19, 0.0  ;;  %v3617_v23 = vmul.f32 %v3605_v19, %v3605_v19 }
 0xf53   :  { %3610 = vadd.xlane.f32.xlu1 %v3609_v22  ;;  %v3622_v30 = vsel %vm200_vm3, %v3618_v28, 0.0  ;;  %8794 = vmatprep.subr.bf16.mxu1 %v8793_v33 }
 0xf54   :  { %v3619_v29 = vsel %vm200_vm3, %v3617_v23, 0.0  ;;  %8796 = vmatpush3.bf16.msra.mxu1 %v8793_v33 }
 0xf55   :  { %8798 = vmatprep.subr.bf16.mxu1 %v8797_v27 }
 0xf56   :  { %3620 = vadd.xlane.f32.xlu0 %v3619_v29 }
 0xf57   :  { %3623 = vadd.xlane.f32.xlu1 %v3622_v30 }
 0xf58   :  { %8800 = vmatpush3.bf16.msra.mxu1 %v8797_v27  ;;  %v3884_v27 = vld [vmem:[#allocation2 + $0x100] sm:$0xff] }
 0xf59   :  { %v8817_v48 = vpack.c.bf16 %v3885_v35, %v3884_v27 }
 0xf5b   :  { %8818 = vmatprep.subr.bf16.mxu1 %v8817_v48 }
 0xfdf   :  { %v3614_v41 = vpop.xlane.xlu0 %3613 }
 0xfe0   :  { %v3611_v42 = vpop.xlane.xlu1 %3610  ;;  %v3616_v45 = vmul.f32 0.03125, %v3614_v41  ;;  %v3897_v41 = vld [vmem:[#allocation2 + $0x158] sm:$0xff] }
 0xfe1   :  { %v3615_v47 = vmul.f32 0.03125, %v3611_v42  ;;  %v8837_v42 = vpack.c.bf16 %v3897_v41, %v3896_v40 }
 0xfe2   :  { %v3628_v53 = vmul.f32 %v3616_v45, %v3616_v45  ;;  %v3632_v61 = vsub.f32 %v3606_v18, %v3616_v45  ;;  %v7757_v18 = vld [vmem:[%s10232_s9 + $0x7] ss:$0 sm:$0xff] }
 0xfe3   :  { %v3627_v49 = vmul.f32 %v3615_v47, %v3615_v47  ;;  %v3621_v50 = vpop.xlane.xlu0 %3620  ;;  %v3631_v59 = vsub.f32 %v3605_v19, %v3615_v47  ;;  %v3889_v45 = vld [vmem:[#allocation2 + $0x120] sm:$0xff]  ;;  %v3890_v47 = vld [vmem:[#allocation2 + $0x128] sm:$0xff] }
 0xfe4   :  { %v3625_v52 = vmul.f32 0.03125, %v3621_v50  ;;  %v3624_v46 = vpop.xlane.xlu1 %3623 }
 0xfe5   :  { %v3626_v54 = vmul.f32 0.03125, %v3624_v46 }
 0xfe6   :  { %v3629_v55 = vsub.f32 %v3625_v52, %v3627_v49  ;;  %v8825_v49 = vpack.c.bf16 %v3890_v47, %v3889_v45 }
 0xfe7   :  { %v3630_v56 = vsub.f32 %v3626_v54, %v3628_v53 }
 0xfe8   :  { %v3633_v21 = vadd.f32 1e-05, %v3629_v55 }
 0xfe9   :  { %v3634_v57 = vadd.f32 1e-05, %v3630_v56 }
 0xfea   :  { %8994 = vrsqrt.f32 %v3633_v21 }
 0xfeb   :  { %8996 = vrsqrt.f32 %v3634_v57 }
 0xff4   :  { %v8995_v60 = vpop.eup %8994 }
 0xff5   :  { %v8997_v63 = vpop.eup %8996  ;;  %v3637_v0 = vmul.f32 %v8995_v60, %v3631_v59 }
 0xff6   :  { %v3638_v3 = vmul.f32 %v8997_v63, %v3632_v61 }
 0xff7   :  { %v3643_v4 = vmul.f32 %v7752_v62, %v3637_v0 }
 0xff8   :  { %v3644_v5 = vmul.f32 %v7752_v62, %v3638_v3 }
 0xff9   :  { %v3649_v6 = vadd.f32 %v7753_v1, %v3643_v4  ;;  %v7760_v4 = vld [vmem:[%s10232_s9 + $0x8] ss:$0 sm:$0xff] }
 0xffa   :  { %v3650_v7 = vadd.f32 %v7753_v1, %v3644_v5 }
 0xffb   :  { %8402 = vmatprep.mubr.msk.f32.mxu1 %vm200_vm3, %v3649_v6 }
 0xffc   :  { %8403 = vmatmul.mubr.msk.f32.vlgmr.msra.gmra.mrb[44].mxu1 %vm200_vm3, %v3650_v7 }
 0xffd   :  { %8820 = vmatpush3.bf16.msra.mxu1 %v8817_v48 }
 0xffe   :  { %8822 = vmatprep.subr.bf16.mxu1 %v8821_v36 }
0x1001   :  { %8824 = vmatpush3.bf16.msra.mxu1 %v8821_v36 }
0x1002   :  { %8826 = vmatprep.subr.bf16.mxu1 %v8825_v49 }
0x10cf   :  { %v8404_v12 = vpop.f32.mrb[44].mxu1 }
0x10d0   :  { %v3738_v13 = vadd.f32 %v8404_v12, %v7754_v11  ;;  %v3732_v14 = vpop.f32.mrb[45].mxu1  ;;  %v3892_v12 = vld [vmem:[#allocation2 + $0x138] sm:$0xff] }
0x10d1   :  { %v3733_v15 = vadd.f32 %v7754_v11, %v3732_v14  ;;  %v3891_v11 = vld [vmem:[#allocation2 + $0x130] sm:$0xff] }
0x10d2   :  { %v3742_v17 = vmax.f32 %v3738_v13, 0.0 }
0x10d3   :  { %v3741_v16 = vmax.f32 %v3733_v15, 0.0  ;;  %v8829_v15 = vpack.c.bf16 %v3892_v12, %v3891_v11 }
0x10d5   :  { %8421 = vmatprep.mubr.msk.f32.mxu0 %vm82_vm0, %v3741_v16 }
0x10d6   :  { %8422 = vmatmul.mubr.msk.f32.vlgmr.msra.gmra.mrb[38].mxu0 %vm82_vm0, %v3742_v17 }
0x10d7   :  { %8836 = vmatpush3.bf16.msra.mxu0 %v8833_v39 }
0x10d8   :  { %8838 = vmatprep.subr.bf16.mxu0 %v8837_v42 }
0x10db   :  { %8840 = vmatpush3.bf16.msra.mxu0 %v8837_v42 }
0x10dc   :  { %8467 = vmatprep.subr.mxu0 %v9132_v24 }
0x11a9   :  { %v8423_v19 = vpop.f32.mrb[38].mxu0 }
0x11aa   :  { %v3834_v20 = vadd.f32 %v8423_v19, %v7757_v18  ;;  %v3828_v22 = vpop.f32.mrb[39].mxu0 }
0x11ab   :  { %v3829_v23 = vadd.f32 %v7757_v18, %v3828_v22 }
0x11ac   :  { %v3838_v28 = vadd.f32 %v3834_v20, %v3650_v7 }
0x11ad   :  { %v3837_v29 = vadd.f32 %v3829_v23, %v3649_v6 }
0x11ae   :  { %v3844_v30 = vsel %vm200_vm3, %v3838_v28, 0.0  ;;  %v3850_v26 = vmul.f32 %v3838_v28, %v3838_v28 }
0x11af   :  { %3845 = vadd.xlane.f32.xlu1 %v3844_v30  ;;  %v3841_v25 = vsel %vm200_vm3, %v3837_v29, 0.0  ;;  %v3849_v32 = vmul.f32 %v3837_v29, %v3837_v29 }
0x11b0   :  { %3842 = vadd.xlane.f32.xlu0 %v3841_v25  ;;  %v3854_v33 = vsel %vm200_vm3, %v3850_v26, 0.0 }
0x11b1   :  { %v3851_v34 = vsel %vm200_vm3, %v3849_v32, 0.0 }
0x11b3   :  { %3855 = vadd.xlane.f32.xlu1 %v3854_v33 }
0x11b4   :  { %3852 = vadd.xlane.f32.xlu0 %v3851_v34 }
0x123c   :  { %v3846_v50 = vpop.xlane.xlu1 %3845 }
0x123d   :  { %v3848_v52 = vmul.f32 0.03125, %v3846_v50  ;;  %v3843_v46 = vpop.xlane.xlu0 %3842 }
0x123e   :  { %v3847_v53 = vmul.f32 0.03125, %v3843_v46 }
0x123f   :  { %v3860_v55 = vmul.f32 %v3848_v52, %v3848_v52  ;;  %v3864_v0 = vsub.f32 %v3838_v28, %v3848_v52 }
0x1240   :  { %v3856_v54 = vpop.xlane.xlu1 %3855  ;;  %v3859_v57 = vmul.f32 %v3847_v53, %v3847_v53  ;;  %v3863_v3 = vsub.f32 %v3837_v29, %v3847_v53 }
0x1241   :  { %v3858_v56 = vmul.f32 0.03125, %v3856_v54  ;;  %v3853_v21 = vpop.xlane.xlu0 %3852 }
0x1242   :  { %v3857_v59 = vmul.f32 0.03125, %v3853_v21 }
0x1243   :  { %v3862_v60 = vsub.f32 %v3858_v56, %v3860_v55 }
0x1244   :  { %v3861_v61 = vsub.f32 %v3857_v59, %v3859_v57 }
0x1245   :  { %v3866_v62 = vadd.f32 1e-05, %v3862_v60 }
0x1246   :  { %v3865_v63 = vadd.f32 1e-05, %v3861_v61 }
0x1247   :  { %8998 = vrsqrt.f32 %v3866_v62 }
0x1248   :  { %9000 = vrsqrt.f32 %v3865_v63 }
0x1251   :  { %v8999_v1 = vpop.eup %8998 }
0x1252   :  { %v9001_v5 = vpop.eup %9000  ;;  %v3870_v6 = vmul.f32 %v8999_v1, %v3864_v0 }
0x1253   :  { %v3869_v7 = vmul.f32 %v9001_v5, %v3863_v3 }
0x1254   :  { %v3876_v9 = vmul.f32 %v7760_v4, %v3870_v6 }
0x1255   :  { %v3875_v10 = vmul.f32 %v7760_v4, %v3869_v7 }
0x1256   :  { %v9754_v14 = vadd.f32 %v7761_v8, %v3876_v9 }
0x1257   :  { %v9752_v13 = vadd.f32 %v7761_v8, %v3875_v10 }
0x1259   :  { %8432 = vmatprep.mubr.msk.f32.mxu1 %vm200_vm3, %v9752_v13  ;;  %8454 = vmatprep.mubr.msk.f32.mxu0 %vm200_vm3, %v9752_v13 }
0x125a   :  { %8433 = vmatmul.mubr.msk.f32.vlgmr.msra.gmra.mrb[46].mxu1 %vm200_vm3, %v9754_v14  ;;  %8455 = vmatmul.mubr.msk.f32.vlgmr.msra.gmra.mrb[40].mxu0 %vm200_vm3, %v9754_v14 }
0x125b   :  { %8828 = vmatpush3.bf16.msra.mxu1 %v8825_v49  ;;  %8443 = vmatprep.mubr.msk.f32.mxu1 %vm200_vm3, %v9752_v13 }
0x125c   :  { %8830 = vmatprep.subr.bf16.mxu1 %v8829_v15  ;;  %8469 = vmatprep.mubr.msk.f32.mxu0 %vm9133_vm4, %v9132_v24 }
0x125f   :  { %8832 = vmatpush3.bf16.msra.mxu1 %v8829_v15 }
0x1260   :  { %8457 = vmatprep.subr.mxu1 %v9132_v24 }
0x1262   :  { %8444 = vmatmul.mubr.msk.f32.vlgmr.msra.gmra.mrb[48].mxu1 %vm200_vm3, %v9754_v14 }
0x1263   :  { %8459 = vmatprep.mubr.msk.f32.mxu1 %vm9133_vm4, %v9132_v24 }
0x132d   :  { %v9773_v16 = vpop.f32.mrb[46].mxu1  ;;  %v8456_v17 = vpop.f32.mrb[40].mxu0 }
0x132e   :  { %v9775_v18 = vpop.f32.mrb[47].mxu1  ;;  %v4126_v19 = vpop.f32.mrb[41].mxu0 }
0x132f   :  { %4295 = vrot.lane.b32.xlu1 %v4126_v19, %s9134_s5 }
0x1335   :  { %v8445_v20 = vpop.f32.mrb[48].mxu1 }
0x1336   :  { %v4051_v22 = vpop.f32.mrb[49].mxu1 }
0x1337   :  { %4463 = vrot.lane.b32.xlu1 %v4051_v22, %s9135_s23  ;;  %4297 = vrot.lane.b32.xlu0 %v4051_v22, %s9134_s5 }
0x1338   :  { %8458 = vmatpush3.xpose.msk.msra.mxu1 %vm432_vm5, %v4051_v22 }
0x1339   :  { %8462 = vmatprep.subr.mxu1 %v9132_v24 }
0x133b   :  { %8460 = vmatmul.mubr.msk.f32.vlgmr.msra.gmra.mrb[50].mxu1 %vm432_vm5, %v4126_v19  ;;  %4628 = vrot.lane.b32.xlu1 %v4051_v22, %s9136_s24 }
0x133c   :  { %4461 = vrot.lane.b32.xlu0 %v4126_v19, %s9135_s23  ;;  %8463 = vmatpush3.msra.mxu1 %v9775_v18 }
0x133d   :  { %8464 = vmatprep.mubr.msk.f32.mxu1 %vm9133_vm4, %v9132_v24  ;;  %8472 = vmatprep.subr.mxu1 %v9132_v24 }
0x133f   :  { %4968 = vrot.lane.b32.xlu1 %v8445_v20, %s9134_s5 }
0x1340   :  { %4626 = vrot.lane.b32.xlu0 %v4126_v19, %s9136_s24 }
0x1343   :  { %5134 = vrot.lane.b32.xlu1 %v8445_v20, %s9135_s23 }
0x1344   :  { %4966 = vrot.lane.b32.xlu0 %v8456_v17, %s9134_s5 }
0x1347   :  { %5299 = vrot.lane.b32.xlu1 %v8445_v20, %s9136_s24 }
0x1348   :  { %5132 = vrot.lane.b32.xlu0 %v8456_v17, %s9135_s23 }
0x134c   :  { %5297 = vrot.lane.b32.xlu0 %v8456_v17, %s9136_s24 }
0x13a1   :  { %v4296_v23 = vpop.permute.xlu1 %4295 }
0x13a9   :  { %v4464_v28 = vpop.permute.xlu1 %4463  ;;  %v4298_v29 = vpop.permute.xlu0 %4297 }
0x13aa   :  { %8468 = vmatpush3.xpose.msk.msra.mxu0 %vm432_vm5, %v4298_v29 }
0x13ab   :  { %8477 = vmatprep.subr.mxu0 %v9132_v24 }
0x13ad   :  { %8470 = vmatmul.mubr.msk.f32.vlgmr.msra.gmra.mrb[42].mxu0 %vm432_vm5, %v4296_v23  ;;  %v4629_v26 = vpop.permute.xlu1 %4628 }
0x13ae   :  { %v4462_v30 = vpop.permute.xlu0 %4461  ;;  %8478 = vmatpush3.xpose.msk.msra.mxu0 %vm432_vm5, %v4464_v28  ;;  %8479 = vmatprep.mubr.msk.f32.mxu0 %vm9133_vm4, %v9132_v24 }
0x13af   :  { %8487 = vmatprep.subr.mxu0 %v9132_v24 }
0x13b1   :  { %8480 = vmatmul.mubr.msk.f32.vlgmr.msra.gmra.mrb[44].mxu0 %vm432_vm5, %v4462_v30  ;;  %v4969_v32 = vpop.permute.xlu1 %4968 }
0x13b2   :  { %v4627_v25 = vpop.permute.xlu0 %4626  ;;  %8488 = vmatpush3.xpose.msk.msra.mxu0 %vm432_vm5, %v4629_v26  ;;  %8489 = vmatprep.mubr.msk.f32.mxu0 %vm9133_vm4, %v9132_v24 }
0x13b3   :  { %8497 = vmatprep.subr.mxu0 %v9132_v24 }
0x13b5   :  { %8490 = vmatmul.mubr.msk.f32.vlgmr.msra.gmra.mrb[46].mxu0 %vm432_vm5, %v4627_v25  ;;  %v5135_v34 = vpop.permute.xlu1 %5134 }
0x13b6   :  { %8498 = vmatpush3.xpose.msk.msra.mxu0 %vm432_vm5, %v8445_v20  ;;  %8499 = vmatprep.mubr.msk.f32.mxu0 %vm9133_vm4, %v9132_v24  ;;  %v4967_v33 = vpop.permute.xlu0 %4966 }
0x13b7   :  { %8507 = vmatprep.subr.mxu0 %v9132_v24 }
0x13b9   :  { %8500 = vmatmul.mubr.msk.f32.vlgmr.msra.gmra.mrb[48].mxu0 %vm432_vm5, %v8456_v17  ;;  %v5300_v35 = vpop.permute.xlu1 %5299 }
0x13ba   :  { %8508 = vmatpush3.xpose.msk.msra.mxu0 %vm432_vm5, %v4969_v32  ;;  %8509 = vmatprep.mubr.msk.f32.mxu0 %vm9133_vm4, %v9132_v24  ;;  %v5133_v27 = vpop.permute.xlu0 %5132 }
0x13bb   :  { %8517 = vmatprep.subr.mxu0 %v9132_v24 }
0x13bd   :  { %8510 = vmatmul.mubr.msk.f32.vlgmr.msra.gmra.mrb[50].mxu0 %vm432_vm5, %v4967_v33 }
0x13be   :  { %8518 = vmatpush3.xpose.msk.msra.mxu0 %vm432_vm5, %v5135_v34  ;;  %8519 = vmatprep.mubr.msk.f32.mxu0 %vm9133_vm4, %v9132_v24  ;;  %v5298_v37 = vpop.permute.xlu0 %5297 }
0x13bf   :  { %8527 = vmatprep.subr.mxu0 %v9132_v24 }
0x13c1   :  { %8520 = vmatmul.mubr.msk.f32.vlgmr.msra.gmra.mrb[52].mxu0 %vm432_vm5, %v5133_v27 }
0x13c2   :  { %8528 = vmatpush3.xpose.msk.msra.mxu0 %vm432_vm5, %v5300_v35  ;;  %8529 = vmatprep.mubr.msk.f32.mxu0 %vm9133_vm4, %v9132_v24 }
0x13c5   :  { %8530 = vmatmul.mubr.msk.f32.vlgmr.msra.gmra.mrb[54].mxu0 %vm432_vm5, %v5298_v37 }
0x140e   :  { %v4207_v48 = vpop.f32.mrb[50].mxu1 }
0x140f   :  { %v4208_v38 = vadd.f32 %v4207_v48, %v9331_v58  ;;  %v8461_v44 = vpop.f32.mrb[51].mxu1 }
0x1411   :  { %v4211_v43 = vsel %vm432_vm5, %v4208_v38, -inf }
0x1412   :  { %4212 = vmax.xlane.f32.xlu1 %v4211_v43 }
0x1480   :  { %v4369_v39 = vpop.f32.mrb[42].mxu0 }
0x1481   :  { %v4370_v36 = vadd.f32 %v4369_v39, %v9331_v58  ;;  %v8471_v40 = vpop.f32.mrb[43].mxu0 }
0x1483   :  { %v4373_v41 = vsel %vm432_vm5, %v4370_v36, -inf }
0x1484   :  { %4374 = vmax.xlane.f32.xlu0 %v4373_v41  ;;  %v4535_v42 = vpop.f32.mrb[44].mxu0 }
0x1485   :  { %v4536_v45 = vadd.f32 %v4535_v42, %v9331_v58  ;;  %v8481_v47 = vpop.f32.mrb[45].mxu0 }
0x1487   :  { %v4539_v49 = vsel %vm432_vm5, %v4536_v45, -inf }
0x1488   :  { %4540 = vmax.xlane.f32.xlu0 %v4539_v49  ;;  %v4700_v50 = vpop.f32.mrb[46].mxu0 }
0x1489   :  { %v4701_v52 = vadd.f32 %v4700_v50, %v9331_v58  ;;  %v8491_v46 = vpop.f32.mrb[47].mxu0 }
0x148b   :  { %v4704_v53 = vsel %vm432_vm5, %v4701_v52, -inf }
0x148c   :  { %v4878_v54 = vpop.f32.mrb[48].mxu0  ;;  %4705 = vmax.xlane.f32.xlu1 %v4704_v53 }
0x148d   :  { %v4879_v55 = vadd.f32 %v4878_v54, %v9375_v31  ;;  %v8501_v56 = vpop.f32.mrb[49].mxu0 }
0x148f   :  { %v4882_v21 = vsel %vm432_vm5, %v4879_v55, -inf }
0x1490   :  { %4883 = vmax.xlane.f32.xlu0 %v4882_v21  ;;  %v5040_v57 = vpop.f32.mrb[50].mxu0 }
0x1491   :  { %v5041_v59 = vadd.f32 %v5040_v57, %v9375_v31  ;;  %v8511_v60 = vpop.f32.mrb[51].mxu0 }
0x1493   :  { %v5044_v61 = vsel %vm432_vm5, %v5041_v59, -inf }
0x1494   :  { %v5206_v62 = vpop.f32.mrb[52].mxu0  ;;  %5045 = vmax.xlane.f32.xlu1 %v5044_v61 }
0x1495   :  { %v9841_v58 = vadd.f32 %v5206_v62, %v9375_v31  ;;  %v8521_v63 = vpop.f32.mrb[53].mxu0 }
0x1497   :  { %v5210_v0 = vsel %vm432_vm5, %v9841_v58, -inf }
0x1498   :  { %5211 = vmax.xlane.f32.xlu0 %v5210_v0  ;;  %v5371_v1 = vpop.f32.mrb[54].mxu0 }
0x1499   :  { %v5372_v3 = vadd.f32 %v5371_v1, %v9375_v31  ;;  %v8531_v4 = vpop.f32.mrb[55].mxu0 }
0x149b   :  { %v5375_v5 = vsel %vm432_vm5, %v5372_v3, -inf }
0x149c   :  { %5376 = vmax.xlane.f32.xlu1 %v5375_v5 }
0x149f   :  { %v4213_v6 = vpop.xlane.xlu1 %4212 }
0x14a0   :  { %v4214_v7 = vsub.f32 %v4208_v38, %v4213_v6 }
0x14a2   :  { %v4215_v8 = vmul.f32 1.442695, %v4214_v7 }
0x14a4   :  { %9002 = vpow2.f32 %v4215_v8 }
0x14ad   :  { %4550 = vrot.lane.b32.xlu1 %v9775_v18, %s9135_s23 }
0x14ae   :  { %4385 = vrot.lane.b32.xlu0 %v9775_v18, %s9134_s5  ;;  %v9003_v9 = vpop.eup %9002 }
0x14af   :  { %v4217_v31 = vsel %vm432_vm5, %v9003_v9, 0.0 }
0x14b1   :  { %4715 = vrot.lane.b32.xlu1 %v9775_v18, %s9136_s24 }
0x14cd   :  { %4218 = vadd.xlane.f32.xlu0 %v4217_v31 }
0x1511   :  { %v4375_v10 = vpop.xlane.xlu0 %4374 }
0x1512   :  { %v4376_v11 = vsub.f32 %v4370_v36, %v4375_v10 }
0x1514   :  { %v4377_v12 = vmul.f32 1.442695, %v4376_v11 }
0x1515   :  { %v4541_v15 = vpop.xlane.xlu0 %4540 }
0x1516   :  { %9004 = vpow2.f32 %v4377_v12  ;;  %v4542_v17 = vsub.f32 %v4536_v45, %v4541_v15 }
0x1518   :  { %v4543_v19 = vmul.f32 1.442695, %v4542_v17 }
0x1519   :  { %v4706_v20 = vpop.xlane.xlu1 %4705 }
0x151a   :  { %9006 = vpow2.f32 %v4543_v19  ;;  %v4707_v22 = vsub.f32 %v4701_v52, %v4706_v20  ;;  %v9908_v20 = vld [vmem:[%s10224_s1] sm:$0xff] }
0x151c   :  { %v4708_v23 = vmul.f32 1.442695, %v4707_v22 }
0x151d   :  { %v4884_v18 = vpop.xlane.xlu0 %4883 }
0x151e   :  { %9008 = vpow2.f32 %v4708_v23  ;;  %v4885_v28 = vsub.f32 %v4879_v55, %v4884_v18 }
0x1520   :  { %v9005_v29 = vpop.eup %9004  ;;  %v4886_v30 = vmul.f32 1.442695, %v4885_v28 }
0x1521   :  { %v5046_v26 = vpop.xlane.xlu1 %5045  ;;  %v4379_v25 = vsel %vm432_vm5, %v9005_v29, 0.0 }
0x1522   :  { %9010 = vpow2.f32 %v4886_v30  ;;  %v5047_v32 = vsub.f32 %v5041_v59, %v5046_v26  ;;  %4380 = vadd.xlane.f32.xlu1 %v4379_v25  ;;  %v3899_v30 = vld [vmem:[#allocation2 + $0x160] sm:$0xff]  ;;  %v3900_v26 = vld [vmem:[#allocation2 + $0x168] sm:$0xff] }
0x1524   :  { %v9007_v33 = vpop.eup %9006  ;;  %v5048_v34 = vmul.f32 1.442695, %v5047_v32  ;;  %v8841_v32 = vpack.c.bf16 %v3900_v26, %v3899_v30  ;;  %v9079_v30 = vld [vmem:[%s10224_s1 + $0x8] sm:$0xff] }
0x1525   :  { %v4545_v27 = vsel %vm432_vm5, %v9007_v33, 0.0  ;;  %v5212_v45 = vpop.xlane.xlu0 %5211 }
0x1526   :  { %9012 = vpow2.f32 %v5048_v34  ;;  %4546 = vadd.xlane.f32.xlu0 %v4545_v27  ;;  %v5213_v47 = vsub.f32 %v9841_v58, %v5212_v45  ;;  %8842 = vmatprep.subr.bf16.mxu0 %v8841_v32 }
0x1527   :  { %8844 = vmatpush3.bf16.msra.mxu0 %v8841_v32 }
0x1528   :  { %v9009_v35 = vpop.eup %9008  ;;  %v5214_v49 = vmul.f32 1.442695, %v5213_v47 }
0x1529   :  { %v5377_v37 = vpop.xlane.xlu1 %5376  ;;  %v4710_v48 = vsel %vm432_vm5, %v9009_v35, 0.0  ;;  %v4386_v50 = vpop.permute.xlu0 %4385 }
0x152a   :  { %v5378_v38 = vsub.f32 %v5372_v3, %v5377_v37  ;;  %4711 = vadd.xlane.f32.xlu1 %v4710_v48 }
0x152c   :  { %v9011_v44 = vpop.eup %9010  ;;  %v5379_v43 = vmul.f32 1.442695, %v5378_v38  ;;  %v3901_v38 = vld [vmem:[#allocation2 + $0x170] sm:$0xff] }
0x152d   :  { %v4888_v39 = vsel %vm432_vm5, %v9011_v44, 0.0  ;;  %v4551_v56 = vpop.permute.xlu1 %4550 }
0x152e   :  { %9014 = vpow2.f32 %v5379_v43  ;;  %4889 = vadd.xlane.f32.xlu0 %v4888_v39 }
0x152f   :  { %9016 = vpow2.f32 %v5214_v49 }
0x1530   :  { %v9858_v36 = vpop.eup %9012 }
0x1531   :  { %v5050_v40 = vsel %vm432_vm5, %v9858_v36, 0.0  ;;  %v4716_v21 = vpop.permute.xlu1 %4715 }
0x1532   :  { %5051 = vadd.xlane.f32.xlu1 %v5050_v40 }
0x1538   :  { %v9862_v41 = vpop.eup %9014 }
0x1539   :  { %v5381_v42 = vsel %vm432_vm5, %v9862_v41, 0.0  ;;  %v9017_v46 = vpop.eup %9016 }
0x153a   :  { %5382 = vadd.xlane.f32.xlu1 %v5381_v42  ;;  %v5216_v53 = vsel %vm432_vm5, %v9017_v46, 0.0 }
0x1544   :  { %5056 = vrot.lane.b32.xlu0 %v9773_v16, %s9134_s5 }
0x154b   :  { %5221 = vrot.lane.b32.xlu1 %v9773_v16, %s9135_s23 }
0x155a   :  { %v4219_v52 = vpop.xlane.xlu0 %4218 }
0x155b   :  { %9018 = vrcp.f32 %v4219_v52 }
0x1563   :  { %5217 = vadd.xlane.f32.xlu0 %v5216_v53 }
0x1565   :  { %v9019_v54 = vpop.eup %9018 }
0x1566   :  { %v4221_v55 = vmul.f32 %v9019_v54, %v9003_v9 }
0x1568   :  { %8465 = vmatmul.mubr.msk.f32.vlgmr.msra.gmra.mrb[52].mxu1 %vm432_vm5, %v4221_v55 }
0x1569   :  { %8473 = vmatpush3.msra.mxu1 %v4386_v50  ;;  %8474 = vmatprep.mubr.msk.f32.mxu1 %vm9133_vm4, %v9132_v24 }
0x156a   :  { %8482 = vmatprep.subr.mxu1 %v9132_v24 }
0x1579   :  { %5386 = vrot.lane.b32.xlu0 %v9773_v16, %s9136_s24 }
0x15af   :  { %v4381_v57 = vpop.xlane.xlu1 %4380 }
0x15b0   :  { %9020 = vrcp.f32 %v4381_v57  ;;  %v7792_v57 = vld [vmem:[%s10232_s9 + $0xa] ss:$0 sm:$0xff] }
0x15b3   :  { %v4547_v59 = vpop.xlane.xlu0 %4546 }
0x15b4   :  { %9022 = vrcp.f32 %v4547_v59 }
0x15b7   :  { %v4712_v60 = vpop.xlane.xlu1 %4711 }
0x15b8   :  { %9024 = vrcp.f32 %v4712_v60 }
0x15ba   :  { %v9021_v61 = vpop.eup %9020 }
0x15bb   :  { %v4383_v62 = vmul.f32 %v9021_v61, %v9005_v29  ;;  %v4890_v58 = vpop.xlane.xlu0 %4889 }
0x15bc   :  { %9026 = vrcp.f32 %v4890_v58 }
0x15bd   :  { %8475 = vmatmul.mubr.msk.f32.vlgmr.msra.gmra.mrb[54].mxu1 %vm432_vm5, %v4383_v62 }
0x15be   :  { %v9023_v63 = vpop.eup %9022  ;;  %8483 = vmatpush3.msra.mxu1 %v4551_v56  ;;  %8484 = vmatprep.mubr.msk.f32.mxu1 %vm9133_vm4, %v9132_v24 }
0x15bf   :  { %v4549_v0 = vmul.f32 %v9023_v63, %v9007_v33  ;;  %v5052_v1 = vpop.xlane.xlu1 %5051  ;;  %8492 = vmatprep.subr.mxu1 %v9132_v24  ;;  %v5057_v8 = vpop.permute.xlu0 %5056 }
0x15c0   :  { %9028 = vrcp.f32 %v5052_v1 }
0x15c1   :  { %8485 = vmatmul.mubr.msk.f32.vlgmr.msra.gmra.mrb[56].mxu1 %vm432_vm5, %v4549_v0 }
0x15c2   :  { %v9025_v3 = vpop.eup %9024  ;;  %8493 = vmatpush3.msra.mxu1 %v4716_v21  ;;  %8494 = vmatprep.mubr.msk.f32.mxu1 %vm9133_vm4, %v9132_v24 }
0x15c3   :  { %v4714_v4 = vmul.f32 %v9025_v3, %v9009_v35  ;;  %8502 = vmatprep.subr.mxu1 %v9132_v24 }
0x15c5   :  { %8495 = vmatmul.mubr.msk.f32.vlgmr.msra.gmra.mrb[58].mxu1 %vm432_vm5, %v4714_v4 }
0x15c6   :  { %v9027_v5 = vpop.eup %9026  ;;  %8503 = vmatpush3.msra.mxu1 %v9773_v16  ;;  %8504 = vmatprep.mubr.msk.f32.mxu1 %vm9133_vm4, %v9132_v24 }
0x15c7   :  { %v4892_v6 = vmul.f32 %v9027_v5, %v9011_v44  ;;  %v5383_v7 = vpop.xlane.xlu1 %5382  ;;  %8512 = vmatprep.subr.mxu1 %v9132_v24  ;;  %v3902_v44 = vld [vmem:[#allocation2 + $0x178] sm:$0xff]  ;;  %v5609_v5 = vld [vmem:[#allocation2 + $0x180] sm:$0xff] }
0x15c8   :  { %v8845_v43 = vpack.c.bf16 %v3902_v44, %v3901_v38 }
0x15c9   :  { %8505 = vmatmul.mubr.msk.f32.vlgmr.msra.gmra.mrb[60].mxu1 %vm432_vm5, %v4892_v6  ;;  %v5610_v6 = vld [vmem:[#allocation2 + $0x188] sm:$0xff] }
0x15ca   :  { %v9029_v9 = vpop.eup %9028  ;;  %8513 = vmatpush3.msra.mxu1 %v5057_v8  ;;  %8514 = vmatprep.mubr.msk.f32.mxu1 %vm9133_vm4, %v9132_v24  ;;  %v5611_v8 = vld [vmem:[#allocation2 + $0x190] sm:$0xff] }
0x15cb   :  { %v5054_v31 = vmul.f32 %v9029_v9, %v9858_v36  ;;  %v5222_v10 = vpop.permute.xlu1 %5221  ;;  %8522 = vmatprep.subr.mxu1 %v9132_v24  ;;  %8846 = vmatprep.subr.bf16.mxu0 %v8845_v43  ;;  %v5612_v9 = vld [vmem:[#allocation2 + $0x198] sm:$0xff] }
0x15cc   :  { %8848 = vmatpush3.bf16.msra.mxu0 %v8845_v43 }
0x15cd   :  { %8515 = vmatmul.mubr.msk.f32.vlgmr.msra.gmra.mrb[62].mxu1 %vm432_vm5, %v5054_v31  ;;  %v8853_v31 = vpack.c.bf16 %v5612_v9, %v5611_v8 }
0x15ce   :  { %8523 = vmatpush3.msra.mxu1 %v5222_v10  ;;  %8524 = vmatprep.mubr.msk.f32.mxu1 %vm9133_vm4, %v9132_v24  ;;  %v5619_v10 = vld [vmem:[#allocation2 + $0x1c0] sm:$0xff] }
0x15cf   :  { %8532 = vmatprep.subr.mxu1 %v9132_v24 }
0x15f0   :  { %v5218_v16 = vpop.xlane.xlu0 %5217 }
0x15f1   :  { %9030 = vrcp.f32 %v5218_v16  ;;  %v5620_v16 = vld [vmem:[#allocation2 + $0x1c8] sm:$0xff] }
0x15f2   :  { %9032 = vrcp.f32 %v5383_v7  ;;  %v8849_v7 = vpack.c.bf16 %v5610_v6, %v5609_v5 }
0x15f4   :  { %v5387_v17 = vpop.permute.xlu0 %5386 }
0x15fb   :  { %v9031_v11 = vpop.eup %9030 }
0x15fc   :  { %v5220_v12 = vmul.f32 %v9031_v11, %v9017_v46  ;;  %v9033_v15 = vpop.eup %9032  ;;  %v5614_v11 = vld [vmem:[#allocation2 + $0x1a0] sm:$0xff] }
0x15fd   :  { %v5385_v19 = vmul.f32 %v9033_v15, %v9862_v41  ;;  %v5615_v15 = vld [vmem:[#allocation2 + $0x1a8] sm:$0xff] }
0x15fe   :  { %8525 = vmatmul.mubr.msk.f32.vlgmr.msra.gmra.mrb[64].mxu1 %vm432_vm5, %v5220_v12  ;;  %v8865_v12 = vpack.c.bf16 %v5620_v16, %v5619_v10 }
0x15ff   :  { %8533 = vmatpush3.msra.mxu1 %v5387_v17  ;;  %8534 = vmatprep.mubr.msk.f32.mxu1 %vm9133_vm4, %v9132_v24  ;;  %v5621_v17 = vld [vmem:[#allocation2 + $0x1d0] sm:$0xff] }
0x1600   :  { %8850 = vmatprep.subr.bf16.mxu1 %v8849_v7 }
0x1602   :  { %8535 = vmatmul.mubr.msk.f32.vlgmr.msra.gmra.mrb[66].mxu1 %vm432_vm5, %v5385_v19  ;;  %v5622_v19 = vld [vmem:[#allocation2 + $0x1d8] sm:$0xff] }
0x1603   :  { %8556 = vmatprep.mubr.msk.f32.mxu1 %vm200_vm3, %v9908_v20  ;;  %8852 = vmatpush3.bf16.msra.mxu1 %v8849_v7 }
0x1604   :  { %8854 = vmatprep.subr.bf16.mxu1 %v8853_v31 }
0x1607   :  { %8856 = vmatpush3.bf16.msra.mxu1 %v8853_v31 }
0x1608   :  { %8866 = vmatprep.subr.bf16.mxu1 %v8865_v12 }
0x160a   :  { %8557 = vmatmul.mubr.msk.f32.vlgmr.msra.gmra.mrb[68].mxu1 %vm200_vm3, %v9079_v30 }
0x160b   :  { %8868 = vmatpush3.bf16.msra.mxu1 %v8865_v12  ;;  %8578 = vmatprep.mubr.msk.f32.mxu1 %vm200_vm3, %v9908_v20 }
0x163b   :  { %v4291_v22 = vpop.f32.mrb[52].mxu1 }
0x163c   :  { %v8466_v23 = vpop.f32.mrb[53].mxu1 }
0x163d   :  { %v5616_v23 = vld [vmem:[#allocation2 + $0x1b0] sm:$0xff] }
0x1690   :  { %v4457_v18 = vpop.f32.mrb[54].mxu1 }
0x1691   :  { %4792 = vrot.lane.b32.xlu1 %v4457_v18, %s9130_s14  ;;  %v8476_v28 = vpop.f32.mrb[55].mxu1  ;;  %v5617_v18 = vld [vmem:[#allocation2 + $0x1b8] sm:$0xff] }
0x1692   :  { %v8861_v28 = vpack.c.bf16 %v5617_v18, %v5616_v23 }
0x1694   :  { %v4622_v29 = vpop.f32.mrb[56].mxu1 }
0x1695   :  { %4796 = vrot.lane.b32.xlu0 %v4622_v29, %s9137_s3  ;;  %v8486_v25 = vpop.f32.mrb[57].mxu1  ;;  %v8869_v29 = vpack.c.bf16 %v5622_v19, %v5621_v17 }
0x1697   :  { %8870 = vmatprep.subr.bf16.mxu1 %v8869_v29 }
0x1698   :  { %v4787_v33 = vpop.f32.mrb[58].mxu1  ;;  %8872 = vmatpush3.bf16.msra.mxu1 %v8869_v29 }
0x1699   :  { %4800 = vrot.lane.b32.xlu0 %v4787_v33, %s9138_s27  ;;  %v8496_v34 = vpop.f32.mrb[59].mxu1  ;;  %8586 = vmatprep.subr.mxu1 %v9132_v24 }
0x169b   :  { %8579 = vmatmul.mubr.msk.f32.vlgmr.msra.gmra.mrb[70].mxu1 %vm200_vm3, %v9079_v30 }
0x169c   :  { %v4962_v27 = vpop.f32.mrb[60].mxu1  ;;  %8588 = vmatprep.mubr.msk.f32.mxu1 %vm9133_vm4, %v9132_v24 }
0x169d   :  { %v8506_v35 = vpop.f32.mrb[61].mxu1 }
0x16a0   :  { %v5128_v37 = vpop.f32.mrb[62].mxu1 }
0x16a1   :  { %5463 = vrot.lane.b32.xlu1 %v5128_v37, %s9130_s14  ;;  %v8516_v48 = vpop.f32.mrb[63].mxu1 }
0x16d1   :  { %v5293_v39 = vpop.f32.mrb[64].mxu1 }
0x16d2   :  { %5467 = vrot.lane.b32.xlu1 %v5293_v39, %s9137_s3  ;;  %v8526_v36 = vpop.f32.mrb[65].mxu1 }
0x16d5   :  { %v5458_v40 = vpop.f32.mrb[66].mxu1 }
0x16d6   :  { %5471 = vrot.lane.b32.xlu0 %v5458_v40, %s9138_s27  ;;  %v8536_v41 = vpop.f32.mrb[67].mxu1 }
0x1703   :  { %v4793_v42 = vpop.permute.xlu1 %4792 }
0x1704   :  { %v4803_v47 = vsel %vm432_vm5, %v4291_v22, %v4793_v42  ;;  %v8857_v22 = vpack.c.bf16 %v5615_v15, %v5614_v11  ;;  %v7795_v42 = vld [vmem:[%s10232_s9 + $0xb] ss:$0 sm:$0xff] }
0x1706   :  { %8858 = vmatprep.subr.bf16.mxu0 %v8857_v22 }
0x1707   :  { %v4797_v45 = vpop.permute.xlu0 %4796 }
0x1708   :  { %v4804_v49 = vsel %vm1102_vm8, %v4803_v47, %v4797_v45 }
0x170b   :  { %v4801_v50 = vpop.permute.xlu0 %4800 }
0x170c   :  { %v4805_v52 = vsel %vm1104_vm9, %v4804_v49, %v4801_v50  ;;  %v7796_v49 = vld [vmem:[%s10232_s9 + $0xc] ss:$0 sm:$0xff] }
0x170d   :  { %8545 = vmatprep.mubr.msk.f32.mxu0 %vm200_vm3, %v4805_v52 }
0x1713   :  { %v5464_v46 = vpop.permute.xlu1 %5463 }
0x1714   :  { %v5474_v54 = vsel %vm432_vm5, %v4962_v27, %v5464_v46 }
0x1744   :  { %v5468_v53 = vpop.permute.xlu1 %5467 }
0x1745   :  { %v5475_v55 = vsel %vm1102_vm8, %v5474_v54, %v5468_v53 }
0x1748   :  { %v5472_v56 = vpop.permute.xlu0 %5471 }
0x1749   :  { %v5476_v21 = vsel %vm1104_vm9, %v5475_v55, %v5472_v56  ;;  %v9974_v55 = vpop.f32.mrb[68].mxu1 }
0x174a   :  { %8546 = vmatmul.mubr.msk.f32.vlgmr.msra.gmra.mrb[56].mxu0 %vm200_vm3, %v5476_v21  ;;  %v9976_v56 = vpop.f32.mrb[69].mxu1 }
0x174b   :  { %8860 = vmatpush3.bf16.msra.mxu0 %v8857_v22  ;;  %8587 = vmatpush3.msra.mxu1 %v9976_v56 }
0x174c   :  { %8862 = vmatprep.subr.bf16.mxu0 %v8861_v28  ;;  %8596 = vmatprep.subr.mxu1 %v9132_v24 }
0x174f   :  { %8864 = vmatpush3.bf16.msra.mxu0 %v8861_v28 }
0x1750   :  { %8581 = vmatprep.subr.mxu0 %v9132_v24 }
0x176e   :  { %v8580_v21 = vpop.f32.mrb[70].mxu1 }
0x181d   :  { %v8547_v59 = vpop.f32.mrb[56].mxu0 }
0x181e   :  { %v5559_v60 = vadd.f32 %v8547_v59, %v7792_v57  ;;  %v5553_v61 = vpop.f32.mrb[57].mxu0 }
0x181f   :  { %v5554_v62 = vadd.f32 %v7792_v57, %v5553_v61  ;;  %v5851_v57 = vpop.f32.mrb[71].mxu1 }
0x1820   :  { %v9930_v58 = vadd.f32 %v5559_v60, %v9754_v14 }
0x1821   :  { %v9933_v63 = vadd.f32 %v5554_v62, %v9752_v13 }
0x1822   :  { %v5569_v0 = vsel %vm200_vm3, %v9930_v58, 0.0  ;;  %v5575_v4 = vmul.f32 %v9930_v58, %v9930_v58 }
0x1823   :  { %5570 = vadd.xlane.f32.xlu0 %v5569_v0  ;;  %v5566_v1 = vsel %vm200_vm3, %v9933_v63, 0.0  ;;  %v5574_v3 = vmul.f32 %v9933_v63, %v9933_v63 }
0x1824   :  { %5567 = vadd.xlane.f32.xlu1 %v5566_v1  ;;  %v5579_v13 = vsel %vm200_vm3, %v5575_v4, 0.0 }
0x1825   :  { %v5576_v14 = vsel %vm200_vm3, %v5574_v3, 0.0 }
0x1827   :  { %5577 = vadd.xlane.f32.xlu0 %v5576_v14 }
0x1828   :  { %5580 = vadd.xlane.f32.xlu1 %v5579_v13 }
0x1839   :  { %6020 = vrot.lane.b32.xlu1 %v5851_v57, %s9134_s5 }
0x18b0   :  { %v5571_v26 = vpop.xlane.xlu0 %5570 }
0x18b1   :  { %v5568_v25 = vpop.xlane.xlu1 %5567  ;;  %v5573_v32 = vmul.f32 0.03125, %v5571_v26 }
0x18b2   :  { %v5572_v33 = vmul.f32 0.03125, %v5568_v25 }
0x18b3   :  { %v5585_v37 = vmul.f32 %v5573_v32, %v5573_v32  ;;  %v5589_v41 = vsub.f32 %v9930_v58, %v5573_v32 }
0x18b4   :  { %v5584_v34 = vmul.f32 %v5572_v33, %v5572_v33  ;;  %v5578_v27 = vpop.xlane.xlu0 %5577  ;;  %v5588_v36 = vsub.f32 %v9933_v63, %v5572_v33 }
0x18b5   :  { %v5582_v35 = vmul.f32 0.03125, %v5578_v27  ;;  %v5581_v20 = vpop.xlane.xlu1 %5580 }
0x18b6   :  { %v5583_v48 = vmul.f32 0.03125, %v5581_v20 }
0x18b7   :  { %v5586_v38 = vsub.f32 %v5582_v35, %v5584_v34 }
0x18b8   :  { %v5587_v44 = vsub.f32 %v5583_v48, %v5585_v37 }
0x18b9   :  { %v5590_v43 = vadd.f32 1e-05, %v5586_v38  ;;  %v6021_v61 = vpop.permute.xlu1 %6020 }
0x18ba   :  { %v5591_v39 = vadd.f32 1e-05, %v5587_v44 }
0x18bb   :  { %9034 = vrsqrt.f32 %v5590_v43 }
0x18bc   :  { %9036 = vrsqrt.f32 %v5591_v39 }
0x18c5   :  { %v9035_v40 = vpop.eup %9034 }
0x18c6   :  { %v9037_v45 = vpop.eup %9036  ;;  %v5594_v47 = vmul.f32 %v9035_v40, %v5588_v36 }
0x18c7   :  { %v5595_v50 = vmul.f32 %v9037_v45, %v5589_v41 }
0x18c8   :  { %v5600_v52 = vmul.f32 %v7795_v42, %v5594_v47 }
0x18c9   :  { %v5601_v46 = vmul.f32 %v7795_v42, %v5595_v50 }
0x18ca   :  { %v9964_v53 = vadd.f32 %v7796_v49, %v5600_v52 }
0x18cb   :  { %v9966_v54 = vadd.f32 %v7796_v49, %v5601_v46 }
0x18cc   :  { %8567 = vmatprep.mubr.msk.f32.mxu0 %vm200_vm3, %v9964_v53 }
0x18cd   :  { %8568 = vmatmul.mubr.msk.f32.vlgmr.msra.gmra.mrb[58].mxu0 %vm200_vm3, %v9966_v54 }
0x18ce   :  { %8583 = vmatprep.mubr.msk.f32.mxu0 %vm9133_vm4, %v9132_v24 }
0x19a0   :  { %v8569_v59 = vpop.f32.mrb[58].mxu0 }
0x19a1   :  { %v5776_v60 = vpop.f32.mrb[59].mxu0 }
0x19a2   :  { %6022 = vrot.lane.b32.xlu0 %v5776_v60, %s9134_s5  ;;  %8582 = vmatpush3.xpose.msk.msra.mxu0 %vm432_vm5, %v5776_v60 }
0x19a3   :  { %6188 = vrot.lane.b32.xlu1 %v5776_v60, %s9135_s23  ;;  %8591 = vmatprep.subr.mxu0 %v9132_v24 }
0x19a5   :  { %8584 = vmatmul.mubr.msk.f32.vlgmr.msra.gmra.mrb[60].mxu0 %vm432_vm5, %v5851_v57 }
0x19a6   :  { %6186 = vrot.lane.b32.xlu0 %v5851_v57, %s9135_s23  ;;  %8593 = vmatprep.mubr.msk.f32.mxu0 %vm9133_vm4, %v9132_v24 }
0x19a7   :  { %6353 = vrot.lane.b32.xlu1 %v5776_v60, %s9136_s24 }
0x19aa   :  { %6351 = vrot.lane.b32.xlu0 %v5851_v57, %s9136_s24 }
0x19ab   :  { %6693 = vrot.lane.b32.xlu1 %v8569_v59, %s9134_s5 }
0x19ae   :  { %6691 = vrot.lane.b32.xlu0 %v8580_v21, %s9134_s5 }
0x19af   :  { %6859 = vrot.lane.b32.xlu1 %v8569_v59, %s9135_s23 }
0x19b2   :  { %6857 = vrot.lane.b32.xlu0 %v8580_v21, %s9135_s23 }
0x19b3   :  { %7024 = vrot.lane.b32.xlu1 %v8569_v59, %s9136_s24 }
0x19b6   :  { %7022 = vrot.lane.b32.xlu0 %v8580_v21, %s9136_s24 }
0x1a14   :  { %v6023_v62 = vpop.permute.xlu0 %6022 }
0x1a15   :  { %v6189_v58 = vpop.permute.xlu1 %6188  ;;  %8592 = vmatpush3.xpose.msk.msra.mxu0 %vm432_vm5, %v6023_v62 }
0x1a16   :  { %8601 = vmatprep.subr.mxu0 %v9132_v24 }
0x1a18   :  { %v6187_v63 = vpop.permute.xlu0 %6186  ;;  %8594 = vmatmul.mubr.msk.f32.vlgmr.msra.gmra.mrb[62].mxu0 %vm432_vm5, %v6021_v61 }
0x1a19   :  { %8602 = vmatpush3.xpose.msk.msra.mxu0 %vm432_vm5, %v6189_v58  ;;  %8603 = vmatprep.mubr.msk.f32.mxu0 %vm9133_vm4, %v9132_v24  ;;  %v6354_v0 = vpop.permute.xlu1 %6353 }
0x1a1a   :  { %8611 = vmatprep.subr.mxu0 %v9132_v24 }
0x1a1c   :  { %8604 = vmatmul.mubr.msk.f32.vlgmr.msra.gmra.mrb[64].mxu0 %vm432_vm5, %v6187_v63  ;;  %v6352_v1 = vpop.permute.xlu0 %6351 }
0x1a1d   :  { %8612 = vmatpush3.xpose.msk.msra.mxu0 %vm432_vm5, %v6354_v0  ;;  %8613 = vmatprep.mubr.msk.f32.mxu0 %vm9133_vm4, %v9132_v24  ;;  %v6694_v3 = vpop.permute.xlu1 %6693 }
0x1a1e   :  { %8621 = vmatprep.subr.mxu0 %v9132_v24 }
0x1a20   :  { %8614 = vmatmul.mubr.msk.f32.vlgmr.msra.gmra.mrb[66].mxu0 %vm432_vm5, %v6352_v1  ;;  %v6692_v4 = vpop.permute.xlu0 %6691 }
0x1a21   :  { %8622 = vmatpush3.xpose.msk.msra.mxu0 %vm432_vm5, %v8569_v59  ;;  %8623 = vmatprep.mubr.msk.f32.mxu0 %vm9133_vm4, %v9132_v24  ;;  %v6860_v14 = vpop.permute.xlu1 %6859 }
0x1a22   :  { %8631 = vmatprep.subr.mxu0 %v9132_v24 }
0x1a24   :  { %8624 = vmatmul.mubr.msk.f32.vlgmr.msra.gmra.mrb[68].mxu0 %vm432_vm5, %v8580_v21  ;;  %v6858_v13 = vpop.permute.xlu0 %6857 }
0x1a25   :  { %8632 = vmatpush3.xpose.msk.msra.mxu0 %vm432_vm5, %v6694_v3  ;;  %8633 = vmatprep.mubr.msk.f32.mxu0 %vm9133_vm4, %v9132_v24  ;;  %v7025_v5 = vpop.permute.xlu1 %7024 }
0x1a26   :  { %8641 = vmatprep.subr.mxu0 %v9132_v24 }
0x1a28   :  { %8634 = vmatmul.mubr.msk.f32.vlgmr.msra.gmra.mrb[70].mxu0 %vm432_vm5, %v6692_v4  ;;  %v7023_v6 = vpop.permute.xlu0 %7022 }
0x1a29   :  { %8642 = vmatpush3.xpose.msk.msra.mxu0 %vm432_vm5, %v6860_v14  ;;  %8643 = vmatprep.mubr.msk.f32.mxu0 %vm9133_vm4, %v9132_v24 }
0x1a2a   :  { %8651 = vmatprep.subr.mxu0 %v9132_v24 }
0x1a2c   :  { %8644 = vmatmul.mubr.msk.f32.vlgmr.msra.gmra.mrb[72].mxu0 %vm432_vm5, %v6858_v13 }
0x1a2d   :  { %8652 = vmatpush3.xpose.msk.msra.mxu0 %vm432_vm5, %v7025_v5  ;;  %8653 = vmatprep.mubr.msk.f32.mxu0 %vm9133_vm4, %v9132_v24 }
0x1a30   :  { %8654 = vmatmul.mubr.msk.f32.vlgmr.msra.gmra.mrb[74].mxu0 %vm432_vm5, %v7023_v6 }
0x1a78   :  { %v5932_v7 = vpop.f32.mrb[60].mxu0 }
0x1a79   :  { %v5933_v8 = vadd.f32 %v5932_v7, %v9581_v51  ;;  %v8585_v9 = vpop.f32.mrb[61].mxu0 }
0x1a7b   :  { %v5936_v31 = vsel %vm432_vm5, %v5933_v8, -inf }
0x1a7c   :  { %5937 = vmax.xlane.f32.xlu1 %v5936_v31 }
0x1aeb   :  { %v6094_v10 = vpop.f32.mrb[62].mxu0 }
0x1aec   :  { %v6095_v16 = vadd.f32 %v6094_v10, %v9581_v51  ;;  %v8595_v11 = vpop.f32.mrb[63].mxu0 }
0x1aee   :  { %v6098_v12 = vsel %vm432_vm5, %v6095_v16, -inf }
0x1aef   :  { %6099 = vmax.xlane.f32.xlu0 %v6098_v12  ;;  %v6260_v15 = vpop.f32.mrb[64].mxu0 }
0x1af0   :  { %v6261_v17 = vadd.f32 %v6260_v15, %v9581_v51  ;;  %v8605_v19 = vpop.f32.mrb[65].mxu0 }
0x1af2   :  { %v6264_v22 = vsel %vm432_vm5, %v6261_v17, -inf }
0x1af3   :  { %6265 = vmax.xlane.f32.xlu0 %v6264_v22  ;;  %v6425_v23 = vpop.f32.mrb[66].mxu0 }
0x1af4   :  { %v6426_v18 = vadd.f32 %v6425_v23, %v9581_v51  ;;  %v8615_v28 = vpop.f32.mrb[67].mxu0 }
0x1af6   :  { %v6429_v29 = vsel %vm432_vm5, %v6426_v18, -inf }
0x1af7   :  { %6430 = vmax.xlane.f32.xlu1 %v6429_v29  ;;  %v6603_v30 = vpop.f32.mrb[68].mxu0 }
0x1af8   :  { %v6604_v26 = vadd.f32 %v6603_v30, %v9593_v2  ;;  %v8625_v25 = vpop.f32.mrb[69].mxu0 }
0x1afa   :  { %v6607_v32 = vsel %vm432_vm5, %v6604_v26, -inf }
0x1afb   :  { %6608 = vmax.xlane.f32.xlu0 %v6607_v32  ;;  %v6765_v33 = vpop.f32.mrb[70].mxu0 }
0x1afc   :  { %v6766_v34 = vadd.f32 %v6765_v33, %v9593_v2  ;;  %v8635_v27 = vpop.f32.mrb[71].mxu0 }
0x1afe   :  { %v6769_v35 = vsel %vm432_vm5, %v6766_v34, -inf }
0x1aff   :  { %6770 = vmax.xlane.f32.xlu1 %v6769_v35  ;;  %v6931_v20 = vpop.f32.mrb[72].mxu0 }
0x1b00   :  { %v10042_v51 = vadd.f32 %v6931_v20, %v9593_v2  ;;  %v8645_v37 = vpop.f32.mrb[73].mxu0 }
0x1b02   :  { %v6935_v48 = vsel %vm432_vm5, %v10042_v51, -inf }
0x1b03   :  { %6936 = vmax.xlane.f32.xlu0 %v6935_v48  ;;  %v7096_v38 = vpop.f32.mrb[74].mxu0 }
0x1b04   :  { %v7097_v44 = vadd.f32 %v7096_v38, %v9593_v2  ;;  %v8655_v43 = vpop.f32.mrb[75].mxu0 }
0x1b06   :  { %v7100_v39 = vsel %vm432_vm5, %v7097_v44, -inf }
0x1b07   :  { %7101 = vmax.xlane.f32.xlu1 %v7100_v39 }
0x1b09   :  { %v5938_v36 = vpop.xlane.xlu1 %5937 }
0x1b0a   :  { %v5939_v40 = vsub.f32 %v5933_v8, %v5938_v36 }
0x1b0c   :  { %v5940_v41 = vmul.f32 1.442695, %v5939_v40 }
0x1b0e   :  { %9038 = vpow2.f32 %v5940_v41 }
0x1b18   :  { %6275 = vrot.lane.b32.xlu1 %v9976_v56, %s9135_s23  ;;  %v9039_v42 = vpop.eup %9038 }
0x1b19   :  { %6110 = vrot.lane.b32.xlu0 %v9976_v56, %s9134_s5  ;;  %v5942_v2 = vsel %vm432_vm5, %v9039_v42, 0.0 }
0x1b1c   :  { %6440 = vrot.lane.b32.xlu1 %v9976_v56, %s9136_s24 }
0x1b38   :  { %5943 = vadd.xlane.f32.xlu0 %v5942_v2 }
0x1b7c   :  { %v6100_v45 = vpop.xlane.xlu0 %6099 }
0x1b7d   :  { %v6101_v47 = vsub.f32 %v6095_v16, %v6100_v45 }
0x1b7f   :  { %v6102_v49 = vmul.f32 1.442695, %v6101_v47 }
0x1b80   :  { %v6266_v50 = vpop.xlane.xlu0 %6265 }
0x1b81   :  { %9040 = vpow2.f32 %v6102_v49  ;;  %v6267_v52 = vsub.f32 %v6261_v17, %v6266_v50 }
0x1b83   :  { %v6268_v46 = vmul.f32 1.442695, %v6267_v52 }
0x1b84   :  { %v6431_v21 = vpop.xlane.xlu1 %6430 }
0x1b85   :  { %9042 = vpow2.f32 %v6268_v46  ;;  %v6432_v57 = vsub.f32 %v6426_v18, %v6431_v21 }
0x1b87   :  { %v6433_v59 = vmul.f32 1.442695, %v6432_v57 }
0x1b88   :  { %v6609_v56 = vpop.xlane.xlu0 %6608 }
0x1b89   :  { %9044 = vpow2.f32 %v6433_v59  ;;  %v6610_v60 = vsub.f32 %v6604_v26, %v6609_v56  ;;  %v5624_v56 = vld [vmem:[#allocation2 + $0x1e0] sm:$0xff] }
0x1b8b   :  { %v9041_v61 = vpop.eup %9040  ;;  %v6611_v62 = vmul.f32 1.442695, %v6610_v60  ;;  %v5625_v60 = vld [vmem:[#allocation2 + $0x1e8] sm:$0xff] }
0x1b8c   :  { %v6771_v58 = vpop.xlane.xlu1 %6770  ;;  %v6104_v63 = vsel %vm432_vm5, %v9041_v61, 0.0 }
0x1b8d   :  { %9046 = vpow2.f32 %v6611_v62  ;;  %v6772_v0 = vsub.f32 %v6766_v34, %v6771_v58  ;;  %6105 = vadd.xlane.f32.xlu1 %v6104_v63  ;;  %v8873_v62 = vpack.c.bf16 %v5625_v60, %v5624_v56 }
0x1b8f   :  { %v9043_v1 = vpop.eup %9042  ;;  %v6773_v3 = vmul.f32 1.442695, %v6772_v0  ;;  %8874 = vmatprep.subr.bf16.mxu0 %v8873_v62 }
0x1b90   :  { %v6270_v4 = vsel %vm432_vm5, %v9043_v1, 0.0  ;;  %v6937_v12 = vpop.xlane.xlu0 %6936  ;;  %8876 = vmatpush3.bf16.msra.mxu0 %v8873_v62 }
0x1b91   :  { %9048 = vpow2.f32 %v6773_v3  ;;  %6271 = vadd.xlane.f32.xlu0 %v6270_v4  ;;  %v6938_v15 = vsub.f32 %v10042_v51, %v6937_v12  ;;  %v5626_v4 = vld [vmem:[#allocation2 + $0x1f0] sm:$0xff] }
0x1b93   :  { %v9045_v14 = vpop.eup %9044  ;;  %v6939_v17 = vmul.f32 1.442695, %v6938_v15 }
0x1b94   :  { %v7102_v13 = vpop.xlane.xlu1 %7101  ;;  %v6435_v5 = vsel %vm432_vm5, %v9045_v14, 0.0  ;;  %v6111_v19 = vpop.permute.xlu0 %6110 }
0x1b95   :  { %v7103_v6 = vsub.f32 %v7097_v44, %v7102_v13  ;;  %6436 = vadd.xlane.f32.xlu1 %v6435_v5 }
0x1b97   :  { %v9047_v7 = vpop.eup %9046  ;;  %v7104_v8 = vmul.f32 1.442695, %v7103_v6 }
0x1b98   :  { %v6613_v9 = vsel %vm432_vm5, %v9047_v7, 0.0  ;;  %v6276_v30 = vpop.permute.xlu1 %6275 }
0x1b99   :  { %9050 = vpow2.f32 %v7104_v8  ;;  %6614 = vadd.xlane.f32.xlu0 %v6613_v9 }
0x1b9a   :  { %9052 = vpow2.f32 %v6939_v17 }
0x1b9b   :  { %v10059_v31 = vpop.eup %9048 }
0x1b9c   :  { %v6775_v10 = vsel %vm432_vm5, %v10059_v31, 0.0  ;;  %v6441_v26 = vpop.permute.xlu1 %6440 }
0x1b9d   :  { %6776 = vadd.xlane.f32.xlu1 %v6775_v10 }
0x1ba3   :  { %v10063_v16 = vpop.eup %9050 }
0x1ba4   :  { %v7106_v11 = vsel %vm432_vm5, %v10063_v16, 0.0  ;;  %v9053_v23 = vpop.eup %9052 }
0x1ba5   :  { %7107 = vadd.xlane.f32.xlu1 %v7106_v11  ;;  %v6941_v18 = vsel %vm432_vm5, %v9053_v23, 0.0 }
0x1baf   :  { %6781 = vrot.lane.b32.xlu0 %v9974_v55, %s9134_s5 }
0x1bb6   :  { %6946 = vrot.lane.b32.xlu1 %v9974_v55, %s9135_s23 }
0x1bc5   :  { %v5944_v22 = vpop.xlane.xlu0 %5943 }
0x1bc6   :  { %9054 = vrcp.f32 %v5944_v22 }
0x1bce   :  { %6942 = vadd.xlane.f32.xlu0 %v6941_v18 }
0x1bd0   :  { %v9055_v28 = vpop.eup %9054 }
0x1bd1   :  { %v5946_v29 = vmul.f32 %v9055_v28, %v9039_v42  ;;  %v7827_v28 = vld [vmem:[%s10232_s9 + $0xd] ss:$0 sm:$0xff] }
0x1bd3   :  { %8589 = vmatmul.mubr.msk.f32.vlgmr.msra.gmra.mrb[72].mxu1 %vm432_vm5, %v5946_v29 }
0x1bd4   :  { %8597 = vmatpush3.msra.mxu1 %v6111_v19  ;;  %8598 = vmatprep.mubr.msk.f32.mxu1 %vm9133_vm4, %v9132_v24 }
0x1bd5   :  { %8606 = vmatprep.subr.mxu1 %v9132_v24 }
0x1be4   :  { %7111 = vrot.lane.b32.xlu0 %v9974_v55, %s9136_s24 }
0x1c1a   :  { %v6106_v25 = vpop.xlane.xlu1 %6105 }
0x1c1b   :  { %9056 = vrcp.f32 %v6106_v25 }
0x1c1e   :  { %v6272_v32 = vpop.xlane.xlu0 %6271 }
0x1c1f   :  { %9058 = vrcp.f32 %v6272_v32 }
0x1c22   :  { %v6437_v33 = vpop.xlane.xlu1 %6436 }
0x1c23   :  { %9060 = vrcp.f32 %v6437_v33 }
0x1c25   :  { %v9057_v34 = vpop.eup %9056 }
0x1c26   :  { %v6108_v27 = vmul.f32 %v9057_v34, %v9041_v61  ;;  %v6615_v35 = vpop.xlane.xlu0 %6614 }
0x1c27   :  { %9062 = vrcp.f32 %v6615_v35 }
0x1c28   :  { %8599 = vmatmul.mubr.msk.f32.vlgmr.msra.gmra.mrb[74].mxu1 %vm432_vm5, %v6108_v27 }
0x1c29   :  { %v9059_v20 = vpop.eup %9058  ;;  %8607 = vmatpush3.msra.mxu1 %v6276_v30  ;;  %8608 = vmatprep.mubr.msk.f32.mxu1 %vm9133_vm4, %v9132_v24 }
0x1c2a   :  { %v6274_v51 = vmul.f32 %v9059_v20, %v9043_v1  ;;  %v6777_v37 = vpop.xlane.xlu1 %6776  ;;  %8616 = vmatprep.subr.mxu1 %v9132_v24  ;;  %v6782_v36 = vpop.permute.xlu0 %6781 }
0x1c2b   :  { %9064 = vrcp.f32 %v6777_v37 }
0x1c2c   :  { %8609 = vmatmul.mubr.msk.f32.vlgmr.msra.gmra.mrb[76].mxu1 %vm432_vm5, %v6274_v51 }
0x1c2d   :  { %v9061_v48 = vpop.eup %9060  ;;  %8617 = vmatpush3.msra.mxu1 %v6441_v26  ;;  %8618 = vmatprep.mubr.msk.f32.mxu1 %vm9133_vm4, %v9132_v24 }
0x1c2e   :  { %v6439_v38 = vmul.f32 %v9061_v48, %v9045_v14  ;;  %8626 = vmatprep.subr.mxu1 %v9132_v24  ;;  %v5627_v14 = vld [vmem:[#allocation2 + $0x1f8] sm:$0xff]  ;;  %v7834_v48 = vld [vmem:[%s10230_s7 + $0x30] sm:$0xff] }
0x1c2f   :  { %v8877_v13 = vpack.c.bf16 %v5627_v14, %v5626_v4  ;;  %v7830_v4 = vld [vmem:[%s10232_s9 + $0xe] ss:$0 sm:$0xff] }
0x1c30   :  { %8619 = vmatmul.mubr.msk.f32.vlgmr.msra.gmra.mrb[78].mxu1 %vm432_vm5, %v6439_v38 }
0x1c31   :  { %v9063_v44 = vpop.eup %9062  ;;  %8627 = vmatpush3.msra.mxu1 %v9974_v55  ;;  %8628 = vmatprep.mubr.msk.f32.mxu1 %vm9133_vm4, %v9132_v24 }
0x1c32   :  { %v6617_v43 = vmul.f32 %v9063_v44, %v9047_v7  ;;  %v7108_v39 = vpop.xlane.xlu1 %7107  ;;  %8636 = vmatprep.subr.mxu1 %v9132_v24  ;;  %8878 = vmatprep.subr.bf16.mxu0 %v8877_v13  ;;  %v7835_v44 = vld [vmem:[%s10230_s7 + $0x38] sm:$0xff] }
0x1c33   :  { %8880 = vmatpush3.bf16.msra.mxu0 %v8877_v13 }
0x1c34   :  { %8629 = vmatmul.mubr.msk.f32.vlgmr.msra.gmra.mrb[80].mxu1 %vm432_vm5, %v6617_v43  ;;  %v8885_v43 = vpack.c.bf16 %v7835_v44, %v7834_v48  ;;  %v7569_v48 = vld [vmem:[%s10233_s10 + $0x10] sm:$0xff]  ;;  %v7570_v44 = vld [vmem:[%s10233_s10 + $0x18] sm:$0xff] }
0x1c35   :  { %v9065_v40 = vpop.eup %9064  ;;  %8637 = vmatpush3.msra.mxu1 %v6782_v36  ;;  %8638 = vmatprep.mubr.msk.f32.mxu1 %vm9133_vm4, %v9132_v24  ;;  %v7840_v36 = vld [vmem:[%s10231_s8 + $0x48] sm:$0xff] }
0x1c36   :  { %v6779_v41 = vmul.f32 %v9065_v40, %v10059_v31  ;;  %v6947_v42 = vpop.permute.xlu1 %6946  ;;  %8646 = vmatprep.subr.mxu1 %v9132_v24  ;;  %v7841_v40 = vld [vmem:[%s10231_s8 + $0x50] sm:$0xff] }
0x1c38   :  { %8639 = vmatmul.mubr.msk.f32.vlgmr.msra.gmra.mrb[82].mxu1 %vm432_vm5, %v6779_v41 }
0x1c39   :  { %8647 = vmatpush3.msra.mxu1 %v6947_v42  ;;  %8648 = vmatprep.mubr.msk.f32.mxu1 %vm9133_vm4, %v9132_v24  ;;  %v7842_v42 = vld [vmem:[%s10231_s8 + $0x58] sm:$0xff] }
0x1c3a   :  { %8656 = vmatprep.subr.mxu1 %v9132_v24 }
0x1c5b   :  { %v6943_v55 = vpop.xlane.xlu0 %6942 }
0x1c5c   :  { %9066 = vrcp.f32 %v6943_v55  ;;  %v8893_v55 = vpack.c.bf16 %v7842_v42, %v7841_v40 }
0x1c5d   :  { %9068 = vrcp.f32 %v7108_v39  ;;  %v7839_v39 = vld [vmem:[%s10231_s8 + $0x40] sm:$0xff] }
0x1c5e   :  { %v8889_v41 = vpack.c.bf16 %v7840_v36, %v7839_v39 }
0x1c5f   :  { %v7112_v49 = vpop.permute.xlu0 %7111 }
0x1c60   :  { %8890 = vmatprep.subr.bf16.mxu0 %v8889_v41 }
0x1c66   :  { %v9067_v2 = vpop.eup %9066 }
0x1c67   :  { %v6945_v45 = vmul.f32 %v9067_v2, %v9053_v23  ;;  %v9069_v47 = vpop.eup %9068  ;;  %v7843_v2 = vld [vmem:[%s10231_s8 + $0x60] sm:$0xff] }
0x1c68   :  { %v7110_v50 = vmul.f32 %v9069_v47, %v10063_v16 }
0x1c69   :  { %8649 = vmatmul.mubr.msk.f32.vlgmr.msra.gmra.mrb[84].mxu1 %vm432_vm5, %v6945_v45  ;;  %v7844_v45 = vld [vmem:[%s10231_s8 + $0x68] sm:$0xff] }
0x1c6a   :  { %8657 = vmatpush3.msra.mxu1 %v7112_v49  ;;  %8658 = vmatprep.mubr.msk.f32.mxu1 %vm9133_vm4, %v9132_v24  ;;  %v8897_v47 = vpack.c.bf16 %v7844_v45, %v7843_v2 }
0x1c6d   :  { %8659 = vmatmul.mubr.msk.f32.vlgmr.msra.gmra.mrb[86].mxu1 %vm432_vm5, %v7110_v50 }
0x1ca6   :  { %v6016_v52 = vpop.f32.mrb[72].mxu1 }
0x1ca7   :  { %v8590_v46 = vpop.f32.mrb[73].mxu1 }
0x1cfb   :  { %v6182_v21 = vpop.f32.mrb[74].mxu1 }
0x1cfc   :  { %6517 = vrot.lane.b32.xlu1 %v6182_v21, %s9130_s14  ;;  %v8600_v57 = vpop.f32.mrb[75].mxu1 }
0x1cff   :  { %v6347_v59 = vpop.f32.mrb[76].mxu1 }
0x1d00   :  { %6521 = vrot.lane.b32.xlu0 %v6347_v59, %s9137_s3  ;;  %v8610_v61 = vpop.f32.mrb[77].mxu1 }
0x1d03   :  { %v6512_v58 = vpop.f32.mrb[78].mxu1 }
0x1d04   :  { %6525 = vrot.lane.b32.xlu0 %v6512_v58, %s9138_s27  ;;  %v8620_v24 = vpop.f32.mrb[79].mxu1 }
0x1d07   :  { %v6687_v63 = vpop.f32.mrb[80].mxu1 }
0x1d08   :  { %v8630_v0 = vpop.f32.mrb[81].mxu1 }
0x1d0b   :  { %v6853_v1 = vpop.f32.mrb[82].mxu1 }
0x1d0c   :  { %7188 = vrot.lane.b32.xlu1 %v6853_v1, %s9130_s14  ;;  %v8640_v3 = vpop.f32.mrb[83].mxu1 }
0x1d3c   :  { %v7018_v5 = vpop.f32.mrb[84].mxu1 }
0x1d3d   :  { %7192 = vrot.lane.b32.xlu1 %v7018_v5, %s9137_s3  ;;  %v8650_v6 = vpop.f32.mrb[85].mxu1  ;;  %v7831_v5 = vld [vmem:[%s10232_s9 + $0xf] ss:$0 sm:$0xff] }
0x1d40   :  { %v7183_v7 = vpop.f32.mrb[86].mxu1 }
0x1d41   :  { %7196 = vrot.lane.b32.xlu0 %v7183_v7, %s9138_s27  ;;  %v8660_v8 = vpop.f32.mrb[87].mxu1 }
0x1d6e   :  { %v6518_v9 = vpop.permute.xlu1 %6517 }
0x1d6f   :  { %v6528_v10 = vsel %vm432_vm5, %v6016_v52, %v6518_v9 }
0x1d72   :  { %v6522_v31 = vpop.permute.xlu0 %6521 }
0x1d73   :  { %v6529_v16 = vsel %vm1102_vm8, %v6528_v10, %v6522_v31  ;;  %v7845_v10 = vld [vmem:[%s10231_s8 + $0x70] sm:$0xff] }
0x1d76   :  { %v6526_v11 = vpop.permute.xlu0 %6525 }
0x1d77   :  { %v6530_v12 = vsel %vm1104_vm9, %v6529_v16, %v6526_v11  ;;  %v7846_v16 = vld [vmem:[%s10231_s8 + $0x78] sm:$0xff] }
0x1d78   :  { %8669 = vmatprep.mubr.msk.f32.mxu0 %vm200_vm3, %v6530_v12  ;;  %v8901_v11 = vpack.c.bf16 %v7846_v16, %v7845_v10  ;;  %v7836_v12 = vld [vmem:[%s10232_s9 + $0x10] ss:$0 sm:$0xff] }
0x1d7e   :  { %v7189_v15 = vpop.permute.xlu1 %7188 }
0x1d7f   :  { %v7199_v19 = vsel %vm432_vm5, %v6687_v63, %v7189_v15 }
0x1daf   :  { %v7193_v17 = vpop.permute.xlu1 %7192 }
0x1db0   :  { %v7200_v22 = vsel %vm1102_vm8, %v7199_v19, %v7193_v17 }
0x1db3   :  { %v7197_v23 = vpop.permute.xlu0 %7196 }
0x1db4   :  { %v7201_v18 = vsel %vm1104_vm9, %v7200_v22, %v7197_v23 }
0x1db5   :  { %8670 = vmatmul.mubr.msk.f32.vlgmr.msra.gmra.mrb[76].mxu0 %vm200_vm3, %v7201_v18 }
0x1db6   :  { %8892 = vmatpush3.bf16.msra.mxu0 %v8889_v41 }
0x1db7   :  { %8894 = vmatprep.subr.bf16.mxu0 %v8893_v55 }
0x1dba   :  { %8896 = vmatpush3.bf16.msra.mxu0 %v8893_v55 }
0x1dbb   :  { %8898 = vmatprep.subr.bf16.mxu0 %v8897_v47 }
0x1dbe   :  { %8900 = vmatpush3.bf16.msra.mxu0 %v8897_v47 }
0x1dbf   :  { %8902 = vmatprep.subr.bf16.mxu0 %v8901_v11 }
0x1dc2   :  { %8904 = vmatpush3.bf16.msra.mxu0 %v8901_v11 }
0x1e88   :  { %v8671_v29 = vpop.f32.mrb[76].mxu0 }
0x1e89   :  { %v7284_v30 = vadd.f32 %v8671_v29, %v7827_v28  ;;  %v7278_v26 = vpop.f32.mrb[77].mxu0 }
0x1e8a   :  { %v7279_v25 = vadd.f32 %v7827_v28, %v7278_v26  ;;  %v7847_v28 = vld [vmem:[%s10232_s9 + $0x11] ss:$0 sm:$0xff] }
0x1e8b   :  { %v7288_v32 = vadd.f32 %v7284_v30, %v9966_v54  ;;  %v7832_v54 = vld [vmem:[%s10230_s7 + $0x20] sm:$0xff] }
0x1e8c   :  { %v7287_v33 = vadd.f32 %v7279_v25, %v9964_v53  ;;  %v7833_v53 = vld [vmem:[%s10230_s7 + $0x28] sm:$0xff] }
0x1e8d   :  { %v7294_v34 = vsel %vm200_vm3, %v7288_v32, 0.0  ;;  %v7300_v20 = vmul.f32 %v7288_v32, %v7288_v32  ;;  %v8881_v38 = vpack.c.bf16 %v7833_v53, %v7832_v54  ;;  %v7567_v54 = vld [vmem:[%s10233_s10] sm:$0xff]  ;;  %v7568_v53 = vld [vmem:[%s10233_s10 + $0x8] sm:$0xff] }
0x1e8e   :  { %7295 = vadd.xlane.f32.xlu0 %v7294_v34  ;;  %v7291_v27 = vsel %vm200_vm3, %v7287_v33, 0.0  ;;  %v7299_v35 = vmul.f32 %v7287_v33, %v7287_v33 }
0x1e8f   :  { %7292 = vadd.xlane.f32.xlu1 %v7291_v27  ;;  %v7304_v37 = vsel %vm200_vm3, %v7300_v20, 0.0  ;;  %8882 = vmatprep.subr.bf16.mxu1 %v8881_v38 }
0x1e90   :  { %v7301_v51 = vsel %vm200_vm3, %v7299_v35, 0.0  ;;  %8884 = vmatpush3.bf16.msra.mxu1 %v8881_v38  ;;  %v8905_v38 = vpack.c.bf16 %v7568_v53, %v7567_v54 }
0x1e91   :  { %8886 = vmatprep.subr.bf16.mxu1 %v8885_v43 }
0x1e92   :  { %7302 = vadd.xlane.f32.xlu0 %v7301_v51 }
0x1e93   :  { %7305 = vadd.xlane.f32.xlu1 %v7304_v37 }
0x1e94   :  { %8888 = vmatpush3.bf16.msra.mxu1 %v8885_v43  ;;  %v8909_v43 = vpack.c.bf16 %v7570_v44, %v7569_v48 }
0x1e95   :  { %8906 = vmatprep.subr.bf16.mxu1 %v8905_v38 }
0x1f1b   :  { %v7296_v49 = vpop.xlane.xlu0 %7295 }
0x1f1c   :  { %v7293_v50 = vpop.xlane.xlu1 %7292  ;;  %v7298_v52 = vmul.f32 0.03125, %v7296_v49 }
0x1f1d   :  { %v7297_v46 = vmul.f32 0.03125, %v7293_v50 }
0x1f1e   :  { %v7310_v60 = vmul.f32 %v7298_v52, %v7298_v52  ;;  %v7314_v3 = vsub.f32 %v7288_v32, %v7298_v52 }
0x1f1f   :  { %v7309_v21 = vmul.f32 %v7297_v46, %v7297_v46  ;;  %v7303_v57 = vpop.xlane.xlu0 %7302  ;;  %v7313_v0 = vsub.f32 %v7287_v33, %v7297_v46 }
0x1f20   :  { %v7307_v59 = vmul.f32 0.03125, %v7303_v57  ;;  %v7306_v56 = vpop.xlane.xlu1 %7305 }
0x1f21   :  { %v7308_v61 = vmul.f32 0.03125, %v7306_v56 }
0x1f22   :  { %v7311_v62 = vsub.f32 %v7307_v59, %v7309_v21 }
0x1f23   :  { %v7312_v58 = vsub.f32 %v7308_v61, %v7310_v60  ;;  %v7850_v60 = vld [vmem:[%s10232_s9 + $0x12] ss:$0 sm:$0xff] }
0x1f24   :  { %v7315_v24 = vadd.f32 1e-05, %v7311_v62 }
0x1f25   :  { %v7316_v63 = vadd.f32 1e-05, %v7312_v58 }
0x1f26   :  { %9070 = vrsqrt.f32 %v7315_v24  ;;  %v7851_v24 = vld [vmem:[%s10232_s9 + $0x13] ss:$0 sm:$0xff]  ;;  %s9102_s9 = scalar_lea.vmem %s7667_s19, 256 }
0x1f27   :  { %9072 = vrsqrt.f32 %v7316_v63  ;;  %p9103_p8 = scmp.ne.s32.totalorder %s7667_s19, %s9102_s9  ;;  %p9108_p10 = scmp.lt.s32.totalorder %s9102_s9, %s9102_s9 }
0x1f29   :  { %p9109_p11 = por %p9108_p10, %p9107_p9 }
0x1f2b   :  { %p9110_p12 = pnand %p9109_p11, %p9103_p8 }
0x1f30   :  { %v9071_v1 = vpop.eup %9070 }
0x1f31   :  { %v9073_v14 = vpop.eup %9072  ;;  %v7319_v13 = vmul.f32 %v9071_v1, %v7313_v0 }
0x1f32   :  { %v7320_v6 = vmul.f32 %v9073_v14, %v7314_v3 }
0x1f33   :  { %v7325_v7 = vmul.f32 %v7830_v4, %v7319_v13 }
0x1f34   :  { %v7326_v8 = vmul.f32 %v7830_v4, %v7320_v6  ;;  %v7852_v4 = vld [vmem:[%s10234_s11] ss:$0 sm:$0xff] }
0x1f35   :  { %v7331_v9 = vadd.f32 %v7831_v5, %v7325_v7 }
0x1f36   :  { %v7332_v31 = vadd.f32 %v7831_v5, %v7326_v8 }
0x1f37   :  { %8680 = vmatprep.mubr.msk.f32.mxu1 %vm200_vm3, %v7331_v9 }
0x1f38   :  { %8681 = vmatmul.mubr.msk.f32.vlgmr.msra.gmra.mrb[88].mxu1 %vm200_vm3, %v7332_v31 }
0x1f39   :  { %8908 = vmatpush3.bf16.msra.mxu1 %v8905_v38 }
0x1f3a   :  { %8910 = vmatprep.subr.bf16.mxu1 %v8909_v43 }
0x1f3d   :  { %8912 = vmatpush3.bf16.msra.mxu1 %v8909_v43 }
0x200b   :  { %v8682_v15 = vpop.f32.mrb[88].mxu1 }
0x200c   :  { %v7421_v17 = vadd.f32 %v8682_v15, %v7836_v12  ;;  %v7415_v19 = vpop.f32.mrb[89].mxu1 }
0x200d   :  { %v7416_v22 = vadd.f32 %v7836_v12, %v7415_v19 }
0x200e   :  { %v7425_v18 = vmax.f32 %v7421_v17, 0.0 }
0x200f   :  { %v7424_v23 = vmax.f32 %v7416_v22, 0.0 }
0x2011   :  { %8699 = vmatprep.mubr.msk.f32.mxu0 %vm82_vm0, %v7424_v23 }
0x2012   :  { %8700 = vmatmul.mubr.msk.f32.vlgmr.msra.gmra.mrb[78].mxu0 %vm82_vm0, %v7425_v18 }
0x20e5   :  { %v8701_v29 = vpop.f32.mrb[78].mxu0 }
0x20e6   :  { %v7518_v30 = vadd.f32 %v8701_v29, %v7847_v28  ;;  %v7512_v26 = vpop.f32.mrb[79].mxu0 }
0x20e7   :  { %v7513_v25 = vadd.f32 %v7847_v28, %v7512_v26 }
0x20e8   :  { %v7522_v32 = vadd.f32 %v7518_v30, %v7332_v31 }
0x20e9   :  { %v7521_v33 = vadd.f32 %v7513_v25, %v7331_v9 }
0x20ea   :  { %v7528_v34 = vsel %vm200_vm3, %v7522_v32, 0.0  ;;  %v7534_v27 = vmul.f32 %v7522_v32, %v7522_v32 }
0x20eb   :  { %7529 = vadd.xlane.f32.xlu1 %v7528_v34  ;;  %v7525_v35 = vsel %vm200_vm3, %v7521_v33, 0.0  ;;  %v7533_v20 = vmul.f32 %v7521_v33, %v7521_v33 }
0x20ec   :  { %7526 = vadd.xlane.f32.xlu0 %v7525_v35  ;;  %v7538_v51 = vsel %vm200_vm3, %v7534_v27, 0.0 }
0x20ed   :  { %v7535_v37 = vsel %vm200_vm3, %v7533_v20, 0.0 }
0x20ef   :  { %7539 = vadd.xlane.f32.xlu1 %v7538_v51 }
0x20f0   :  { %7536 = vadd.xlane.f32.xlu0 %v7535_v37 }
0x2178   :  { %v7530_v39 = vpop.xlane.xlu1 %7529 }
0x2179   :  { %v7532_v36 = vmul.f32 0.03125, %v7530_v39  ;;  %v7527_v40 = vpop.xlane.xlu0 %7526 }
0x217a   :  { %v7531_v41 = vmul.f32 0.03125, %v7527_v40 }
0x217b   :  { %v7544_v55 = vmul.f32 %v7532_v36, %v7532_v36  ;;  %v7548_v57 = vsub.f32 %v7522_v32, %v7532_v36 }
0x217c   :  { %v7540_v42 = vpop.xlane.xlu1 %7539  ;;  %v7543_v47 = vmul.f32 %v7531_v41, %v7531_v41  ;;  %v7547_v56 = vsub.f32 %v7521_v33, %v7531_v41 }
0x217d   :  { %v7542_v2 = vmul.f32 0.03125, %v7540_v42  ;;  %v7537_v45 = vpop.xlane.xlu0 %7536 }
0x217e   :  { %v7541_v49 = vmul.f32 0.03125, %v7537_v45 }
0x217f   :  { %v7546_v50 = vsub.f32 %v7542_v2, %v7544_v55 }
0x2180   :  { %v7545_v52 = vsub.f32 %v7541_v49, %v7543_v47 }
0x2181   :  { %v7550_v46 = vadd.f32 1e-05, %v7546_v50 }
0x2182   :  { %v7549_v21 = vadd.f32 1e-05, %v7545_v52 }
0x2183   :  { %9074 = vrsqrt.f32 %v7550_v46 }
0x2184   :  { %9076 = vrsqrt.f32 %v7549_v21 }
0x218d   :  { %v9075_v59 = vpop.eup %9074 }
0x218e   :  { %v9077_v61 = vpop.eup %9076  ;;  %v7554_v62 = vmul.f32 %v9075_v59, %v7548_v57 }
0x218f   :  { %v7553_v58 = vmul.f32 %v9077_v61, %v7547_v56 }
0x2190   :  { %v7560_v63 = vmul.f32 %v7850_v60, %v7554_v62 }
0x2191   :  { %v7559_v0 = vmul.f32 %v7850_v60, %v7553_v58 }
0x2192   :  { %v7566_v3 = vadd.f32 %v7851_v24, %v7560_v63 }
0x2193   :  { %v7565_v1 = vadd.f32 %v7851_v24, %v7559_v0 }
0x2195   :  { %8710 = vmatprep.mubr.msk.f32.mxu1 %vm200_vm3, %v7565_v1 }
0x2196   :  { %8711 = vmatmul.mubr.msk.f32.vlgmr.msra.gmra.mrb[90].mxu1 %vm200_vm3, %v7566_v3 }
0x2269   :  { %v8712_v14 = vpop.f32.mrb[90].mxu1 }
0x226a   :  { %v7656_v13 = vadd.f32 %v8712_v14, %v7852_v4  ;;  %v7650_v5 = vpop.f32.mrb[91].mxu1 }
0x226b   :  { %v7651_v6 = vadd.f32 %v7852_v4, %v7650_v5 }
0x226c   :  { %7660 = vst [vmem:[#allocation5 + $0x8] sm:$0xff] %v7656_v13 }
0x226d   :  { %7659 = vst [vmem:[#allocation5] sm:$0xff] %v7651_v6 }
0x226e   :  { %9113 = shalt.err (!%p9110_p12)
}
0x226f   :  { %s9114_s11 = scalar_lea.hbm %s10235_s12, 256 }
0x2270   :  { %p9115_p13 = scmp.ne.s32.totalorder %s10235_s12, %s9114_s11  ;;  %p9118_p0 = scmp.lt.u32.totalorder %s9114_s11, %s10235_s12 }
0x2272   :  { %p9120_p1 = pnand %p9118_p0, %p9115_p13 }
0x2274   :  { %9123 = shalt.err (!%p9120_p1)
}
0x2275   :  { %7672 = dma.vmem_to_hbm [thread:$0]  %s7667_s19, 256, %s10235_s12, [#allocation4], %s9129_s13, %s9129_s13, %s9130_s14  }
0x2276   :  { %9126 = dma.done.wait [#allocation4], 256  }
0x2277   :  { %9127 = vsyncadd [#allocation4], 4294967040 }
0x2278   :  { %7676 = vsyncpa [#allocation3], 1 }
0x2279   :  { %7677 = vsyncpa [#allocation4], 1 }

</bundles_post_ra>
